<compile_context>
chip_gen: v7x
topology: tpu7x:2x2x1
jax: 0.10.0
libtpu: 0.0.40
codegen_flags: <defaults>
</compile_context>

<pallas_src>
import jax
import jax.numpy as jnp
from jax import lax
from jax.experimental import pallas as pl
from jax.experimental.pallas import tpu as pltpu


# --------------------------------------------------------------------------
# Kernel
# --------------------------------------------------------------------------
def _mlp_normalize_kernel(h_ref, te_ref, w1h_ref, w1t_ref, b1_ref,
                          w2_ref, b2_ref, w3_ref, b3_ref, o_ref, acc_ref):
    """One (batch tile, K chunk) step of
    Linear -> ReLU -> Linear -> ReLU -> Linear -> L2-normalize.

    Layer 1 is reduced across the K grid axis into the f32 accumulator; the
    rest of the network runs only on the last K step of each batch tile.
    """
    k = pl.program_id(1)
    nk = pl.num_programs(1)

    @pl.when(k == 0)
    def _():
        acc_ref[...] = jnp.zeros_like(acc_ref)

    # Streamed layer-1 partial product for this K chunk of h / W1_h.
    # h arrives as f32 and is cast on the VPU (slack under the MXU), so the
    # wrapper never runs a separate cast pass over HBM.
    acc_ref[...] += jnp.dot(h_ref[...].astype(w1h_ref.dtype), w1h_ref[...],
                            preferred_element_type=jnp.float32)

    @pl.when(k == nk - 1)
    def _():
        # t_emb contribution: concat([h, t_emb]) @ W1 == h @ W1_h + t_emb @ W1_t.
        # Added once per batch tile (not once per K step).
        h1 = acc_ref[...] + jnp.dot(te_ref[...].astype(w1t_ref.dtype),
                                    w1t_ref[...],
                                    preferred_element_type=jnp.float32)
        h1 = jnp.maximum(h1 + b1_ref[...], 0.0)    # ReLU (Dropout = identity)

        # Layer 2
        h2 = jnp.dot(h1.astype(w2_ref.dtype), w2_ref[...],
                     preferred_element_type=jnp.float32)
        h2 = jnp.maximum(h2 + b2_ref[...], 0.0)    # ReLU (Dropout = identity)

        # Layer 3
        y = jnp.dot(h2.astype(w3_ref.dtype), w3_ref[...],
                    preferred_element_type=jnp.float32) + b3_ref[...]

        # F.normalize(y, dim=-1): y / max(||y||_2, eps), eps = 1e-12.
        # rsqrt(max(sum(y^2), eps^2)) == 1 / max(||y||, eps); single EUP op.
        sq = jnp.sum(y * y, axis=-1, keepdims=True)
        inv_norm = lax.rsqrt(jnp.maximum(sq, 1e-24))
        o_ref[...] = (y * inv_norm).astype(o_ref.dtype)


# --------------------------------------------------------------------------
# Generation-aware defaults
# --------------------------------------------------------------------------
def _vmem_capacity_bytes():
    try:
        info = pltpu.get_tpu_info()
        cap = getattr(info, "vmem_capacity_bytes", None)
        if cap:
            return int(cap)
    except Exception:
        pass
    return 64 << 20  # conservative fallback (v7x physical VMEM)


def _default_block_b(vmem_cap):
    # v7x (64 MiB VMEM, ~3.2 TB/s HBM): ~512 rows clears the streamed-W1
    # roofline with headroom.  128-MiB parts (v5e/v6e) can afford more rows,
    # which amortizes W1 HBM re-reads and MXU weight-tile pushes.
    return 512 if vmem_cap <= (64 << 20) else 768


def _pick_block_k(h_dim, target=512):
    """Largest 128-aligned divisor of h_dim not exceeding `target`."""
    if h_dim <= target:
        return h_dim
    start = max(128, target - (target % 128))
    for bk in range(start, 0, -128):
        if h_dim % bk == 0:
            return bk
    return h_dim


# --------------------------------------------------------------------------
# One-time parameter preparation (hoisted out of the hot path)
# --------------------------------------------------------------------------
def prepare_params(params, h_dim, compute_dtype=jnp.bfloat16):
    """Pre-split W1 into (W1_h, W1_t) and pre-cast weights to bf16 ONCE so the
    per-forward slice+convert HBM pass disappears.  Biases stay f32 (epilogue
    runs in f32)."""
    return {
        "time_embed": params["time_embed"],                       # (T, t_dim) f32
        "w1_h": params["w1"][:h_dim, :].astype(compute_dtype),    # (h_dim, H1)
        "w1_t": params["w1"][h_dim:, :].astype(compute_dtype),    # (t_dim, H1)
        "b1": params["b1"],                                       # (1, H1) f32
        "w2": params["w2"].astype(compute_dtype),                 # (H1, H2)
        "b2": params["b2"],                                       # (1, H2) f32
        "w3": params["w3"].astype(compute_dtype),                 # (H2, out)
        "b3": params["b3"],                                       # (1, out) f32
    }


# --------------------------------------------------------------------------
# Forward
# --------------------------------------------------------------------------
def h_to_clip_joint_forward(h, t, prepared, *, block_b=None, block_k=512):
    """HToCLIPJoint.forward (eval mode) on prepared (pre-split / pre-cast)
    params.

    h: (B, h_dim) float32;  t: (B,) int32 timestep indices.
    Weights are stored transposed vs. PyTorch, i.e. (in_dim, out_dim).
    """
    time_embed = prepared["time_embed"]
    w1_h, w1_t = prepared["w1_h"], prepared["w1_t"]
    b1, w2, b2, w3, b3 = (prepared["b1"], prepared["w2"], prepared["b2"],
                          prepared["w3"], prepared["b3"])

    B, h_dim = h.shape
    t_dim = time_embed.shape[1]
    hidden1 = w1_h.shape[1]
    out_dim = w3.shape[1]

    # Embedding lookup stays in plain JAX (tiny gather); its concat with h is
    # eliminated because W1 is pre-split.
    t_emb = jnp.take(time_embed, t, axis=0)                  # (B, t_dim) f32

    vmem_cap = _vmem_capacity_bytes()
    if block_b is None:
        block_b = _default_block_b(vmem_cap)
    block_b = min(block_b, B)
    block_k = _pick_block_k(h_dim, block_k)

    # Grid: batch tiles ("parallel", sharded across v7x's two TCs) x K chunks
    # of the layer-1 reduction ("arbitrary", accumulator in scratch).
    grid = (pl.cdiv(B, block_b), h_dim // block_k)

    def resident_spec(arr):
        # Grid-invariant weights / biases: single-buffer (a second VMEM copy
        # of a block that never changes is pure waste).
        return pl.BlockSpec(arr.shape, lambda i, k: (0, 0),
                            pipeline_mode=pl.Buffered(1))

    return pl.pallas_call(
        _mlp_normalize_kernel,
        out_shape=jax.ShapeDtypeStruct((B, out_dim), jnp.float32),
        grid_spec=pltpu.PrefetchScalarGridSpec(
            num_scalar_prefetch=0,
            grid=grid,
            in_specs=[
                # f32 activations; cast happens inside the kernel.
                pl.BlockSpec((block_b, block_k), lambda i, k: (i, k)),   # h
                pl.BlockSpec((block_b, t_dim), lambda i, k: (i, 0)),     # t_emb
                # Streamed W1_h chunks (default double-buffered pipeline).
                pl.BlockSpec((block_k, hidden1), lambda i, k: (k, 0)),   # W1_h
                resident_spec(w1_t), resident_spec(b1),
                resident_spec(w2), resident_spec(b2),
                resident_spec(w3), resident_spec(b3),
            ],
            out_specs=pl.BlockSpec((block_b, out_dim), lambda i, k: (i, 0)),
            scratch_shapes=[pltpu.VMEM((block_b, hidden1), jnp.float32)],
        ),
        compiler_params=pltpu.CompilerParams(
            dimension_semantics=("parallel", "arbitrary"),
            # ~85% of physical VMEM (~109 MiB on v5e/v6e, ~54 MiB on v7x).
            vmem_limit_bytes=int(vmem_cap * 0.85),
        ),
    )(h, t_emb, w1_h, w1_t, b1, w2, b2, w3, b3)


# --------------------------------------------------------------------------
# Parameter init + self-test
# --------------------------------------------------------------------------
def init_params(key, *, h_dim, t_dim, hidden1, hidden2, out_dim,
                num_timesteps):
    """Deterministic synthetic parameters (shapes mirror the nn.Module)."""
    ks = jax.random.split(key, 7)
    scale = 0.02
    return {
        "time_embed": scale * jax.random.normal(
            ks[0], (num_timesteps, t_dim), jnp.float32),
        "w1": scale * jax.random.normal(
            ks[1], (h_dim + t_dim, hidden1), jnp.float32),
        "b1": scale * jax.random.normal(ks[2], (1, hidden1), jnp.float32),
        "w2": scale * jax.random.normal(
            ks[3], (hidden1, hidden2), jnp.float32),
        "b2": scale * jax.random.normal(ks[4], (1, hidden2), jnp.float32),
        "w3": scale * jax.random.normal(
            ks[5], (hidden2, out_dim), jnp.float32),
        "b3": scale * jax.random.normal(ks[6], (1, out_dim), jnp.float32),
    }


def _reference(h, t, params):
    """Pure-JAX reference of the same math (bf16 operands, f32 accumulation).
    Note: validates against the kernel's bf16-operand precision choice, not
    the f32 PyTorch module."""
    cd = jnp.bfloat16
    t_emb = jnp.take(params["time_embed"], t, axis=0)
    x = jnp.concatenate([h, t_emb], axis=-1).astype(cd)
    a1 = jnp.maximum(
        jnp.dot(x, params["w1"].astype(cd),
                preferred_element_type=jnp.float32) + params["b1"], 0.0)
    a2 = jnp.maximum(
        jnp.dot(a1.astype(cd), params["w2"].astype(cd),
                preferred_element_type=jnp.float32) + params["b2"], 0.0)
    y = jnp.dot(a2.astype(cd), params["w3"].astype(cd),
                preferred_element_type=jnp.float32) + params["b3"]
    return y * lax.rsqrt(
        jnp.maximum(jnp.sum(y * y, axis=-1, keepdims=True), 1e-24))


if __name__ == "__main__":
    # Small shapes consistent with the module (orig: 8192+128 -> 4096 -> 2048
    # -> 512, 50 timesteps), scaled down but keeping the structure.  The
    # explicit block sizes give a (2 batch tiles) x (2 K chunks) grid, which
    # exercises the streamed-W1 accumulator and both pl.when phases.
    B = 512
    H_DIM = 256
    T_DIM = 128
    HIDDEN1 = 512
    HIDDEN2 = 256
    OUT_DIM = 128
    NUM_TIMESTEPS = 50

    key = jax.random.PRNGKey(0)
    k_param, k_h, k_t = jax.random.split(key, 3)

    params = init_params(
        k_param, h_dim=H_DIM, t_dim=T_DIM, hidden1=HIDDEN1,
        hidden2=HIDDEN2, out_dim=OUT_DIM, num_timesteps=NUM_TIMESTEPS)
    prepared = prepare_params(params, H_DIM)   # one-time, outside the hot path

    h = jax.random.normal(k_h, (B, H_DIM), jnp.float32)
    t = jax.random.randint(k_t, (B,), 0, NUM_TIMESTEPS, jnp.int32)

    ref = _reference(h, t, params)

    # 1) Explicit small tiles: 2 batch tiles x 2 K chunks.
    out = h_to_clip_joint_forward(h, t, prepared, block_b=256, block_k=128)
    out = jax.block_until_ready(out)
    assert out.shape == (B, OUT_DIM)
    assert out.dtype == jnp.float32
    err = float(jnp.max(jnp.abs(out - ref)))
    assert jnp.allclose(out, ref, atol=1e-2, rtol=1e-2), err

    # 2) Generation-aware defaults (block_b / block_k / vmem picked per chip).
    out2 = h_to_clip_joint_forward(h, t, prepared)
    out2 = jax.block_until_ready(out2)
    err2 = float(jnp.max(jnp.abs(out2 - ref)))
    assert jnp.allclose(out2, ref, atol=1e-2, rtol=1e-2), err2

    print("KERNEL_OK")
</pallas_src>

<mosaic_0001>
module attributes {stable_mosaic.version = 11 : i64} {
  func.func @_mlp_normalize_kernel(%arg0: i32, %arg1: i32, %arg2: memref<256x128xf32, #tpu.memory_space<vmem>>, %arg3: memref<256x128xf32, #tpu.memory_space<vmem>>, %arg4: memref<128x512xbf16, #tpu.memory_space<vmem>>, %arg5: memref<128x512xbf16, #tpu.memory_space<vmem>>, %arg6: memref<1x512xf32, #tpu.memory_space<vmem>>, %arg7: memref<512x256xbf16, #tpu.memory_space<vmem>>, %arg8: memref<1x256xf32, #tpu.memory_space<vmem>>, %arg9: memref<256x128xbf16, #tpu.memory_space<vmem>>, %arg10: memref<1x128xf32, #tpu.memory_space<vmem>>, %arg11: memref<256x128xf32, #tpu.memory_space<vmem>>, %arg12: memref<256x512xf32, #tpu.memory_space<vmem>>) attributes {dimension_semantics = [#tpu.dimension_semantics<parallel>, #tpu.dimension_semantics<arbitrary>], iteration_bounds = array<i64: 2, 2>, scalar_prefetch = 0 : i64, scratch_operands = 1 : i64, tpu.core_type = #tpu.core_type<tc>, window_params = [{transform_indices = @transform_0, window_bounds = array<i64: 256, 128>}, {transform_indices = @transform_1, window_bounds = array<i64: 256, 128>}, {transform_indices = @transform_2, window_bounds = array<i64: 128, 512>}, {pipeline_mode = #tpu.pipeline_mode<synchronous>, transform_indices = @transform_3, window_bounds = array<i64: 128, 512>}, {pipeline_mode = #tpu.pipeline_mode<synchronous>, transform_indices = @transform_4, window_bounds = array<i64: 1, 512>}, {pipeline_mode = #tpu.pipeline_mode<synchronous>, transform_indices = @transform_5, window_bounds = array<i64: 512, 256>}, {pipeline_mode = #tpu.pipeline_mode<synchronous>, transform_indices = @transform_6, window_bounds = array<i64: 1, 256>}, {pipeline_mode = #tpu.pipeline_mode<synchronous>, transform_indices = @transform_7, window_bounds = array<i64: 256, 128>}, {pipeline_mode = #tpu.pipeline_mode<synchronous>, transform_indices = @transform_8, window_bounds = array<i64: 1, 128>}, {transform_indices = @transform_9, window_bounds = array<i64: 256, 128>}]} {
    %c0_i32 = arith.constant 0 : i32
    %0 = arith.cmpi eq, %arg1, %c0_i32 : i32
    %1 = arith.extui %0 : i1 to i32
    %c0_i32_0 = arith.constant 0 : i32
    %2 = arith.cmpi ne, %1, %c0_i32_0 : i32
    scf.if %2 {
      %cst_9 = arith.constant 0.000000e+00 : f32
      %13 = vector.broadcast %cst_9 : f32 to vector<256x512xf32>
      %c0_10 = arith.constant 0 : index
      %c0_11 = arith.constant 0 : index
      %14 = vector.load %arg12[%c0_10, %c0_11] : memref<256x512xf32, #tpu.memory_space<vmem>>, vector<256x512xf32>
      tpu.vector_store %arg12[%c0_10, %c0_11], %13 {strides = array<i32>} : memref<256x512xf32, #tpu.memory_space<vmem>>, vector<256x512xf32>,
    } else {
    }
    %c0 = arith.constant 0 : index
    %c0_1 = arith.constant 0 : index
    %3 = vector.load %arg12[%c0, %c0_1] : memref<256x512xf32, #tpu.memory_space<vmem>>, vector<256x512xf32>
    %c0_2 = arith.constant 0 : index
    %c0_3 = arith.constant 0 : index
    %4 = vector.load %arg2[%c0_2, %c0_3] : memref<256x128xf32, #tpu.memory_space<vmem>>, vector<256x128xf32>
    %5 = arith.truncf %4 : vector<256x128xf32> to vector<256x128xbf16>
    %c0_4 = arith.constant 0 : index
    %c0_5 = arith.constant 0 : index
    %6 = vector.load %arg4[%c0_4, %c0_5] : memref<128x512xbf16, #tpu.memory_space<vmem>>, vector<128x512xbf16>
    %cst = arith.constant dense<0.000000e+00> : vector<256x512xf32>
    %7 = tpu.matmul %5, %6, %cst {dimension_numbers = #tpu.dot_dimension_numbers<[1], [0], [0], [1], [0, 0, 1, 1], [], []>} : vector<256x128xbf16>, vector<128x512xbf16>, vector<256x512xf32> -> vector<256x512xf32>
    %8 = arith.addf %3, %7 : vector<256x512xf32>
    %c0_6 = arith.constant 0 : index
    %c0_7 = arith.constant 0 : index
    %9 = vector.load %arg12[%c0_6, %c0_7] : memref<256x512xf32, #tpu.memory_space<vmem>>, vector<256x512xf32>
    tpu.vector_store %arg12[%c0_6, %c0_7], %8 {strides = array<i32>} : memref<256x512xf32, #tpu.memory_space<vmem>>, vector<256x512xf32>,
    %c1_i32 = arith.constant 1 : i32
    %10 = arith.cmpi eq, %arg1, %c1_i32 : i32
    %11 = arith.extui %10 : i1 to i32
    %c0_i32_8 = arith.constant 0 : i32
    %12 = arith.cmpi ne, %11, %c0_i32_8 : i32
    scf.if %12 {
      %c0_9 = arith.constant 0 : index
      %c0_10 = arith.constant 0 : index
      %13 = vector.load %arg12[%c0_9, %c0_10] : memref<256x512xf32, #tpu.memory_space<vmem>>, vector<256x512xf32>
      %c0_11 = arith.constant 0 : index
      %c0_12 = arith.constant 0 : index
      %14 = vector.load %arg3[%c0_11, %c0_12] : memref<256x128xf32, #tpu.memory_space<vmem>>, vector<256x128xf32>
      %15 = arith.truncf %14 : vector<256x128xf32> to vector<256x128xbf16>
      %c0_13 = arith.constant 0 : index
      %c0_14 = arith.constant 0 : index
      %16 = vector.load %arg5[%c0_13, %c0_14] : memref<128x512xbf16, #tpu.memory_space<vmem>>, vector<128x512xbf16>
      %cst_15 = arith.constant dense<0.000000e+00> : vector<256x512xf32>
      %17 = tpu.matmul %15, %16, %cst_15 {dimension_numbers = #tpu.dot_dimension_numbers<[1], [0], [0], [1], [0, 0, 1, 1], [], []>} : vector<256x128xbf16>, vector<128x512xbf16>, vector<256x512xf32> -> vector<256x512xf32>
      %18 = arith.addf %13, %17 : vector<256x512xf32>
      %c0_16 = arith.constant 0 : index
      %c0_17 = arith.constant 0 : index
      %19 = vector.load %arg6[%c0_16, %c0_17] : memref<1x512xf32, #tpu.memory_space<vmem>>, vector<1x512xf32>
      %20 = vector.broadcast %19 : vector<1x512xf32> to vector<256x512xf32>
      %21 = arith.addf %18, %20 : vector<256x512xf32>
      %cst_18 = arith.constant 0.000000e+00 : f32
      %22 = vector.broadcast %cst_18 : f32 to vector<256x512xf32>
      %23 = arith.maximumf %21, %22 : vector<256x512xf32>
      %24 = arith.truncf %23 : vector<256x512xf32> to vector<256x512xbf16>
      %c0_19 = arith.constant 0 : index
      %c0_20 = arith.constant 0 : index
      %25 = vector.load %arg7[%c0_19, %c0_20] : memref<512x256xbf16, #tpu.memory_space<vmem>>, vector<512x256xbf16>
      %cst_21 = arith.constant dense<0.000000e+00> : vector<256x256xf32>
      %26 = tpu.matmul %24, %25, %cst_21 {dimension_numbers = #tpu.dot_dimension_numbers<[1], [0], [0], [1], [0, 0, 1, 1], [], []>} : vector<256x512xbf16>, vector<512x256xbf16>, vector<256x256xf32> -> vector<256x256xf32>
      %c0_22 = arith.constant 0 : index
      %c0_23 = arith.constant 0 : index
      %27 = vector.load %arg8[%c0_22, %c0_23] : memref<1x256xf32, #tpu.memory_space<vmem>>, vector<1x256xf32>
      %28 = vector.broadcast %27 : vector<1x256xf32> to vector<256x256xf32>
      %29 = arith.addf %26, %28 : vector<256x256xf32>
      %cst_24 = arith.constant 0.000000e+00 : f32
      %30 = vector.broadcast %cst_24 : f32 to vector<256x256xf32>
      %31 = arith.maximumf %29, %30 : vector<256x256xf32>
      %32 = arith.truncf %31 : vector<256x256xf32> to vector<256x256xbf16>
      %c0_25 = arith.constant 0 : index
      %c0_26 = arith.constant 0 : index
      %33 = vector.load %arg9[%c0_25, %c0_26] : memref<256x128xbf16, #tpu.memory_space<vmem>>, vector<256x128xbf16>
      %cst_27 = arith.constant dense<0.000000e+00> : vector<256x128xf32>
      %34 = tpu.matmul %32, %33, %cst_27 {dimension_numbers = #tpu.dot_dimension_numbers<[1], [0], [0], [1], [0, 0, 1, 1], [], []>} : vector<256x256xbf16>, vector<256x128xbf16>, vector<256x128xf32> -> vector<256x128xf32>
      %c0_28 = arith.constant 0 : index
      %c0_29 = arith.constant 0 : index
      %35 = vector.load %arg10[%c0_28, %c0_29] : memref<1x128xf32, #tpu.memory_space<vmem>>, vector<1x128xf32>
      %36 = vector.broadcast %35 : vector<1x128xf32> to vector<256x128xf32>
      %37 = arith.addf %34, %36 : vector<256x128xf32>
      %38 = arith.mulf %37, %37 : vector<256x128xf32>
      %cst_30 = arith.constant dense<0.000000e+00> : vector<256xf32>
      %39 = vector.multi_reduction <add>, %38, %cst_30 [1] : vector<256x128xf32> to vector<256xf32>
      %40 = vector.shape_cast %39 : vector<256xf32> to vector<256x1xf32>
      %cst_31 = arith.constant 1.000000e-24 : f32
      %41 = vector.broadcast %cst_31 : f32 to vector<256x1xf32>
      %42 = arith.maximumf %40, %41 : vector<256x1xf32>
      %43 = math.rsqrt %42 : vector<256x1xf32>
      %44 = vector.broadcast %43 : vector<256x1xf32> to vector<256x128xf32>
      %45 = arith.mulf %37, %44 : vector<256x128xf32>
      %c0_32 = arith.constant 0 : index
      %c0_33 = arith.constant 0 : index
      %46 = vector.load %arg11[%c0_32, %c0_33] : memref<256x128xf32, #tpu.memory_space<vmem>>, vector<256x128xf32>
      tpu.vector_store %arg11[%c0_32, %c0_33], %45 {strides = array<i32>} : memref<256x128xf32, #tpu.memory_space<vmem>>, vector<256x128xf32>,
    } else {
    }
    return
  }
  func.func @transform_0(%arg0: i32, %arg1: i32) -> (i32, i32) {
    %c0_i32 = arith.constant 0 : i32
    return %arg0, %arg1 : i32, i32
  }
  func.func @transform_1(%arg0: i32, %arg1: i32) -> (i32, i32) {
    %c0_i32 = arith.constant 0 : i32
    %c0_i32_0 = arith.constant 0 : i32
    return %arg0, %c0_i32 : i32, i32
  }
  func.func @transform_2(%arg0: i32, %arg1: i32) -> (i32, i32) {
    %c0_i32 = arith.constant 0 : i32
    %c0_i32_0 = arith.constant 0 : i32
    return %arg1, %c0_i32 : i32, i32
  }
  func.func @transform_3(%arg0: i32, %arg1: i32) -> (i32, i32) {
    %c0_i32 = arith.constant 0 : i32
    %c0_i32_0 = arith.constant 0 : i32
    %c0_i32_1 = arith.constant 0 : i32
    return %c0_i32, %c0_i32_0 : i32, i32
  }
  func.func @transform_4(%arg0: i32, %arg1: i32) -> (i32, i32) {
    %c0_i32 = arith.constant 0 : i32
    %c0_i32_0 = arith.constant 0 : i32
    %c0_i32_1 = arith.constant 0 : i32
    return %c0_i32, %c0_i32_0 : i32, i32
  }
  func.func @transform_5(%arg0: i32, %arg1: i32) -> (i32, i32) {
    %c0_i32 = arith.constant 0 : i32
    %c0_i32_0 = arith.constant 0 : i32
    %c0_i32_1 = arith.constant 0 : i32
    return %c0_i32, %c0_i32_0 : i32, i32
  }
  func.func @transform_6(%arg0: i32, %arg1: i32) -> (i32, i32) {
    %c0_i32 = arith.constant 0 : i32
    %c0_i32_0 = arith.constant 0 : i32
    %c0_i32_1 = arith.constant 0 : i32
    return %c0_i32, %c0_i32_0 : i32, i32
  }
  func.func @transform_7(%arg0: i32, %arg1: i32) -> (i32, i32) {
    %c0_i32 = arith.constant 0 : i32
    %c0_i32_0 = arith.constant 0 : i32
    %c0_i32_1 = arith.constant 0 : i32
    return %c0_i32, %c0_i32_0 : i32, i32
  }
  func.func @transform_8(%arg0: i32, %arg1: i32) -> (i32, i32) {
    %c0_i32 = arith.constant 0 : i32
    %c0_i32_0 = arith.constant 0 : i32
    %c0_i32_1 = arith.constant 0 : i32
    return %c0_i32, %c0_i32_0 : i32, i32
  }
  func.func @transform_9(%arg0: i32, %arg1: i32) -> (i32, i32) {
    %c0_i32 = arith.constant 0 : i32
    %c0_i32_0 = arith.constant 0 : i32
    return %arg0, %c0_i32 : i32, i32
  }
}

</mosaic_0001>

<bundles_post_ra>
// kernel: tpu_custom_call.1
= control target key start
LH: loop header
LB: loop body
LE: loop exit
PB: predicated region body
PF: predicated region fallthrough
CT: control target
= control target key end

     0   :  { %s7169_s0 = inlined_call_operand.hbm [shape: f32[512,256], index: 0, kind: input, shape index: {}]   ;;  %s7170_s1 = inlined_call_operand.hbm [shape: f32[512,128], index: 1, kind: input, shape index: {}]   ;;  %s7171_s2 = inlined_call_operand.hbm [shape: bf16[256,512], index: 2, kind: input, shape index: {}]   ;;  %s7172_s3 = inlined_call_operand.hbm [shape: bf16[128,512], index: 3, kind: input, shape index: {}]   ;;  %s7173_s4 = inlined_call_operand.vmem [shape: f32[1,512], index: 4, kind: input, shape index: {}]   ;;  %s7174_s5 = inlined_call_operand.hbm [shape: bf16[512,256], index: 5, kind: input, shape index: {}]   ;;  %s7175_s6 = inlined_call_operand.vmem [shape: f32[1,256], index: 6, kind: input, shape index: {}]   ;;  %s7176_s7 = inlined_call_operand.hbm [shape: bf16[256,128], index: 7, kind: input, shape index: {}]   ;;  %s7177_s8 = inlined_call_operand.vmem [shape: f32[1,128], index: 8, kind: input, shape index: {}]   ;;  %s7178_s9 = inlined_call_operand.hbm [shape: f32[512,128], index: 9, kind: output, shape index: {}]  }
   0x1   :  { %7207 = sst [smem:[#allocation31_spill]] %s7170_s1 }
   0x2   :  { %7208 = sst [smem:[#allocation32_spill]] %s7171_s2 }
   0x3   :  { %7209 = sst [smem:[#allocation33_spill]] %s7172_s3 }
   0x4   :  { %7210 = sst [smem:[#allocation34_spill]] %s7173_s4 }
   0x5   :  { %7211 = sst [smem:[#allocation35_spill]] %s7174_s5 }
   0x6   :  { %7212 = sst [smem:[#allocation36_spill]] %s7175_s6 }
   0x7   :  { %7213 = sst [smem:[#allocation37_spill]] %s7176_s7 }
   0x8   :  { %7214 = sst [smem:[#allocation38_spill]] %s7177_s8 }
   0x9   :  { %7215 = sst [smem:[#allocation39_spill]] %s7178_s9 }
   0xa   :  { %14 = vsyncpa [#allocation4], 0 }
   0xb   :  { %16 = vsyncpa [#allocation4 + $0x1], 0 }
   0xc   :  { %17 = vsyncpa [#allocation7], 0 }
   0xd   :  { %19 = vsyncpa [#allocation7 + $0x1], 0 }
   0xe   :  { %20 = vsyncpa [#allocation10], 0 }
   0xf   :  { %21 = vsyncpa [#allocation13], 0 }
  0x10   :  { %22 = vsyncpa [#allocation5], 0 }
  0x11   :  { %24 = vsyncpa [#allocation5 + $0x1], 0  ;;  %s5729_s30 = smov 0   ;;  %s5731_s10 = smov 0  }
  0x12   :  { %s5733_s11 = smov 0   ;;  %s5735_s12 = smov 0  }
  0x13   :  { %s5737_s13 = smov 0   ;;  %s5739_s14 = smov 0  }
  0x14   :  { %s5741_s15 = smov 0   ;;  %s5743_s16 = smov 0  }
  0x15   :  { %s5745_s17 = smov 0   ;;  %s5747_s18 = smov 0  }
  0x16   :  { %s5749_s19 = smov 0   ;;  %s5751_s20 = smov 0  }
  0x17   :  { %s5753_s21 = smov 0   ;;  %s5755_s22 = smov 0  }
  0x18 LB: > { %7216 = sst [smem:[#allocation21_spill]] %s5619_s12  ;;  %s5800_s23 = sadd.s32 4294967295, %s5659_s22   ;;  %s5659_s22 = sphi %s5755_s22, %s30_s22   ;;  %s5655_s21 = sphi %s5753_s21, %s7299_s21   ;;  %s5651_s20 = sphi %s5751_s20, %s7298_s20   ;;  %s5647_s19 = sphi %s5749_s19, %s7297_s19   ;;  %s5643_s18 = sphi %s5747_s18, %s7296_s18   ;;  %s5639_s17 = sphi %s5745_s17, %s7295_s17   ;;  %s5635_s16 = sphi %s5743_s16, %s7294_s16   ;;  %s5631_s15 = sphi %s5741_s15, %s7293_s15   ;;  %s5627_s14 = sphi %s5739_s14, %s7292_s14   ;;  %s5623_s13 = sphi %s5737_s13, %s7291_s13   ;;  %s5619_s12 = sphi %s5735_s12, %s7286_s12   ;;  %s5615_s11 = sphi %s5733_s11, %s7290_s11   ;;  %s5611_s10 = sphi %s5731_s10, %s7289_s10   ;;  %s5607_s30 = sphi %s5729_s30, %s7288_s30  }
  0x19   : > { %7217 = sst [smem:[#allocation22_spill]] %s5623_s13  ;;  %p4436_p0 = scmp.ge.s32.totalorder %s5659_s22, 1 }
  0x1a   : > { %7218 = sst [smem:[#allocation23_spill]] %s5643_s18  ;;  %p7180_p1 = scmp.eq.s32.totalorder %s5800_s23, 0 }
  0x1b   : > { %7219 = sst [smem:[#allocation24_spill]] %s5647_s19  ;;  %p279_p3 = scmp.lt.s32.totalorder %s5659_s22, 5 }
  0x1c   : > { %s5661_s25 = smov [#allocation9]   ;;  %s7223_s3 = sld [smem:[#allocation33_spill]] }
  0x1d   : > { %p5806_p4 = pnand %p4436_p0, %p279_p3  ;;  %s291_s26 = sshll.u32 %s5661_s25, 4  ;;  %s292_s26 = int_to_ptr.vmem [resolvable:$true] %s291_s26 }
  0x1f   : > { %s7220_s24 = scalar_select %p5806_p4, 1, 0 }
  0x20   : > { %p4893_p5 = pneg %p5806_p4 }
  0x21   : > { %7221 = sst [smem:[#allocation25_spill]] %s7220_s24 }
  0x22   : > { %p5814_p6 = pnand %p4893_p5, %p7180_p1  ;;  %s5323_s9 = scalar_lea.hbm %s7223_s3, 4096 }
  0x23   : > { %p5324_p7 = scmp.ne.s32.totalorder %s7223_s3, %s5323_s9  ;;  %p5330_p11 = scmp.lt.u32.totalorder %s5323_s9, %s7223_s3 }
  0x24   : > { %s7222_s27 = scalar_select %p5814_p6, 1, 0 }
  0x25   : > { %p5826_p8 = pneg %p5814_p6 }
  0x27   : > { %p5326_p9 = pnand %p5826_p8, %p5324_p7 }
  0x29   : > { %p5327_p10 = pneg %p5326_p9 }
  0x2b   : > { %p5332_p12 = pnand %p5330_p11, %p5327_p10 }
  0x2d   : > { %5335 = shalt.err (!%p5332_p12)
}
  0x2e   : > { %s5336_s28 = scalar_lea.vmem %s292_s26, 4096  ;;  %p5344_p5 = scmp.lt.s32.totalorder %s292_s26, %s292_s26 }
  0x2f   : > { %p5337_p13 = scmp.ne.s32.totalorder %s292_s26, %s5336_s28  ;;  %p5345_p2 = scmp.lt.s32.totalorder %s5336_s28, %s5336_s28 }
  0x31   : > { %p5339_p0 = pnand %p5337_p13, %p5826_p8  ;;  %p5346_p1 = por %p5345_p2, %p5344_p5 }
  0x33   : > { %p5340_p3 = pneg %p5339_p0 }
  0x35   : > { %p5347_p4 = pnand %p5346_p1, %p5340_p3 }
  0x37   : > { %5350 = shalt.err (!%p5347_p4)
}
  0x38   : > { %s7184_s8 = smov 256   ;;  %s7183_s4 = smov 16  }
  0x39   : > { %4896 = dma.hbm_to_vmem [thread:$0]  (!%p5814_p6), %s7223_s3, 4096, %s292_s26, [#allocation10], %s7184_s8, %s7184_s8, %s7183_s4  }
  0x3a   : > { %s4435_s19 = sadd.s32 4294967294, %s5659_s22   ;;  %p7195_p1 = scmp.eq.s32.totalorder %s5659_s22, 0 }
  0x3b   : > { %p84_p2 = scmp.ne.s32.totalorder %s5627_s14, %s5623_s13  ;;  %p90_p4 = scmp.ne.s32.totalorder %s5623_s13, %s5619_s12 }
  0x3c   : > { %p272_p7 = scmp.eq.s32.totalorder %s4435_s19, 3  ;;  %p7226_p10 = scmp.eq.s32.totalorder %s5800_s23, 0 }
  0x3d   : > { %p5855_p9 = por %p84_p2, %p7195_p1  ;;  %p7229_p12 = scmp.eq.s32.totalorder %s5800_s23, 3 }
  0x3e   : > { %p5861_p11 = por %p90_p4, %p7226_p10  ;;  %p5871_p0 = por %p272_p7, %p90_p4 }
  0x3f   : > { %p5867_p13 = por %p7229_p12, %p84_p2  ;;  %p7194_p3 = scmp.lt.s32.totalorder %s5659_s22, 4 }
  0x40   : > { %s7227_s24 = scalar_select %p5861_p11, 1, 0 }
  0x41   : > { %s7230_s26 = scalar_select %p5867_p13, 1, 0 }
  0x42   : > { %7228 = sst [smem:[#allocation26_spill]] %s7227_s24  ;;  %s363_s9 = sand.u32 1, %s5659_s22  }
  0x43   : > { %7231 = sst [smem:[#allocation27_spill]] %s7230_s26  ;;  %s365_s19 = sand.u32 1, %s5627_s14  }
  0x44   : > { %s7232_s6 = scalar_select %p5871_p0, 1, 0 }
  0x45   : > { %s4445_s4 = sshll.u32 %s365_s19, 8  ;;  %s4613_s8 = sshll.u32 %s5655_s21, 12 }
  0x46   : > { %7233 = sst [smem:[#allocation28_spill]] %s7232_s6  ;;  %s7234_s1 = sld [smem:[#allocation31_spill]] }
  0x47   : > { %s367_s12 = scalar_lea.vmem [#allocation6], %s4445_s4  ;;  %p5890_p5 = pnand %p7194_p3, %p5855_p9 }
  0x48   : > { %s374_s26 = sshll.u32 %s367_s12, 4  ;;  %s5664_s19 = smov [#allocation11]   ;;  %s5884_s26 = int_to_ptr.vmem [resolvable:$true] %s374_s26 }
  0x49   : > { %s5894_s29 = sshll.u32 %s5664_s19, 4  ;;  %p5353_p4 = pneg %p5890_p5  ;;  %s308_s29 = int_to_ptr.vmem [resolvable:$true] %s5894_s29 }
  0x4c   : > { %s5882_s3 = scalar_lea.hbm %s7234_s1, %s4613_s8  ;;  %s5896_s8 = scalar_lea.sflag [#allocation7], %s363_s9 }
  0x4d   : > { %s5351_s28 = scalar_lea.hbm %s5882_s3, 4096  ;;  %s5356_s4 = scalar_lea.hbm %s7234_s1, 8192 }
  0x4e   : > { %p5352_p2 = scmp.ne.s32.totalorder %s5882_s3, %s5351_s28  ;;  %p5357_p9 = scmp.lt.u32.totalorder %s5882_s3, %s7234_s1 }
  0x4f   : > { %p5358_p12 = scmp.lt.u32.totalorder %s5356_s4, %s5351_s28  ;;  %p5360_p1 = scmp.lt.u32.totalorder %s5351_s28, %s5882_s3 }
  0x50   : > { %p5354_p7 = pnand %p5353_p4, %p5352_p2 }
  0x51   : > { %p5359_p3 = por %p5358_p12, %p5357_p9 }
  0x52   : > { %p5355_p10 = pneg %p5354_p7 }
  0x53   : > { %p5361_p0 = por %p5360_p1, %p5359_p3 }
  0x55   : > { %p5362_p13 = pnand %p5361_p0, %p5355_p10 }
  0x57   : > { %5365 = shalt.err (!%p5362_p13)
}
  0x58   : > { %s5366_s9 = scalar_lea.vmem %s5884_s26, 4096  ;;  %s5665_s19 = smov [#allocation6]  }
  0x59   : > { %p5367_p2 = scmp.ne.s32.totalorder %s5884_s26, %s5366_s9  ;;  %s5371_s12 = sshll.u32 %s5665_s19, 4  ;;  %s5372_s12 = int_to_ptr.vmem [resolvable:$false] %s5371_s12 }
  0x5a   : > { %s5373_s13 = scalar_lea.vmem %s5372_s12, 8192  ;;  %p5374_p6 = scmp.lt.s32.totalorder %s5884_s26, %s5372_s12 }
  0x5b   : > { %p5369_p7 = pnand %p5367_p2, %p5353_p4  ;;  %p5375_p9 = scmp.lt.s32.totalorder %s5373_s13, %s5366_s9 }
  0x5d   : > { %p5370_p11 = pneg %p5369_p7  ;;  %p5376_p12 = por %p5375_p9, %p5374_p6 }
  0x5f   : > { %p5377_p1 = pnand %p5376_p12, %p5370_p11 }
  0x61   : > { %5380 = shalt.err (!%p5377_p1)
}
  0x62   : > { %s7201_s24 = smov 128   ;;  %s7202_s28 = smov 8  }
  0x63   : > { %4909 = dma.hbm_to_vmem [thread:$0]  (!%p5890_p5), %s5882_s3, 4096, %s5884_s26, %s5896_s8, %s7201_s24, %s7201_s24, %s7202_s28  }
  0x64   : > { %s5668_s18 = smov [#allocation12]   ;;  %s7236_s5 = sld [smem:[#allocation35_spill]] }
  0x65   : > { %s323_s4 = sshll.u32 %s5668_s18, 4  ;;  %s324_s4 = int_to_ptr.vmem [resolvable:$true] %s323_s4 }
  0x6a   : > { %s5381_s12 = scalar_lea.hbm %s7236_s5, 8192 }
  0x6b   : > { %p5382_p6 = scmp.ne.s32.totalorder %s7236_s5, %s5381_s12  ;;  %p5388_p0 = scmp.lt.u32.totalorder %s5381_s12, %s7236_s5 }
  0x6d   : > { %p5384_p11 = pnand %p5382_p6, %p5826_p8 }
  0x6f   : > { %p5385_p13 = pneg %p5384_p11 }
  0x71   : > { %p5390_p3 = pnand %p5388_p0, %p5385_p13 }
  0x73   : > { %5393 = shalt.err (!%p5390_p3)
}
  0x74   : > { %s5394_s3 = scalar_lea.vmem %s308_s29, 8192  ;;  %p5402_p2 = scmp.lt.s32.totalorder %s308_s29, %s308_s29 }
  0x75   : > { %p5395_p5 = scmp.ne.s32.totalorder %s308_s29, %s5394_s3  ;;  %p5403_p7 = scmp.lt.s32.totalorder %s5394_s3, %s5394_s3 }
  0x77   : > { %p5397_p4 = pnand %p5395_p5, %p5826_p8  ;;  %p5404_p9 = por %p5403_p7, %p5402_p2 }
  0x79   : > { %p5398_p10 = pneg %p5397_p4 }
  0x7b   : > { %p5405_p12 = pnand %p5404_p9, %p5398_p10 }
  0x7d   : > { %5408 = shalt.err (!%p5405_p12)
}
  0x7e   : > { %p7237_p1 = scmp.ne.s32.totalorder %s7222_s27, 0  ;;  %s7238_s7 = sld [smem:[#allocation37_spill]] }
  0x80   : > { %4899 = dma.hbm_to_vmem [thread:$0]  (!%p7237_p1), %s7236_s5, 8192, %s308_s29, [#allocation10], %s7201_s24, %s7201_s24, %s7202_s28  }
  0x84   : > { %s5409_s9 = scalar_lea.hbm %s7238_s7, 2048 }
  0x85   : > { %p5410_p6 = scmp.ne.s32.totalorder %s7238_s7, %s5409_s9  ;;  %p5416_p0 = scmp.lt.u32.totalorder %s5409_s9, %s7238_s7 }
  0x87   : > { %p5412_p11 = pnand %p5410_p6, %p5826_p8 }
  0x89   : > { %p5413_p13 = pneg %p5412_p11 }
  0x8b   : > { %p5418_p3 = pnand %p5416_p0, %p5413_p13 }
  0x8d   : > { %5421 = shalt.err (!%p5418_p3)
}
  0x8e   : > { %s5422_s3 = scalar_lea.vmem %s324_s4, 2048  ;;  %p5430_p2 = scmp.lt.s32.totalorder %s324_s4, %s324_s4 }
  0x8f   : > { %p5423_p5 = scmp.ne.s32.totalorder %s324_s4, %s5422_s3  ;;  %p5431_p7 = scmp.lt.s32.totalorder %s5422_s3, %s5422_s3 }
  0x91   : > { %p5425_p4 = pnand %p5423_p5, %p5826_p8  ;;  %p5432_p9 = por %p5431_p7, %p5430_p2 }
  0x93   : > { %p5426_p10 = pneg %p5425_p4 }
  0x95   : > { %p5433_p12 = pnand %p5432_p9, %p5426_p10 }
  0x97   : > { %5436 = shalt.err (!%p5433_p12)
}
  0x98   : > { %s5669_s29 = smov 64   ;;  %s5670_s25 = smov 4  }
  0x99   : > { %4902 = dma.hbm_to_vmem [thread:$0]  (!%p7237_p1), %s7238_s7, 2048, %s324_s4, [#allocation13], %s5669_s29, %s5669_s29, %s5670_s25  }
  0x9a   : > { %s39_s26 = sadd.s32 1, %s5651_s20  ;;  %s51_s18 = sadd.s32 1, %s5639_s17 }
  0x9b   : > { %p40_p8 = scmp.ge.s32.totalorder %s39_s26, 2  ;;  %p58_p6 = scmp.ne.s32.totalorder %s5639_s17, %s5635_s16 }
  0x9c   : > { %p64_p11 = scmp.ne.s32.totalorder %s5635_s16, %s5631_s15  ;;  %s7240_s9 = sadd.s32 1, %s5655_s21 }
  0x9d   : > { %s7301_s26 = smov (%p40_p8, %s39_s26), 0  ;;  %s7303_s9 = smov (!%p40_p8, %s7240_s9), %s5655_s21 }
  0x9e   : > { %7239 = sst [smem:[#allocation29_spill]] %s7301_s26  ;;  %s5980_s27 = ssub.s32 %s5651_s20, %s7301_s26 }
  0x9f   : > { %p7241_p13 = scmp.eq.s32.totalorder %s5659_s22, 0  ;;  %p44_p0 = scmp.ge.s32.totalorder %s7303_s9, 2 }
  0xa0   : > { %p7243_p3 = scmp.eq.s32.totalorder %s5800_s23, 0  ;;  %s340_s19 = sand.u32 1, %s5639_s17  }
  0xa1   : > { %p5984_p1 = por %p7241_p13, %p58_p6  ;;  %s7305_s9 = smov (%p44_p0, %s7303_s9), 0 }
  0xa2   : > { %p5990_p5 = por %p7243_p3, %p64_p11  ;;  %s4441_s12 = sshll.u32 %s340_s19, 8 }
  0xa3   : > { %s46_s13 = ssub.s32 %s5655_s21, %s7305_s9  ;;  %s4612_s3 = sshll.u32 %s5655_s21, 6 }
  0xa4   : > { %s7244_s15 = scalar_select %p5990_p5, 1, 0 }
  0xa5   : > { %s48_s6 = sor.u32 %s5980_s27, %s46_s13  ;;  %p75_p10 = scmp.eq.s32.totalorder %s46_s13, 0 }
  0xa6   : > { %7245 = sst [smem:[#allocation30_spill]] %s7244_s15  ;;  %p49_p2 = scmp.eq.s32.totalorder %s48_s6, 0 }
  0xa7   : > { %s7246_s29 = sadd.s32 1, %s5627_s14  ;;  %s350_s2 = sadd.s32 %s5651_s20, %s4612_s3 }
  0xa8   : > { %s6005_s25 = scalar_select %p75_p10, %s5627_s14, %s7246_s29  }
  0xa9   : > { %s6008_s1 = scalar_select %p49_p2, %s5639_s17, %s51_s18  }
  0xaa   : > { %s344_s24 = scalar_lea.vmem [#allocation3], %s4441_s12  ;;  %s4444_s5 = sshll.u32 %s350_s2, 7 }
  0xab   : > { %s353_s28 = sshll.u32 %s344_s24, 4  ;;  %s6016_s15 = scalar_lea.hbm %s7169_s0, %s4444_s5  ;;  %s6011_s28 = int_to_ptr.vmem [resolvable:$true] %s353_s28 }
  0xac   : > { %p7247_p7 = scmp.lt.s32.totalorder %s5659_s22, 4  ;;  %s6026_s24 = scalar_lea.sflag [#allocation4], %s340_s19 }
  0xad   : > { %s5437_s12 = scalar_lea.hbm %s6016_s15, 4096  ;;  %s5442_s26 = scalar_lea.hbm %s7169_s0, 16384 }
  0xae   : > { %p6022_p9 = pnand %p7247_p7, %p5984_p1  ;;  %p5438_p12 = scmp.ne.s32.totalorder %s6016_s15, %s5437_s12 }
  0xaf   : > { %p5443_p13 = scmp.lt.u32.totalorder %s6016_s15, %s7169_s0  ;;  %p5444_p1 = scmp.lt.u32.totalorder %s5442_s26, %s5437_s12 }
  0xb0   : > { %p5439_p8 = pneg %p6022_p9  ;;  %p5446_p3 = scmp.lt.u32.totalorder %s5437_s12, %s6016_s15 }
  0xb1   : > { %p5445_p0 = por %p5444_p1, %p5443_p13 }
  0xb2   : > { %p5440_p6 = pnand %p5439_p8, %p5438_p12 }
  0xb3   : > { %p5447_p10 = por %p5446_p3, %p5445_p0 }
  0xb4   : > { %p5441_p11 = pneg %p5440_p6 }
  0xb6   : > { %p5448_p2 = pnand %p5447_p10, %p5441_p11 }
  0xb8   : > { %5451 = shalt.err (!%p5448_p2)
}
  0xb9   : > { %s5452_s19 = scalar_lea.vmem %s6011_s28, 4096  ;;  %s5671_s6 = smov [#allocation3]  }
  0xba   : > { %p5453_p7 = scmp.ne.s32.totalorder %s6011_s28, %s5452_s19  ;;  %s5457_s3 = sshll.u32 %s5671_s6, 4  ;;  %s5458_s3 = int_to_ptr.vmem [resolvable:$false] %s5457_s3 }
  0xbb   : > { %s5459_s29 = scalar_lea.vmem %s5458_s3, 8192  ;;  %p5460_p4 = scmp.lt.s32.totalorder %s6011_s28, %s5458_s3 }
  0xbc   : > { %p5455_p12 = pnand %p5453_p7, %p5439_p8  ;;  %p5461_p13 = scmp.lt.s32.totalorder %s5459_s29, %s5452_s19 }
  0xbe   : > { %p5456_p6 = pneg %p5455_p12  ;;  %p5462_p1 = por %p5461_p13, %p5460_p4 }
  0xc0   : > { %p5463_p0 = pnand %p5462_p1, %p5456_p6 }
  0xc2   : > { %5466 = shalt.err (!%p5463_p0)
}
  0xc3   : > { %s7249_s2 = smov 8   ;;  %s7250_s12 = smov 128  }
  0xc4   : > { %s7251_s5 = smov 256   ;;  %s103_s18 = sadd.s32 1, %s5615_s11 }
  0xc5   : > { %4906 = dma.hbm_to_vmem [thread:$0]  (!%p6022_p9), %s6016_s15, 4096, %s6011_s28, %s6026_s24, %s7251_s5, %s7250_s12, %s7249_s2  }
  0xc6   : > { %p7252_p4 = scmp.eq.s32.totalorder %s5980_s27, 0  ;;  %p110_p8 = scmp.ne.s32.totalorder %s5615_s11, %s5611_s10 }
  0xc7   : > { %p116_p11 = scmp.ne.s32.totalorder %s5611_s10, %s5607_s30  ;;  %s386_s26 = sand.u32 1, %s5615_s11  }
  0xc8   : > { %s6061_s7 = scalar_select %p7252_p4, %s5615_s11, %s103_s18  }
  0xc9   : > { %s4615_s4 = sshll.u32 %s5651_s20, 12  ;;  %p7253_p3 = scmp.eq.s32.totalorder %s5659_s22, 0 }
  0xca   : > { %p7254_p2 = scmp.eq.s32.totalorder %s5800_s23, 0  ;;  %s4448_s19 = sshll.u32 %s386_s26, 8 }
  0xcb   : > { %p112_p10 = por %p110_p8, %p7253_p3  ;;  %s7256_s29 = sld [smem:[#allocation32_spill]] }
  0xcc   : > { %p6073_p7 = por %p116_p11, %p7254_p2  ;;  %p7257_p9 = scmp.lt.s32.totalorder %s5659_s22, 4 }
  0xcd   : > { %s388_s27 = scalar_lea.vmem [#allocation8], %s4448_s19 }
  0xce   : > { %s7255_s13 = scalar_select %p6073_p7, 1, 0 }
  0xcf   : > { %p6084_p12 = pnand %p7257_p9, %p112_p10  ;;  %s396_s15 = sshll.u32 %s388_s27, 4  ;;  %s6088_s15 = int_to_ptr.vmem [resolvable:$true] %s396_s15 }
  0xd1   : > { %s6080_s28 = scalar_lea.hbm %s7256_s29, %s4615_s4  ;;  %p5469_p13 = pneg %p6084_p12 }
  0xd2   : > { %s5467_s24 = scalar_lea.hbm %s6080_s28, 4096  ;;  %s5472_s18 = scalar_lea.hbm %s7256_s29, 8192 }
  0xd3   : > { %p5468_p6 = scmp.ne.s32.totalorder %s6080_s28, %s5467_s24  ;;  %p5473_p4 = scmp.lt.u32.totalorder %s6080_s28, %s7256_s29 }
  0xd4   : > { %p5474_p8 = scmp.lt.u32.totalorder %s5472_s18, %s5467_s24  ;;  %p5476_p3 = scmp.lt.u32.totalorder %s5467_s24, %s6080_s28 }
  0xd5   : > { %p5470_p1 = pnand %p5469_p13, %p5468_p6 }
  0xd6   : > { %p5475_p11 = por %p5474_p8, %p5473_p4 }
  0xd7   : > { %p5471_p0 = pneg %p5470_p1 }
  0xd8   : > { %p5477_p10 = por %p5476_p3, %p5475_p11 }
  0xda   : > { %p5478_p2 = pnand %p5477_p10, %p5471_p0 }
  0xdc   : > { %5481 = shalt.err (!%p5478_p2)
}
  0xdd   : > { %s5482_s19 = scalar_lea.vmem %s6088_s15, 4096  ;;  %s5672_s6 = smov [#allocation8]  }
  0xde   : > { %p5483_p9 = scmp.ne.s32.totalorder %s6088_s15, %s5482_s19  ;;  %s5487_s3 = sshll.u32 %s5672_s6, 4  ;;  %s5488_s3 = int_to_ptr.vmem [resolvable:$false] %s5487_s3 }
  0xdf   : > { %s5489_s27 = scalar_lea.vmem %s5488_s3, 8192  ;;  %p5490_p7 = scmp.lt.s32.totalorder %s6088_s15, %s5488_s3 }
  0xe0   : > { %p5485_p6 = pnand %p5483_p9, %p5469_p13  ;;  %p5491_p4 = scmp.lt.s32.totalorder %s5489_s27, %s5482_s19 }
  0xe2   : > { %p5486_p1 = pneg %p5485_p6  ;;  %p5492_p8 = por %p5491_p4, %p5490_p7 }
  0xe4   : > { %p5493_p11 = pnand %p5492_p8, %p5486_p1 }
  0xe6   : > { %5496 = shalt.err (!%p5493_p11)
}
  0xe7   : > { %s7259_s24 = smov 16   ;;  %s7260_s2 = sld [smem:[#allocation25_spill]] }
  0xe8   : > { %4912 = dma.hbm_to_vmem [thread:$0]  (!%p6084_p12), %s6080_s28, 4096, %s6088_s15, %s5896_s8, %s7251_s5, %s7251_s5, %s7259_s24  }
  0xed   : > { %p7261_p13 = scmp.ne.s32.totalorder %s7260_s2, 0 }
  0xee   : > { %s410_s18 = sand.u32 (!%p7261_p13), 1, %s5635_s16  }
  0xef   : > { %408 = sbr.rel (%p7261_p13) target bundleno = 1826 (0x722), region = 56  ;;  %s4453_s26 = sshll.u32 (!%p7261_p13), %s410_s18, 8 }
  0xf0   : > { %s411_s4 = scalar_lea.sflag (!%p7261_p13), [#allocation4], %s410_s18  ;;  %s6122_s19 = scalar_lea.vmem (!%p7261_p13), [#allocation3], %s4453_s26 }
  0xf6   : > { %5582 = dma.done.wait (%p5990_p5), %s411_s4, 4096  }
  0xf7   : > { %5584 = vsyncadd (%p5990_p5), %s411_s4, 4294963200  ;;  %s7263_s30 = sld [smem:[#allocation22_spill]]  ;;  %s7264_s6 = sld [smem:[#allocation26_spill]] }
  0xf8   : > { %s419_s8 = sand.u32 1, %s5800_s23  }
  0xf9   : > { %s420_s15 = scalar_lea.sflag [#allocation7], %s419_s8 }
  0xfd   : > { %s421_s5 = sand.u32 1, %s7263_s30   ;;  %p7265_p7 = scmp.ne.s32.totalorder %s7264_s6, 0 }
  0xfe   : > { %s4454_s28 = sshll.u32 %s421_s5, 8 }
  0xff   : > { %s6132_s3 = scalar_lea.vmem [#allocation6], %s4454_s28 }
 0x100   : > { %5586 = dma.done.wait (%p7265_p7), %s420_s15, 4096  }
 0x101   : > { %5588 = vsyncadd (%p7265_p7), %s420_s15, 4294963200  ;;  %s430_s27 = sand.u32 1, %s5611_s10   ;;  %p7266_p5 = scmp.ne.s32.totalorder %s7255_s13, 0 }
 0x102   : > { %s4455_s24 = sshll.u32 %s430_s27, 8 }
 0x103   : > { %s6139_s2 = scalar_lea.vmem [#allocation8], %s4455_s24 }
 0x104   : > { %5590 = dma.done.wait (%p7266_p5), %s420_s15, 4096  }
 0x105   : > { %5592 = vsyncadd (%p7266_p5), %s420_s15, 4294963200  ;;  %p7267_p12 = scmp.eq.s32.totalorder %s5800_s23, 0 }
 0x107   : > { %5594 = dma.done.wait (%p7267_p12), [#allocation10], 12288   ;;  %p7268_p0 = pmov %p7267_p12 }
 0x109   : > { %5596 = vsyncadd (%p7268_p0), [#allocation10], 4294955008  ;;  %p7269_p3 = pmov %p7268_p0 }
 0x10a   : > { %p7270_p10 = pmov %p7268_p0 }
 0x10b   : > { %5598 = dma.done.wait (%p7269_p3), [#allocation13], 2048  }
 0x10c   : > { %5600 = vsyncadd (%p7270_p10), [#allocation13], 4294965248  ;;  %s6153_s12 = scalar_lea.vmem [#allocation14], %s4454_s28  ;;  %s7271_s18 = sld [smem:[#allocation23_spill]] }
 0x112   : > { %p4460_p2 = scmp.ne.s32.totalorder %s7271_s18, 0 }
 0x113   : > { %v5673_v0 = vmov (!%p4460_p2), 0.0  }
 0x114   : > { %497 = sbr.rel (%p4460_p2) target bundleno = 340 (0x154), region = 84  ;;  %498 = vst [vmem:[#allocation2] sm:$0xff] (!%p4460_p2), %v5673_v0  ;;  %499 = vst [vmem:[#allocation2 + $0x8] sm:$0xff] (!%p4460_p2), %v5673_v0 }
 0x115   : > { %500 = vst [vmem:[#allocation2 + $0x10] sm:$0xff] (!%p4460_p2), %v5673_v0  ;;  %501 = vst [vmem:[#allocation2 + $0x18] sm:$0xff] (!%p4460_p2), %v5673_v0 }
 0x116   : > { %502 = vst [vmem:[#allocation2 + $0x20] sm:$0xff] (!%p4460_p2), %v5673_v0  ;;  %503 = vst [vmem:[#allocation2 + $0x28] sm:$0xff] (!%p4460_p2), %v5673_v0 }
 0x117   : > { %504 = vst [vmem:[#allocation2 + $0x30] sm:$0xff] (!%p4460_p2), %v5673_v0  ;;  %505 = vst [vmem:[#allocation2 + $0x38] sm:$0xff] (!%p4460_p2), %v5673_v0 }
 0x118   : > { %506 = vst [vmem:[#allocation2 + $0x40] sm:$0xff] (!%p4460_p2), %v5673_v0  ;;  %507 = vst [vmem:[#allocation2 + $0x48] sm:$0xff] (!%p4460_p2), %v5673_v0 }
 0x119   : > { %508 = vst [vmem:[#allocation2 + $0x50] sm:$0xff] (!%p4460_p2), %v5673_v0  ;;  %509 = vst [vmem:[#allocation2 + $0x58] sm:$0xff] (!%p4460_p2), %v5673_v0 }
 0x11a   : > { %510 = vst [vmem:[#allocation2 + $0x60] sm:$0xff] (!%p4460_p2), %v5673_v0  ;;  %511 = vst [vmem:[#allocation2 + $0x68] sm:$0xff] (!%p4460_p2), %v5673_v0 }
 0x11b   : > { %512 = vst [vmem:[#allocation2 + $0x70] sm:$0xff] %v5673_v0  ;;  %513 = vst [vmem:[#allocation2 + $0x78] sm:$0xff] %v5673_v0 }
 0x11c   : > { %514 = vst [vmem:[#allocation2 + $0x80] sm:$0xff] %v5673_v0  ;;  %515 = vst [vmem:[#allocation2 + $0x88] sm:$0xff] %v5673_v0 }
 0x11d   : > { %516 = vst [vmem:[#allocation2 + $0x90] sm:$0xff] %v5673_v0  ;;  %517 = vst [vmem:[#allocation2 + $0x98] sm:$0xff] %v5673_v0 }
 0x11e   : > { %518 = vst [vmem:[#allocation2 + $0xa0] sm:$0xff] %v5673_v0  ;;  %519 = vst [vmem:[#allocation2 + $0xa8] sm:$0xff] %v5673_v0 }
 0x11f   : > { %520 = vst [vmem:[#allocation2 + $0xb0] sm:$0xff] %v5673_v0  ;;  %521 = vst [vmem:[#allocation2 + $0xb8] sm:$0xff] %v5673_v0 }
 0x120   : > { %522 = vst [vmem:[#allocation2 + $0xc0] sm:$0xff] %v5673_v0  ;;  %523 = vst [vmem:[#allocation2 + $0xc8] sm:$0xff] %v5673_v0 }
 0x121   : > { %524 = vst [vmem:[#allocation2 + $0xd0] sm:$0xff] %v5673_v0  ;;  %525 = vst [vmem:[#allocation2 + $0xd8] sm:$0xff] %v5673_v0 }
 0x122   : > { %526 = vst [vmem:[#allocation2 + $0xe0] sm:$0xff] %v5673_v0  ;;  %527 = vst [vmem:[#allocation2 + $0xe8] sm:$0xff] %v5673_v0 }
 0x123   : > { %528 = vst [vmem:[#allocation2 + $0xf0] sm:$0xff] %v5673_v0  ;;  %529 = vst [vmem:[#allocation2 + $0xf8] sm:$0xff] %v5673_v0 }
 0x124   : > { %530 = vst [vmem:[#allocation2 + $0x100] sm:$0xff] %v5673_v0  ;;  %531 = vst [vmem:[#allocation2 + $0x108] sm:$0xff] %v5673_v0 }
 0x125   : > { %532 = vst [vmem:[#allocation2 + $0x110] sm:$0xff] %v5673_v0  ;;  %533 = vst [vmem:[#allocation2 + $0x118] sm:$0xff] %v5673_v0 }
 0x126   : > { %534 = vst [vmem:[#allocation2 + $0x120] sm:$0xff] %v5673_v0  ;;  %535 = vst [vmem:[#allocation2 + $0x128] sm:$0xff] %v5673_v0 }
 0x127   : > { %536 = vst [vmem:[#allocation2 + $0x130] sm:$0xff] %v5673_v0  ;;  %537 = vst [vmem:[#allocation2 + $0x138] sm:$0xff] %v5673_v0 }
 0x128   : > { %538 = vst [vmem:[#allocation2 + $0x140] sm:$0xff] %v5673_v0  ;;  %539 = vst [vmem:[#allocation2 + $0x148] sm:$0xff] %v5673_v0 }
 0x129   : > { %540 = vst [vmem:[#allocation2 + $0x150] sm:$0xff] %v5673_v0  ;;  %541 = vst [vmem:[#allocation2 + $0x158] sm:$0xff] %v5673_v0 }
 0x12a   : > { %542 = vst [vmem:[#allocation2 + $0x160] sm:$0xff] %v5673_v0  ;;  %543 = vst [vmem:[#allocation2 + $0x168] sm:$0xff] %v5673_v0 }
 0x12b   : > { %544 = vst [vmem:[#allocation2 + $0x170] sm:$0xff] %v5673_v0  ;;  %545 = vst [vmem:[#allocation2 + $0x178] sm:$0xff] %v5673_v0 }
 0x12c   : > { %546 = vst [vmem:[#allocation2 + $0x180] sm:$0xff] %v5673_v0  ;;  %547 = vst [vmem:[#allocation2 + $0x188] sm:$0xff] %v5673_v0 }
 0x12d   : > { %548 = vst [vmem:[#allocation2 + $0x190] sm:$0xff] %v5673_v0  ;;  %549 = vst [vmem:[#allocation2 + $0x198] sm:$0xff] %v5673_v0 }
 0x12e   : > { %550 = vst [vmem:[#allocation2 + $0x1a0] sm:$0xff] %v5673_v0  ;;  %551 = vst [vmem:[#allocation2 + $0x1a8] sm:$0xff] %v5673_v0 }
 0x12f   : > { %552 = vst [vmem:[#allocation2 + $0x1b0] sm:$0xff] %v5673_v0  ;;  %553 = vst [vmem:[#allocation2 + $0x1b8] sm:$0xff] %v5673_v0 }
 0x130   : > { %554 = vst [vmem:[#allocation2 + $0x1c0] sm:$0xff] %v5673_v0  ;;  %555 = vst [vmem:[#allocation2 + $0x1c8] sm:$0xff] %v5673_v0 }
 0x131   : > { %556 = vst [vmem:[#allocation2 + $0x1d0] sm:$0xff] %v5673_v0  ;;  %557 = vst [vmem:[#allocation2 + $0x1d8] sm:$0xff] %v5673_v0 }
 0x132   : > { %558 = vst [vmem:[#allocation2 + $0x1e0] sm:$0xff] %v5673_v0  ;;  %559 = vst [vmem:[#allocation2 + $0x1e8] sm:$0xff] %v5673_v0 }
 0x133   : > { %560 = vst [vmem:[#allocation2 + $0x1f0] sm:$0xff] %v5673_v0  ;;  %561 = vst [vmem:[#allocation2 + $0x1f8] sm:$0xff] %v5673_v0 }
 0x134   : > { %562 = vst [vmem:[#allocation2 + $0x200] sm:$0xff] %v5673_v0  ;;  %563 = vst [vmem:[#allocation2 + $0x208] sm:$0xff] %v5673_v0 }
 0x135   : > { %564 = vst [vmem:[#allocation2 + $0x210] sm:$0xff] %v5673_v0  ;;  %565 = vst [vmem:[#allocation2 + $0x218] sm:$0xff] %v5673_v0 }
 0x136   : > { %566 = vst [vmem:[#allocation2 + $0x220] sm:$0xff] %v5673_v0  ;;  %567 = vst [vmem:[#allocation2 + $0x228] sm:$0xff] %v5673_v0 }
 0x137   : > { %568 = vst [vmem:[#allocation2 + $0x230] sm:$0xff] %v5673_v0  ;;  %569 = vst [vmem:[#allocation2 + $0x238] sm:$0xff] %v5673_v0 }
 0x138   : > { %570 = vst [vmem:[#allocation2 + $0x240] sm:$0xff] %v5673_v0  ;;  %571 = vst [vmem:[#allocation2 + $0x248] sm:$0xff] %v5673_v0 }
 0x139   : > { %572 = vst [vmem:[#allocation2 + $0x250] sm:$0xff] %v5673_v0  ;;  %573 = vst [vmem:[#allocation2 + $0x258] sm:$0xff] %v5673_v0 }
 0x13a   : > { %574 = vst [vmem:[#allocation2 + $0x260] sm:$0xff] %v5673_v0  ;;  %575 = vst [vmem:[#allocation2 + $0x268] sm:$0xff] %v5673_v0 }
 0x13b   : > { %576 = vst [vmem:[#allocation2 + $0x270] sm:$0xff] %v5673_v0  ;;  %577 = vst [vmem:[#allocation2 + $0x278] sm:$0xff] %v5673_v0 }
 0x13c   : > { %578 = vst [vmem:[#allocation2 + $0x280] sm:$0xff] %v5673_v0  ;;  %579 = vst [vmem:[#allocation2 + $0x288] sm:$0xff] %v5673_v0 }
 0x13d   : > { %580 = vst [vmem:[#allocation2 + $0x290] sm:$0xff] %v5673_v0  ;;  %581 = vst [vmem:[#allocation2 + $0x298] sm:$0xff] %v5673_v0 }
 0x13e   : > { %582 = vst [vmem:[#allocation2 + $0x2a0] sm:$0xff] %v5673_v0  ;;  %583 = vst [vmem:[#allocation2 + $0x2a8] sm:$0xff] %v5673_v0 }
 0x13f   : > { %584 = vst [vmem:[#allocation2 + $0x2b0] sm:$0xff] %v5673_v0  ;;  %585 = vst [vmem:[#allocation2 + $0x2b8] sm:$0xff] %v5673_v0 }
 0x140   : > { %586 = vst [vmem:[#allocation2 + $0x2c0] sm:$0xff] %v5673_v0  ;;  %587 = vst [vmem:[#allocation2 + $0x2c8] sm:$0xff] %v5673_v0 }
 0x141   : > { %588 = vst [vmem:[#allocation2 + $0x2d0] sm:$0xff] %v5673_v0  ;;  %589 = vst [vmem:[#allocation2 + $0x2d8] sm:$0xff] %v5673_v0 }
 0x142   : > { %590 = vst [vmem:[#allocation2 + $0x2e0] sm:$0xff] %v5673_v0  ;;  %591 = vst [vmem:[#allocation2 + $0x2e8] sm:$0xff] %v5673_v0 }
 0x143   : > { %592 = vst [vmem:[#allocation2 + $0x2f0] sm:$0xff] %v5673_v0  ;;  %593 = vst [vmem:[#allocation2 + $0x2f8] sm:$0xff] %v5673_v0 }
 0x144   : > { %594 = vst [vmem:[#allocation2 + $0x300] sm:$0xff] %v5673_v0  ;;  %595 = vst [vmem:[#allocation2 + $0x308] sm:$0xff] %v5673_v0 }
 0x145   : > { %596 = vst [vmem:[#allocation2 + $0x310] sm:$0xff] %v5673_v0  ;;  %597 = vst [vmem:[#allocation2 + $0x318] sm:$0xff] %v5673_v0 }
 0x146   : > { %598 = vst [vmem:[#allocation2 + $0x320] sm:$0xff] %v5673_v0  ;;  %599 = vst [vmem:[#allocation2 + $0x328] sm:$0xff] %v5673_v0 }
 0x147   : > { %600 = vst [vmem:[#allocation2 + $0x330] sm:$0xff] %v5673_v0  ;;  %601 = vst [vmem:[#allocation2 + $0x338] sm:$0xff] %v5673_v0 }
 0x148   : > { %602 = vst [vmem:[#allocation2 + $0x340] sm:$0xff] %v5673_v0  ;;  %603 = vst [vmem:[#allocation2 + $0x348] sm:$0xff] %v5673_v0 }
 0x149   : > { %604 = vst [vmem:[#allocation2 + $0x350] sm:$0xff] %v5673_v0  ;;  %605 = vst [vmem:[#allocation2 + $0x358] sm:$0xff] %v5673_v0 }
 0x14a   : > { %606 = vst [vmem:[#allocation2 + $0x360] sm:$0xff] %v5673_v0  ;;  %607 = vst [vmem:[#allocation2 + $0x368] sm:$0xff] %v5673_v0 }
 0x14b   : > { %608 = vst [vmem:[#allocation2 + $0x370] sm:$0xff] %v5673_v0  ;;  %609 = vst [vmem:[#allocation2 + $0x378] sm:$0xff] %v5673_v0 }
 0x14c   : > { %610 = vst [vmem:[#allocation2 + $0x380] sm:$0xff] %v5673_v0  ;;  %611 = vst [vmem:[#allocation2 + $0x388] sm:$0xff] %v5673_v0 }
 0x14d   : > { %612 = vst [vmem:[#allocation2 + $0x390] sm:$0xff] %v5673_v0  ;;  %613 = vst [vmem:[#allocation2 + $0x398] sm:$0xff] %v5673_v0 }
 0x14e   : > { %614 = vst [vmem:[#allocation2 + $0x3a0] sm:$0xff] %v5673_v0  ;;  %615 = vst [vmem:[#allocation2 + $0x3a8] sm:$0xff] %v5673_v0 }
 0x14f   : > { %616 = vst [vmem:[#allocation2 + $0x3b0] sm:$0xff] %v5673_v0  ;;  %617 = vst [vmem:[#allocation2 + $0x3b8] sm:$0xff] %v5673_v0 }
 0x150   : > { %618 = vst [vmem:[#allocation2 + $0x3c0] sm:$0xff] %v5673_v0  ;;  %619 = vst [vmem:[#allocation2 + $0x3c8] sm:$0xff] %v5673_v0 }
 0x151   : > { %620 = vst [vmem:[#allocation2 + $0x3d0] sm:$0xff] %v5673_v0  ;;  %621 = vst [vmem:[#allocation2 + $0x3d8] sm:$0xff] %v5673_v0 }
 0x152   : > { %622 = vst [vmem:[#allocation2 + $0x3e0] sm:$0xff] %v5673_v0  ;;  %623 = vst [vmem:[#allocation2 + $0x3e8] sm:$0xff] %v5673_v0 }
 0x153   : > { %624 = vst [vmem:[#allocation2 + $0x3f0] sm:$0xff] %v5673_v0  ;;  %625 = vst [vmem:[#allocation2 + $0x3f8] sm:$0xff] %v5673_v0 }
 0x154 PF: > { %v5051_v1 = vld [vmem:[%s6139_s2 + $0x4] ss:$16 sps:$4 sm:$0xff]   ;;  %v5053_v2 = vld [vmem:[%s6139_s2 + $0xc] ss:$16 sps:$4 sm:$0xff]   ;;  %v5674_v3 = vmov 0   ;;  %s7272_s23 = sld [smem:[#allocation23_spill]] }
 0x155   : > { %1026 = vmatprep.mubr.bf16.mxu0 %v5674_v3  ;;  %1219 = vmatprep.mubr.bf16.mxu1 %v5674_v3  ;;  %v5055_v4 = vld [vmem:[%s6139_s2] ss:$16 sps:$4 sm:$0xff]   ;;  %v5056_v5 = vld [vmem:[%s6139_s2 + $0x8] ss:$16 sps:$4 sm:$0xff]   ;;  %v5057_v6 = vld [vmem:[%s6139_s2 + $0x24] ss:$16 sps:$4 sm:$0xff]  }
 0x156   : > { %994 = vmatprep.subr.bf16.mxu0 %v5051_v1  ;;  %1187 = vmatprep.subr.bf16.mxu1 %v5053_v2  ;;  %v5059_v7 = vld [vmem:[%s6139_s2 + $0x2c] ss:$16 sps:$4 sm:$0xff]   ;;  %v5061_v8 = vld [vmem:[%s6139_s2 + $0x20] ss:$16 sps:$4 sm:$0xff]   ;;  %v5062_v9 = vld [vmem:[%s6139_s2 + $0x28] ss:$16 sps:$4 sm:$0xff]  }
 0x157   : > { %995 = vmatpush1.bf16.msra.mxu0 %v5055_v4  ;;  %1188 = vmatpush1.bf16.msra.mxu1 %v5056_v5  ;;  %v5063_v10 = vld [vmem:[%s6139_s2 + $0x44] ss:$16 sps:$4 sm:$0xff]   ;;  %v5065_v11 = vld [vmem:[%s6139_s2 + $0x4c] ss:$16 sps:$4 sm:$0xff]   ;;  %v5067_v12 = vld [vmem:[%s6139_s2 + $0x40] ss:$16 sps:$4 sm:$0xff]  }
 0x158   : > { %996 = vmatprep.subr.bf16.mxu0 %v5057_v6  ;;  %1189 = vmatprep.subr.bf16.mxu1 %v5059_v7  ;;  %v5068_v13 = vld [vmem:[%s6139_s2 + $0x48] ss:$16 sps:$4 sm:$0xff]   ;;  %v5069_v14 = vld [vmem:[%s6139_s2 + $0x64] ss:$16 sps:$4 sm:$0xff]   ;;  %v5071_v15 = vld [vmem:[%s6139_s2 + $0x6c] ss:$16 sps:$4 sm:$0xff]  }
 0x159   : > { %v5073_v16 = vld [vmem:[%s6139_s2 + $0x60] ss:$16 sps:$4 sm:$0xff]   ;;  %v5074_v17 = vld [vmem:[%s6139_s2 + $0x68] ss:$16 sps:$4 sm:$0xff]   ;;  %v5075_v18 = vld [vmem:[%s6139_s2 + $0x84] ss:$16 sps:$4 sm:$0xff]  }
 0x15a   : > { %v5077_v19 = vld [vmem:[%s6139_s2 + $0x8c] ss:$16 sps:$4 sm:$0xff]   ;;  %v5079_v20 = vld [vmem:[%s6139_s2 + $0x80] ss:$16 sps:$4 sm:$0xff]   ;;  %v5080_v21 = vld [vmem:[%s6139_s2 + $0x88] ss:$16 sps:$4 sm:$0xff]  }
 0x15b   : > { %997 = vmatpush1.bf16.msra.mxu0 %v5061_v8  ;;  %1190 = vmatpush1.bf16.msra.mxu1 %v5062_v9  ;;  %v5081_v22 = vld [vmem:[%s6139_s2 + $0xa4] ss:$16 sps:$4 sm:$0xff]   ;;  %v5083_v23 = vld [vmem:[%s6139_s2 + $0xac] ss:$16 sps:$4 sm:$0xff]   ;;  %v5085_v24 = vld [vmem:[%s6139_s2 + $0xa0] ss:$16 sps:$4 sm:$0xff]  }
 0x15c   : > { %998 = vmatprep.subr.bf16.mxu0 %v5063_v10  ;;  %1191 = vmatprep.subr.bf16.mxu1 %v5065_v11  ;;  %v5086_v25 = vld [vmem:[%s6139_s2 + $0xa8] ss:$16 sps:$4 sm:$0xff]   ;;  %v5087_v26 = vld [vmem:[%s6139_s2 + $0xc4] ss:$16 sps:$4 sm:$0xff]   ;;  %v5089_v27 = vld [vmem:[%s6139_s2 + $0xcc] ss:$16 sps:$4 sm:$0xff]  }
 0x15d   : > { %v5091_v28 = vld [vmem:[%s6139_s2 + $0xc0] ss:$16 sps:$4 sm:$0xff]   ;;  %v5092_v29 = vld [vmem:[%s6139_s2 + $0xc8] ss:$16 sps:$4 sm:$0xff]   ;;  %v5093_v30 = vld [vmem:[%s6139_s2 + $0xe4] ss:$16 sps:$4 sm:$0xff]  }
 0x15e   : > { %v5095_v31 = vld [vmem:[%s6139_s2 + $0xec] ss:$16 sps:$4 sm:$0xff]   ;;  %v5097_v32 = vld [vmem:[%s6139_s2 + $0xe0] ss:$16 sps:$4 sm:$0xff]   ;;  %v5098_v33 = vld [vmem:[%s6139_s2 + $0xe8] ss:$16 sps:$4 sm:$0xff]  }
 0x15f   : > { %999 = vmatpush1.bf16.msra.mxu0 %v5067_v12  ;;  %1192 = vmatpush1.bf16.msra.mxu1 %v5068_v13  ;;  %v754_v34 = vld [vmem:[%s6122_s19] sm:$0xff]  ;;  %v755_v35 = vld [vmem:[%s6122_s19 + $0x8] sm:$0xff]  ;;  %v756_v37 = vld [vmem:[%s6122_s19 + $0x10] sm:$0xff]  ;;  %p4493_p9 = scmp.ne.s32.totalorder %s7272_s23, 1 }
 0x160   : > { %1000 = vmatprep.subr.bf16.mxu0 %v5069_v14  ;;  %1193 = vmatprep.subr.bf16.mxu1 %v5071_v15  ;;  %v786_v36 = vpack.c.bf16 %v755_v35, %v754_v34  ;;  %v757_v38 = vld [vmem:[%s6122_s19 + $0x18] sm:$0xff]  ;;  %v758_v40 = vld [vmem:[%s6122_s19 + $0x20] sm:$0xff]  ;;  %v759_v41 = vld [vmem:[%s6122_s19 + $0x28] sm:$0xff]  ;;  %s7273_s4 = sld [smem:[#allocation34_spill]] (!%p4493_p9)  ;;  %s7274_s6 = sld [smem:[#allocation36_spill]] (!%p4493_p9) }
 0x161   : > { %v787_v39 = vpack.c.bf16 %v757_v38, %v756_v37  ;;  %v788_v42 = vpack.c.bf16 %v759_v41, %v758_v40  ;;  %v760_v43 = vld [vmem:[%s6122_s19 + $0x30] sm:$0xff]  ;;  %v761_v44 = vld [vmem:[%s6122_s19 + $0x38] sm:$0xff]  ;;  %v762_v46 = vld [vmem:[%s6122_s19 + $0x40] sm:$0xff]  ;;  %s7275_s15 = sld [smem:[#allocation38_spill]] (!%p4493_p9) }
 0x162   : > { %v789_v45 = vpack.c.bf16 %v761_v44, %v760_v43  ;;  %v763_v47 = vld [vmem:[%s6122_s19 + $0x48] sm:$0xff]  ;;  %v764_v49 = vld [vmem:[%s6122_s19 + $0x50] sm:$0xff]  ;;  %v765_v50 = vld [vmem:[%s6122_s19 + $0x58] sm:$0xff] }
 0x163   : > { %1001 = vmatpush1.bf16.msra.mxu0 %v5073_v16  ;;  %1194 = vmatpush1.bf16.msra.mxu1 %v5074_v17  ;;  %v790_v48 = vpack.c.bf16 %v763_v47, %v762_v46  ;;  %v791_v51 = vpack.c.bf16 %v765_v50, %v764_v49  ;;  %v766_v52 = vld [vmem:[%s6122_s19 + $0x60] sm:$0xff]  ;;  %v767_v53 = vld [vmem:[%s6122_s19 + $0x68] sm:$0xff]  ;;  %v768_v55 = vld [vmem:[%s6122_s19 + $0x70] sm:$0xff] }
 0x164   : > { %1002 = vmatprep.subr.bf16.mxu0 %v5075_v18  ;;  %1195 = vmatprep.subr.bf16.mxu1 %v5077_v19  ;;  %v792_v54 = vpack.c.bf16 %v767_v53, %v766_v52  ;;  %v769_v56 = vld [vmem:[%s6122_s19 + $0x78] sm:$0xff]  ;;  %v770_v58 = vld [vmem:[%s6122_s19 + $0x80] sm:$0xff]  ;;  %v771_v59 = vld [vmem:[%s6122_s19 + $0x88] sm:$0xff] }
 0x165   : > { %v793_v57 = vpack.c.bf16 %v769_v56, %v768_v55  ;;  %v794_v60 = vpack.c.bf16 %v771_v59, %v770_v58  ;;  %v772_v61 = vld [vmem:[%s6122_s19 + $0x90] sm:$0xff]  ;;  %v773_v62 = vld [vmem:[%s6122_s19 + $0x98] sm:$0xff]  ;;  %v774_v0 = vld [vmem:[%s6122_s19 + $0xa0] sm:$0xff] }
 0x166   : > { %v795_v63 = vpack.c.bf16 %v773_v62, %v772_v61  ;;  %v775_v1 = vld [vmem:[%s6122_s19 + $0xa8] sm:$0xff]  ;;  %v776_v4 = vld [vmem:[%s6122_s19 + $0xb0] sm:$0xff]  ;;  %v777_v5 = vld [vmem:[%s6122_s19 + $0xb8] sm:$0xff] }
 0x167   : > { %1003 = vmatpush1.bf16.msra.mxu0 %v5079_v20  ;;  %1196 = vmatpush1.bf16.msra.mxu1 %v5080_v21  ;;  %v796_v2 = vpack.c.bf16 %v775_v1, %v774_v0  ;;  %v797_v6 = vpack.c.bf16 %v777_v5, %v776_v4  ;;  %v778_v7 = vld [vmem:[%s6122_s19 + $0xc0] sm:$0xff]  ;;  %v779_v8 = vld [vmem:[%s6122_s19 + $0xc8] sm:$0xff]  ;;  %v780_v10 = vld [vmem:[%s6122_s19 + $0xd0] sm:$0xff] }
 0x168   : > { %1004 = vmatprep.subr.bf16.mxu0 %v5081_v22  ;;  %1197 = vmatprep.subr.bf16.mxu1 %v5083_v23  ;;  %v798_v9 = vpack.c.bf16 %v779_v8, %v778_v7  ;;  %v781_v11 = vld [vmem:[%s6122_s19 + $0xd8] sm:$0xff]  ;;  %v782_v13 = vld [vmem:[%s6122_s19 + $0xe0] sm:$0xff]  ;;  %v783_v14 = vld [vmem:[%s6122_s19 + $0xe8] sm:$0xff] }
 0x169   : > { %v799_v12 = vpack.c.bf16 %v781_v11, %v780_v10  ;;  %v800_v15 = vpack.c.bf16 %v783_v14, %v782_v13  ;;  %v784_v16 = vld [vmem:[%s6122_s19 + $0xf0] sm:$0xff]  ;;  %v785_v17 = vld [vmem:[%s6122_s19 + $0xf8] sm:$0xff]  ;;  %v626_v19 = vld [vmem:[#allocation2] sm:$0xff] }
 0x16a   : > { %v801_v18 = vpack.c.bf16 %v785_v17, %v784_v16  ;;  %v628_v20 = vld [vmem:[#allocation2 + $0x10] sm:$0xff]  ;;  %v627_v21 = vld [vmem:[#allocation2 + $0x8] sm:$0xff]  ;;  %v629_v22 = vld [vmem:[#allocation2 + $0x18] sm:$0xff] }
 0x16b   : > { %1005 = vmatpush1.bf16.msra.mxu0 %v5085_v24  ;;  %1198 = vmatpush1.bf16.msra.mxu1 %v5086_v25  ;;  %v630_v25 = vld [vmem:[#allocation2 + $0x20] sm:$0xff]  ;;  %v636_v43 = vld [vmem:[#allocation2 + $0x50] sm:$0xff]  ;;  %v635_v44 = vld [vmem:[#allocation2 + $0x48] sm:$0xff] }
 0x16c   : > { %1006 = vmatprep.subr.bf16.mxu0 %v5087_v26  ;;  %1199 = vmatprep.subr.bf16.mxu1 %v5089_v27  ;;  %v632_v26 = vld [vmem:[#allocation2 + $0x30] sm:$0xff]  ;;  %v641_v55 = vld [vmem:[#allocation2 + $0x78] sm:$0xff]  ;;  %v643_v5 = vld [vmem:[#allocation2 + $0x88] sm:$0xff] }
 0x16d   : > { %v640_v49 = vld [vmem:[#allocation2 + $0x70] sm:$0xff]  ;;  %v649_v16 = vld [vmem:[#allocation2 + $0xb8] sm:$0xff] }
 0x16e   : > { %v644_v4 = vld [vmem:[#allocation2 + $0x90] sm:$0xff] }
 0x16f   : > { %1007 = vmatpush1.bf16.msra.mxu0 %v5091_v28  ;;  %1200 = vmatpush1.bf16.msra.mxu1 %v5092_v29  ;;  %v648_v10 = vld [vmem:[#allocation2 + $0xb0] sm:$0xff] }
 0x170   : > { %1008 = vmatprep.subr.bf16.mxu0 %v5093_v30  ;;  %1201 = vmatprep.subr.bf16.mxu1 %v5095_v31  ;;  %v631_v31 = vld [vmem:[#allocation2 + $0x28] sm:$0xff] }
 0x173   : > { %1009 = vmatpush1.bf16.msra.mxu0 %v5097_v32  ;;  %1202 = vmatpush1.bf16.msra.mxu1 %v5098_v33  ;;  %v633_v32 = vld [vmem:[#allocation2 + $0x38] sm:$0xff] }
 0x176   : > { %1027 = vmatmul.mubr.bf16.vlgmr.msra.gmra.mrb[0].mxu0 %v786_v36  ;;  %1220 = vmatmul.mubr.bf16.vlgmr.msra.gmra.mrb[0].mxu1 %v786_v36 }
 0x177   : > { %1036 = vmatprep.mubr.bf16.mxu0 %v5674_v3  ;;  %1229 = vmatprep.mubr.bf16.mxu1 %v5674_v3 }
 0x17e   : > { %1037 = vmatmul.mubr.bf16.gmra.mrb[4].mxu0 %v787_v39  ;;  %1230 = vmatmul.mubr.bf16.gmra.mrb[4].mxu1 %v787_v39 }
 0x17f   : > { %1046 = vmatprep.mubr.bf16.mxu0 %v5674_v3  ;;  %1239 = vmatprep.mubr.bf16.mxu1 %v5674_v3 }
 0x186   : > { %1047 = vmatmul.mubr.bf16.gmra.mrb[8].mxu0 %v788_v42  ;;  %1240 = vmatmul.mubr.bf16.gmra.mrb[8].mxu1 %v788_v42  ;;  %v634_v42 = vld [vmem:[#allocation2 + $0x40] sm:$0xff] }
 0x187   : > { %1056 = vmatprep.mubr.bf16.mxu0 %v5674_v3  ;;  %1249 = vmatprep.mubr.bf16.mxu1 %v5674_v3 }
 0x18e   : > { %1057 = vmatmul.mubr.bf16.gmra.mrb[12].mxu0 %v789_v45  ;;  %1250 = vmatmul.mubr.bf16.gmra.mrb[12].mxu1 %v789_v45  ;;  %v637_v45 = vld [vmem:[#allocation2 + $0x58] sm:$0xff] }
 0x18f   : > { %1066 = vmatprep.mubr.bf16.mxu0 %v5674_v3  ;;  %1259 = vmatprep.mubr.bf16.mxu1 %v5674_v3 }
 0x196   : > { %1067 = vmatmul.mubr.bf16.gmra.mrb[16].mxu0 %v790_v48  ;;  %1260 = vmatmul.mubr.bf16.gmra.mrb[16].mxu1 %v790_v48  ;;  %v638_v48 = vld [vmem:[#allocation2 + $0x60] sm:$0xff] }
 0x197   : > { %1076 = vmatprep.mubr.bf16.mxu0 %v5674_v3  ;;  %1269 = vmatprep.mubr.bf16.mxu1 %v5674_v3 }
 0x19e   : > { %1077 = vmatmul.mubr.bf16.gmra.mrb[20].mxu0 %v791_v51  ;;  %1270 = vmatmul.mubr.bf16.gmra.mrb[20].mxu1 %v791_v51 }
 0x19f   : > { %1086 = vmatprep.mubr.bf16.mxu0 %v5674_v3  ;;  %1279 = vmatprep.mubr.bf16.mxu1 %v5674_v3 }
 0x1a6   : > { %1087 = vmatmul.mubr.bf16.gmra.mrb[24].mxu0 %v792_v54  ;;  %1280 = vmatmul.mubr.bf16.gmra.mrb[24].mxu1 %v792_v54  ;;  %v639_v54 = vld [vmem:[#allocation2 + $0x68] sm:$0xff] }
 0x1a7   : > { %1096 = vmatprep.mubr.bf16.mxu0 %v5674_v3  ;;  %1289 = vmatprep.mubr.bf16.mxu1 %v5674_v3 }
 0x1ae   : > { %1097 = vmatmul.mubr.bf16.gmra.mrb[28].mxu0 %v793_v57  ;;  %1290 = vmatmul.mubr.bf16.gmra.mrb[28].mxu1 %v793_v57 }
 0x1af   : > { %1106 = vmatprep.mubr.bf16.mxu0 %v5674_v3  ;;  %1299 = vmatprep.mubr.bf16.mxu1 %v5674_v3 }
 0x1b6   : > { %1107 = vmatmul.mubr.bf16.gmra.mrb[32].mxu0 %v794_v60  ;;  %1300 = vmatmul.mubr.bf16.gmra.mrb[32].mxu1 %v794_v60 }
 0x1b7   : > { %1116 = vmatprep.mubr.bf16.mxu0 %v5674_v3  ;;  %1309 = vmatprep.mubr.bf16.mxu1 %v5674_v3 }
 0x1be   : > { %1117 = vmatmul.mubr.bf16.gmra.mrb[36].mxu0 %v795_v63  ;;  %1310 = vmatmul.mubr.bf16.gmra.mrb[36].mxu1 %v795_v63 }
 0x1bf   : > { %1126 = vmatprep.mubr.bf16.mxu0 %v5674_v3  ;;  %1319 = vmatprep.mubr.bf16.mxu1 %v5674_v3 }
 0x1c6   : > { %1127 = vmatmul.mubr.bf16.gmra.mrb[40].mxu0 %v796_v2  ;;  %1320 = vmatmul.mubr.bf16.gmra.mrb[40].mxu1 %v796_v2  ;;  %v642_v2 = vld [vmem:[#allocation2 + $0x80] sm:$0xff] }
 0x1c7   : > { %1136 = vmatprep.mubr.bf16.mxu0 %v5674_v3  ;;  %1329 = vmatprep.mubr.bf16.mxu1 %v5674_v3 }
 0x1ce   : > { %1137 = vmatmul.mubr.bf16.gmra.mrb[44].mxu0 %v797_v6  ;;  %1330 = vmatmul.mubr.bf16.gmra.mrb[44].mxu1 %v797_v6  ;;  %v645_v6 = vld [vmem:[#allocation2 + $0x98] sm:$0xff] }
 0x1cf   : > { %1146 = vmatprep.mubr.bf16.mxu0 %v5674_v3  ;;  %1339 = vmatprep.mubr.bf16.mxu1 %v5674_v3 }
 0x1d6   : > { %1147 = vmatmul.mubr.bf16.gmra.mrb[48].mxu0 %v798_v9  ;;  %1340 = vmatmul.mubr.bf16.gmra.mrb[48].mxu1 %v798_v9  ;;  %v646_v9 = vld [vmem:[#allocation2 + $0xa0] sm:$0xff] }
 0x1d7   : > { %1156 = vmatprep.mubr.bf16.mxu0 %v5674_v3  ;;  %1349 = vmatprep.mubr.bf16.mxu1 %v5674_v3 }
 0x1de   : > { %1157 = vmatmul.mubr.bf16.gmra.mrb[52].mxu0 %v799_v12  ;;  %1350 = vmatmul.mubr.bf16.gmra.mrb[52].mxu1 %v799_v12 }
 0x1df   : > { %1166 = vmatprep.mubr.bf16.mxu0 %v5674_v3  ;;  %1359 = vmatprep.mubr.bf16.mxu1 %v5674_v3 }
 0x1e6   : > { %1167 = vmatmul.mubr.bf16.gmra.mrb[56].mxu0 %v800_v15  ;;  %1360 = vmatmul.mubr.bf16.gmra.mrb[56].mxu1 %v800_v15  ;;  %v647_v15 = vld [vmem:[#allocation2 + $0xa8] sm:$0xff] }
 0x1e7   : > { %1176 = vmatprep.mubr.bf16.mxu0 %v5674_v3  ;;  %1369 = vmatprep.mubr.bf16.mxu1 %v5674_v3 }
 0x1ee   : > { %1177 = vmatmul.mubr.bf16.gmra.mrb[60].mxu0 %v801_v18  ;;  %1370 = vmatmul.mubr.bf16.gmra.mrb[60].mxu1 %v801_v18 }
 0x249   : > { %v1028_v23 = vpop.f32.mrb[0].mxu0  ;;  %v1221_v24 = vpop.f32.mrb[0].mxu1 }
 0x24a   : > { %v1380_v27 = vadd.f32 %v1028_v23, %v626_v19  ;;  %v1382_v28 = vadd.f32 %v1221_v24, %v628_v20  ;;  %v1030_v29 = vpop.f32.mrb[1].mxu0  ;;  %v1223_v30 = vpop.f32.mrb[1].mxu1 }
 0x24b   : > { %v1381_v3 = vadd.f32 %v1030_v29, %v627_v21  ;;  %v1383_v33 = vadd.f32 %v1223_v30, %v629_v22  ;;  %v1032_v34 = vpop.f32.mrb[2].mxu0  ;;  %v1225_v35 = vpop.f32.mrb[2].mxu1  ;;  %v651_v29 = vld [vmem:[#allocation2 + $0xc8] sm:$0xff]  ;;  %v653_v30 = vld [vmem:[#allocation2 + $0xd8] sm:$0xff] }
 0x24c   : > { %1508 = vst [vmem:[#allocation2] sm:$0xff] %v1380_v27  ;;  %1510 = vst [vmem:[#allocation2 + $0x10] sm:$0xff] %v1382_v28  ;;  %v1384_v36 = vadd.f32 %v1032_v34, %v630_v25  ;;  %v1386_v37 = vadd.f32 %v1225_v35, %v632_v26  ;;  %v1034_v38 = vpop.f32.mrb[3].mxu0  ;;  %v1227_v39 = vpop.f32.mrb[3].mxu1  ;;  %v650_v27 = vld [vmem:[#allocation2 + $0xc0] sm:$0xff]  ;;  %v652_v28 = vld [vmem:[#allocation2 + $0xd0] sm:$0xff] }
 0x24d   : > { %1509 = vst [vmem:[#allocation2 + $0x8] sm:$0xff] %v1381_v3  ;;  %1511 = vst [vmem:[#allocation2 + $0x18] sm:$0xff] %v1383_v33  ;;  %v1385_v40 = vadd.f32 %v1034_v38, %v631_v31  ;;  %v1387_v41 = vadd.f32 %v1227_v39, %v633_v32  ;;  %v654_v3 = vld [vmem:[#allocation2 + $0xe0] sm:$0xff]  ;;  %v656_v33 = vld [vmem:[#allocation2 + $0xf0] sm:$0xff] }
 0x24e   : > { %1512 = vst [vmem:[#allocation2 + $0x20] sm:$0xff] %v1384_v36  ;;  %1514 = vst [vmem:[#allocation2 + $0x30] sm:$0xff] %v1386_v37  ;;  %v655_v38 = vld [vmem:[#allocation2 + $0xe8] sm:$0xff]  ;;  %v657_v39 = vld [vmem:[#allocation2 + $0xf8] sm:$0xff] }
 0x24f   : > { %1513 = vst [vmem:[#allocation2 + $0x28] sm:$0xff] %v1385_v40  ;;  %1515 = vst [vmem:[#allocation2 + $0x38] sm:$0xff] %v1387_v41 }
 0x251   : > { %v1038_v46 = vpop.f32.mrb[4].mxu0  ;;  %v1231_v47 = vpop.f32.mrb[4].mxu1 }
 0x252   : > { %v1388_v50 = vadd.f32 %v1038_v46, %v634_v42  ;;  %v1390_v51 = vadd.f32 %v1231_v47, %v636_v43  ;;  %v1040_v52 = vpop.f32.mrb[5].mxu0  ;;  %v1233_v53 = vpop.f32.mrb[5].mxu1 }
 0x253   : > { %v1389_v56 = vadd.f32 %v1040_v52, %v635_v44  ;;  %v1391_v57 = vadd.f32 %v1233_v53, %v637_v45  ;;  %v1042_v58 = vpop.f32.mrb[6].mxu0  ;;  %v1235_v59 = vpop.f32.mrb[6].mxu1  ;;  %v659_v52 = vld [vmem:[#allocation2 + $0x108] sm:$0xff]  ;;  %v661_v53 = vld [vmem:[#allocation2 + $0x118] sm:$0xff] }
 0x254   : > { %1516 = vst [vmem:[#allocation2 + $0x40] sm:$0xff] %v1388_v50  ;;  %1518 = vst [vmem:[#allocation2 + $0x50] sm:$0xff] %v1390_v51  ;;  %v1392_v60 = vadd.f32 %v1042_v58, %v638_v48  ;;  %v1394_v61 = vadd.f32 %v1235_v59, %v640_v49  ;;  %v1044_v62 = vpop.f32.mrb[7].mxu0  ;;  %v1237_v63 = vpop.f32.mrb[7].mxu1  ;;  %v658_v50 = vld [vmem:[#allocation2 + $0x100] sm:$0xff]  ;;  %v660_v51 = vld [vmem:[#allocation2 + $0x110] sm:$0xff] }
 0x255   : > { %1517 = vst [vmem:[#allocation2 + $0x48] sm:$0xff] %v1389_v56  ;;  %1519 = vst [vmem:[#allocation2 + $0x58] sm:$0xff] %v1391_v57  ;;  %v1393_v0 = vadd.f32 %v1044_v62, %v639_v54  ;;  %v1395_v1 = vadd.f32 %v1237_v63, %v641_v55  ;;  %v662_v56 = vld [vmem:[#allocation2 + $0x120] sm:$0xff]  ;;  %v664_v57 = vld [vmem:[#allocation2 + $0x130] sm:$0xff] }
 0x256   : > { %1520 = vst [vmem:[#allocation2 + $0x60] sm:$0xff] %v1392_v60  ;;  %1522 = vst [vmem:[#allocation2 + $0x70] sm:$0xff] %v1394_v61  ;;  %v663_v62 = vld [vmem:[#allocation2 + $0x128] sm:$0xff]  ;;  %v665_v63 = vld [vmem:[#allocation2 + $0x138] sm:$0xff] }
 0x257   : > { %1521 = vst [vmem:[#allocation2 + $0x68] sm:$0xff] %v1393_v0  ;;  %1523 = vst [vmem:[#allocation2 + $0x78] sm:$0xff] %v1395_v1 }
 0x259   : > { %v1048_v7 = vpop.f32.mrb[8].mxu0  ;;  %v1241_v8 = vpop.f32.mrb[8].mxu1 }
 0x25a   : > { %v1396_v11 = vadd.f32 %v1048_v7, %v642_v2  ;;  %v1398_v12 = vadd.f32 %v1241_v8, %v644_v4  ;;  %v1050_v13 = vpop.f32.mrb[9].mxu0  ;;  %v1243_v14 = vpop.f32.mrb[9].mxu1 }
 0x25b   : > { %v1397_v17 = vadd.f32 %v1050_v13, %v643_v5  ;;  %v1399_v18 = vadd.f32 %v1243_v14, %v645_v6  ;;  %v1052_v19 = vpop.f32.mrb[10].mxu0  ;;  %v1245_v20 = vpop.f32.mrb[10].mxu1  ;;  %v667_v13 = vld [vmem:[#allocation2 + $0x148] sm:$0xff]  ;;  %v669_v14 = vld [vmem:[#allocation2 + $0x158] sm:$0xff] }
 0x25c   : > { %1524 = vst [vmem:[#allocation2 + $0x80] sm:$0xff] %v1396_v11  ;;  %1526 = vst [vmem:[#allocation2 + $0x90] sm:$0xff] %v1398_v12  ;;  %v1400_v21 = vadd.f32 %v1052_v19, %v646_v9  ;;  %v1402_v22 = vadd.f32 %v1245_v20, %v648_v10  ;;  %v1054_v23 = vpop.f32.mrb[11].mxu0  ;;  %v1247_v24 = vpop.f32.mrb[11].mxu1  ;;  %v666_v11 = vld [vmem:[#allocation2 + $0x140] sm:$0xff]  ;;  %v668_v12 = vld [vmem:[#allocation2 + $0x150] sm:$0xff] }
 0x25d   : > { %1525 = vst [vmem:[#allocation2 + $0x88] sm:$0xff] %v1397_v17  ;;  %1527 = vst [vmem:[#allocation2 + $0x98] sm:$0xff] %v1399_v18  ;;  %v1401_v25 = vadd.f32 %v1054_v23, %v647_v15  ;;  %v1403_v26 = vadd.f32 %v1247_v24, %v649_v16  ;;  %v670_v17 = vld [vmem:[#allocation2 + $0x160] sm:$0xff]  ;;  %v672_v18 = vld [vmem:[#allocation2 + $0x170] sm:$0xff] }
 0x25e   : > { %1528 = vst [vmem:[#allocation2 + $0xa0] sm:$0xff] %v1400_v21  ;;  %1530 = vst [vmem:[#allocation2 + $0xb0] sm:$0xff] %v1402_v22  ;;  %v671_v23 = vld [vmem:[#allocation2 + $0x168] sm:$0xff]  ;;  %v673_v24 = vld [vmem:[#allocation2 + $0x178] sm:$0xff] }
 0x25f   : > { %1529 = vst [vmem:[#allocation2 + $0xa8] sm:$0xff] %v1401_v25  ;;  %1531 = vst [vmem:[#allocation2 + $0xb8] sm:$0xff] %v1403_v26 }
 0x261   : > { %v1058_v31 = vpop.f32.mrb[12].mxu0  ;;  %v1251_v32 = vpop.f32.mrb[12].mxu1 }
 0x262   : > { %v1404_v34 = vadd.f32 %v1058_v31, %v650_v27  ;;  %v1406_v35 = vadd.f32 %v1251_v32, %v652_v28  ;;  %v1060_v36 = vpop.f32.mrb[13].mxu0  ;;  %v1253_v37 = vpop.f32.mrb[13].mxu1 }
 0x263   : > { %v1405_v40 = vadd.f32 %v1060_v36, %v651_v29  ;;  %v1407_v41 = vadd.f32 %v1253_v37, %v653_v30  ;;  %v1062_v42 = vpop.f32.mrb[14].mxu0  ;;  %v1255_v43 = vpop.f32.mrb[14].mxu1  ;;  %v675_v36 = vld [vmem:[#allocation2 + $0x188] sm:$0xff]  ;;  %v677_v37 = vld [vmem:[#allocation2 + $0x198] sm:$0xff] }
 0x264   : > { %1532 = vst [vmem:[#allocation2 + $0xc0] sm:$0xff] %v1404_v34  ;;  %1534 = vst [vmem:[#allocation2 + $0xd0] sm:$0xff] %v1406_v35  ;;  %v1408_v44 = vadd.f32 %v1062_v42, %v654_v3  ;;  %v1410_v45 = vadd.f32 %v1255_v43, %v656_v33  ;;  %v1064_v46 = vpop.f32.mrb[15].mxu0  ;;  %v1257_v47 = vpop.f32.mrb[15].mxu1  ;;  %v674_v34 = vld [vmem:[#allocation2 + $0x180] sm:$0xff]  ;;  %v676_v35 = vld [vmem:[#allocation2 + $0x190] sm:$0xff] }
 0x265   : > { %1533 = vst [vmem:[#allocation2 + $0xc8] sm:$0xff] %v1405_v40  ;;  %1535 = vst [vmem:[#allocation2 + $0xd8] sm:$0xff] %v1407_v41  ;;  %v1409_v48 = vadd.f32 %v1064_v46, %v655_v38  ;;  %v1411_v49 = vadd.f32 %v1257_v47, %v657_v39  ;;  %v678_v40 = vld [vmem:[#allocation2 + $0x1a0] sm:$0xff]  ;;  %v680_v41 = vld [vmem:[#allocation2 + $0x1b0] sm:$0xff] }
 0x266   : > { %1536 = vst [vmem:[#allocation2 + $0xe0] sm:$0xff] %v1408_v44  ;;  %1538 = vst [vmem:[#allocation2 + $0xf0] sm:$0xff] %v1410_v45  ;;  %v679_v46 = vld [vmem:[#allocation2 + $0x1a8] sm:$0xff]  ;;  %v681_v47 = vld [vmem:[#allocation2 + $0x1b8] sm:$0xff] }
 0x267   : > { %1537 = vst [vmem:[#allocation2 + $0xe8] sm:$0xff] %v1409_v48  ;;  %1539 = vst [vmem:[#allocation2 + $0xf8] sm:$0xff] %v1411_v49 }
 0x269   : > { %v1068_v54 = vpop.f32.mrb[16].mxu0  ;;  %v1261_v55 = vpop.f32.mrb[16].mxu1 }
 0x26a   : > { %v1412_v58 = vadd.f32 %v1068_v54, %v658_v50  ;;  %v1414_v59 = vadd.f32 %v1261_v55, %v660_v51  ;;  %v1070_v60 = vpop.f32.mrb[17].mxu0  ;;  %v1263_v61 = vpop.f32.mrb[17].mxu1 }
 0x26b   : > { %v1413_v0 = vadd.f32 %v1070_v60, %v659_v52  ;;  %v1415_v1 = vadd.f32 %v1263_v61, %v661_v53  ;;  %v1072_v2 = vpop.f32.mrb[18].mxu0  ;;  %v1265_v4 = vpop.f32.mrb[18].mxu1  ;;  %v683_v60 = vld [vmem:[#allocation2 + $0x1c8] sm:$0xff]  ;;  %v685_v61 = vld [vmem:[#allocation2 + $0x1d8] sm:$0xff] }
 0x26c   : > { %1540 = vst [vmem:[#allocation2 + $0x100] sm:$0xff] %v1412_v58  ;;  %1542 = vst [vmem:[#allocation2 + $0x110] sm:$0xff] %v1414_v59  ;;  %v1416_v5 = vadd.f32 %v1072_v2, %v662_v56  ;;  %v1418_v6 = vadd.f32 %v1265_v4, %v664_v57  ;;  %v1074_v7 = vpop.f32.mrb[19].mxu0  ;;  %v1267_v8 = vpop.f32.mrb[19].mxu1  ;;  %v682_v58 = vld [vmem:[#allocation2 + $0x1c0] sm:$0xff]  ;;  %v684_v59 = vld [vmem:[#allocation2 + $0x1d0] sm:$0xff] }
 0x26d   : > { %1541 = vst [vmem:[#allocation2 + $0x108] sm:$0xff] %v1413_v0  ;;  %1543 = vst [vmem:[#allocation2 + $0x118] sm:$0xff] %v1415_v1  ;;  %v1417_v9 = vadd.f32 %v1074_v7, %v663_v62  ;;  %v1419_v10 = vadd.f32 %v1267_v8, %v665_v63  ;;  %v686_v0 = vld [vmem:[#allocation2 + $0x1e0] sm:$0xff]  ;;  %v688_v1 = vld [vmem:[#allocation2 + $0x1f0] sm:$0xff] }
 0x26e   : > { %1544 = vst [vmem:[#allocation2 + $0x120] sm:$0xff] %v1416_v5  ;;  %1546 = vst [vmem:[#allocation2 + $0x130] sm:$0xff] %v1418_v6  ;;  %v687_v7 = vld [vmem:[#allocation2 + $0x1e8] sm:$0xff]  ;;  %v689_v8 = vld [vmem:[#allocation2 + $0x1f8] sm:$0xff] }
 0x26f   : > { %1545 = vst [vmem:[#allocation2 + $0x128] sm:$0xff] %v1417_v9  ;;  %1547 = vst [vmem:[#allocation2 + $0x138] sm:$0xff] %v1419_v10 }
 0x271   : > { %v1078_v15 = vpop.f32.mrb[20].mxu0  ;;  %v1271_v16 = vpop.f32.mrb[20].mxu1 }
 0x272   : > { %v1420_v19 = vadd.f32 %v1078_v15, %v666_v11  ;;  %v1422_v20 = vadd.f32 %v1271_v16, %v668_v12  ;;  %v1080_v21 = vpop.f32.mrb[21].mxu0  ;;  %v1273_v22 = vpop.f32.mrb[21].mxu1 }
 0x273   : > { %v1421_v25 = vadd.f32 %v1080_v21, %v667_v13  ;;  %v1423_v26 = vadd.f32 %v1273_v22, %v669_v14  ;;  %v1082_v27 = vpop.f32.mrb[22].mxu0  ;;  %v1275_v28 = vpop.f32.mrb[22].mxu1  ;;  %v691_v21 = vld [vmem:[#allocation2 + $0x208] sm:$0xff]  ;;  %v693_v22 = vld [vmem:[#allocation2 + $0x218] sm:$0xff] }
 0x274   : > { %1548 = vst [vmem:[#allocation2 + $0x140] sm:$0xff] %v1420_v19  ;;  %1550 = vst [vmem:[#allocation2 + $0x150] sm:$0xff] %v1422_v20  ;;  %v1424_v29 = vadd.f32 %v1082_v27, %v670_v17  ;;  %v1426_v30 = vadd.f32 %v1275_v28, %v672_v18  ;;  %v1084_v31 = vpop.f32.mrb[23].mxu0  ;;  %v1277_v32 = vpop.f32.mrb[23].mxu1  ;;  %v690_v19 = vld [vmem:[#allocation2 + $0x200] sm:$0xff]  ;;  %v692_v20 = vld [vmem:[#allocation2 + $0x210] sm:$0xff] }
 0x275   : > { %1549 = vst [vmem:[#allocation2 + $0x148] sm:$0xff] %v1421_v25  ;;  %1551 = vst [vmem:[#allocation2 + $0x158] sm:$0xff] %v1423_v26  ;;  %v1425_v3 = vadd.f32 %v1084_v31, %v671_v23  ;;  %v1427_v33 = vadd.f32 %v1277_v32, %v673_v24  ;;  %v694_v25 = vld [vmem:[#allocation2 + $0x220] sm:$0xff]  ;;  %v696_v26 = vld [vmem:[#allocation2 + $0x230] sm:$0xff] }
 0x276   : > { %1552 = vst [vmem:[#allocation2 + $0x160] sm:$0xff] %v1424_v29  ;;  %1554 = vst [vmem:[#allocation2 + $0x170] sm:$0xff] %v1426_v30  ;;  %v695_v31 = vld [vmem:[#allocation2 + $0x228] sm:$0xff]  ;;  %v697_v32 = vld [vmem:[#allocation2 + $0x238] sm:$0xff] }
 0x277   : > { %1553 = vst [vmem:[#allocation2 + $0x168] sm:$0xff] %v1425_v3  ;;  %1555 = vst [vmem:[#allocation2 + $0x178] sm:$0xff] %v1427_v33 }
 0x279   : > { %v1088_v38 = vpop.f32.mrb[24].mxu0  ;;  %v1281_v39 = vpop.f32.mrb[24].mxu1 }
 0x27a   : > { %v1428_v42 = vadd.f32 %v1088_v38, %v674_v34  ;;  %v1430_v43 = vadd.f32 %v1281_v39, %v676_v35  ;;  %v1090_v44 = vpop.f32.mrb[25].mxu0  ;;  %v1283_v45 = vpop.f32.mrb[25].mxu1 }
 0x27b   : > { %v1429_v48 = vadd.f32 %v1090_v44, %v675_v36  ;;  %v1431_v49 = vadd.f32 %v1283_v45, %v677_v37  ;;  %v1092_v50 = vpop.f32.mrb[26].mxu0  ;;  %v1285_v51 = vpop.f32.mrb[26].mxu1  ;;  %v699_v44 = vld [vmem:[#allocation2 + $0x248] sm:$0xff]  ;;  %v701_v45 = vld [vmem:[#allocation2 + $0x258] sm:$0xff] }
 0x27c   : > { %1556 = vst [vmem:[#allocation2 + $0x180] sm:$0xff] %v1428_v42  ;;  %1558 = vst [vmem:[#allocation2 + $0x190] sm:$0xff] %v1430_v43  ;;  %v1432_v52 = vadd.f32 %v1092_v50, %v678_v40  ;;  %v1434_v53 = vadd.f32 %v1285_v51, %v680_v41  ;;  %v1094_v54 = vpop.f32.mrb[27].mxu0  ;;  %v1287_v55 = vpop.f32.mrb[27].mxu1  ;;  %v698_v42 = vld [vmem:[#allocation2 + $0x240] sm:$0xff]  ;;  %v700_v43 = vld [vmem:[#allocation2 + $0x250] sm:$0xff] }
 0x27d   : > { %1557 = vst [vmem:[#allocation2 + $0x188] sm:$0xff] %v1429_v48  ;;  %1559 = vst [vmem:[#allocation2 + $0x198] sm:$0xff] %v1431_v49  ;;  %v1433_v56 = vadd.f32 %v1094_v54, %v679_v46  ;;  %v1435_v57 = vadd.f32 %v1287_v55, %v681_v47  ;;  %v702_v48 = vld [vmem:[#allocation2 + $0x260] sm:$0xff]  ;;  %v704_v49 = vld [vmem:[#allocation2 + $0x270] sm:$0xff] }
 0x27e   : > { %1560 = vst [vmem:[#allocation2 + $0x1a0] sm:$0xff] %v1432_v52  ;;  %1562 = vst [vmem:[#allocation2 + $0x1b0] sm:$0xff] %v1434_v53  ;;  %v703_v54 = vld [vmem:[#allocation2 + $0x268] sm:$0xff]  ;;  %v705_v55 = vld [vmem:[#allocation2 + $0x278] sm:$0xff] }
 0x27f   : > { %1561 = vst [vmem:[#allocation2 + $0x1a8] sm:$0xff] %v1433_v56  ;;  %1563 = vst [vmem:[#allocation2 + $0x1b8] sm:$0xff] %v1435_v57 }
 0x281   : > { %v1098_v62 = vpop.f32.mrb[28].mxu0  ;;  %v1291_v63 = vpop.f32.mrb[28].mxu1 }
 0x282   : > { %v1436_v2 = vadd.f32 %v1098_v62, %v682_v58  ;;  %v1438_v4 = vadd.f32 %v1291_v63, %v684_v59  ;;  %v1100_v5 = vpop.f32.mrb[29].mxu0  ;;  %v1293_v6 = vpop.f32.mrb[29].mxu1 }
 0x283   : > { %v1437_v9 = vadd.f32 %v1100_v5, %v683_v60  ;;  %v1439_v10 = vadd.f32 %v1293_v6, %v685_v61  ;;  %v1102_v11 = vpop.f32.mrb[30].mxu0  ;;  %v1295_v12 = vpop.f32.mrb[30].mxu1  ;;  %v707_v5 = vld [vmem:[#allocation2 + $0x288] sm:$0xff]  ;;  %v709_v6 = vld [vmem:[#allocation2 + $0x298] sm:$0xff] }
 0x284   : > { %1564 = vst [vmem:[#allocation2 + $0x1c0] sm:$0xff] %v1436_v2  ;;  %1566 = vst [vmem:[#allocation2 + $0x1d0] sm:$0xff] %v1438_v4  ;;  %v1440_v13 = vadd.f32 %v1102_v11, %v686_v0  ;;  %v1442_v14 = vadd.f32 %v1295_v12, %v688_v1  ;;  %v1104_v15 = vpop.f32.mrb[31].mxu0  ;;  %v1297_v16 = vpop.f32.mrb[31].mxu1  ;;  %v706_v2 = vld [vmem:[#allocation2 + $0x280] sm:$0xff]  ;;  %v708_v4 = vld [vmem:[#allocation2 + $0x290] sm:$0xff] }
 0x285   : > { %1565 = vst [vmem:[#allocation2 + $0x1c8] sm:$0xff] %v1437_v9  ;;  %1567 = vst [vmem:[#allocation2 + $0x1d8] sm:$0xff] %v1439_v10  ;;  %v1441_v17 = vadd.f32 %v1104_v15, %v687_v7  ;;  %v1443_v18 = vadd.f32 %v1297_v16, %v689_v8  ;;  %v710_v9 = vld [vmem:[#allocation2 + $0x2a0] sm:$0xff]  ;;  %v712_v10 = vld [vmem:[#allocation2 + $0x2b0] sm:$0xff] }
 0x286   : > { %1568 = vst [vmem:[#allocation2 + $0x1e0] sm:$0xff] %v1440_v13  ;;  %1570 = vst [vmem:[#allocation2 + $0x1f0] sm:$0xff] %v1442_v14  ;;  %v711_v15 = vld [vmem:[#allocation2 + $0x2a8] sm:$0xff]  ;;  %v713_v16 = vld [vmem:[#allocation2 + $0x2b8] sm:$0xff] }
 0x287   : > { %1569 = vst [vmem:[#allocation2 + $0x1e8] sm:$0xff] %v1441_v17  ;;  %1571 = vst [vmem:[#allocation2 + $0x1f8] sm:$0xff] %v1443_v18 }
 0x289   : > { %v1108_v23 = vpop.f32.mrb[32].mxu0  ;;  %v1301_v24 = vpop.f32.mrb[32].mxu1 }
 0x28a   : > { %v1444_v27 = vadd.f32 %v1108_v23, %v690_v19  ;;  %v1446_v28 = vadd.f32 %v1301_v24, %v692_v20  ;;  %v1110_v29 = vpop.f32.mrb[33].mxu0  ;;  %v1303_v30 = vpop.f32.mrb[33].mxu1 }
 0x28b   : > { %v1445_v3 = vadd.f32 %v1110_v29, %v691_v21  ;;  %v1447_v33 = vadd.f32 %v1303_v30, %v693_v22  ;;  %v1112_v34 = vpop.f32.mrb[34].mxu0  ;;  %v1305_v35 = vpop.f32.mrb[34].mxu1  ;;  %v715_v29 = vld [vmem:[#allocation2 + $0x2c8] sm:$0xff]  ;;  %v717_v30 = vld [vmem:[#allocation2 + $0x2d8] sm:$0xff] }
 0x28c   : > { %1572 = vst [vmem:[#allocation2 + $0x200] sm:$0xff] %v1444_v27  ;;  %1574 = vst [vmem:[#allocation2 + $0x210] sm:$0xff] %v1446_v28  ;;  %v1448_v36 = vadd.f32 %v1112_v34, %v694_v25  ;;  %v1450_v37 = vadd.f32 %v1305_v35, %v696_v26  ;;  %v1114_v38 = vpop.f32.mrb[35].mxu0  ;;  %v1307_v39 = vpop.f32.mrb[35].mxu1  ;;  %v714_v27 = vld [vmem:[#allocation2 + $0x2c0] sm:$0xff]  ;;  %v716_v28 = vld [vmem:[#allocation2 + $0x2d0] sm:$0xff] }
 0x28d   : > { %1573 = vst [vmem:[#allocation2 + $0x208] sm:$0xff] %v1445_v3  ;;  %1575 = vst [vmem:[#allocation2 + $0x218] sm:$0xff] %v1447_v33  ;;  %v1449_v40 = vadd.f32 %v1114_v38, %v695_v31  ;;  %v1451_v41 = vadd.f32 %v1307_v39, %v697_v32  ;;  %v718_v3 = vld [vmem:[#allocation2 + $0x2e0] sm:$0xff]  ;;  %v720_v33 = vld [vmem:[#allocation2 + $0x2f0] sm:$0xff] }
 0x28e   : > { %1576 = vst [vmem:[#allocation2 + $0x220] sm:$0xff] %v1448_v36  ;;  %1578 = vst [vmem:[#allocation2 + $0x230] sm:$0xff] %v1450_v37  ;;  %v719_v38 = vld [vmem:[#allocation2 + $0x2e8] sm:$0xff]  ;;  %v721_v39 = vld [vmem:[#allocation2 + $0x2f8] sm:$0xff] }
 0x28f   : > { %1577 = vst [vmem:[#allocation2 + $0x228] sm:$0xff] %v1449_v40  ;;  %1579 = vst [vmem:[#allocation2 + $0x238] sm:$0xff] %v1451_v41 }
 0x291   : > { %v1118_v46 = vpop.f32.mrb[36].mxu0  ;;  %v1311_v47 = vpop.f32.mrb[36].mxu1 }
 0x292   : > { %v1452_v50 = vadd.f32 %v1118_v46, %v698_v42  ;;  %v1454_v51 = vadd.f32 %v1311_v47, %v700_v43  ;;  %v1120_v52 = vpop.f32.mrb[37].mxu0  ;;  %v1313_v53 = vpop.f32.mrb[37].mxu1 }
 0x293   : > { %v1453_v56 = vadd.f32 %v1120_v52, %v699_v44  ;;  %v1455_v57 = vadd.f32 %v1313_v53, %v701_v45  ;;  %v1122_v58 = vpop.f32.mrb[38].mxu0  ;;  %v1315_v59 = vpop.f32.mrb[38].mxu1  ;;  %v723_v52 = vld [vmem:[#allocation2 + $0x308] sm:$0xff]  ;;  %v725_v53 = vld [vmem:[#allocation2 + $0x318] sm:$0xff] }
 0x294   : > { %1580 = vst [vmem:[#allocation2 + $0x240] sm:$0xff] %v1452_v50  ;;  %1582 = vst [vmem:[#allocation2 + $0x250] sm:$0xff] %v1454_v51  ;;  %v1456_v60 = vadd.f32 %v1122_v58, %v702_v48  ;;  %v1458_v61 = vadd.f32 %v1315_v59, %v704_v49  ;;  %v1124_v62 = vpop.f32.mrb[39].mxu0  ;;  %v1317_v63 = vpop.f32.mrb[39].mxu1  ;;  %v722_v50 = vld [vmem:[#allocation2 + $0x300] sm:$0xff]  ;;  %v724_v51 = vld [vmem:[#allocation2 + $0x310] sm:$0xff] }
 0x295   : > { %1581 = vst [vmem:[#allocation2 + $0x248] sm:$0xff] %v1453_v56  ;;  %1583 = vst [vmem:[#allocation2 + $0x258] sm:$0xff] %v1455_v57  ;;  %v1457_v0 = vadd.f32 %v1124_v62, %v703_v54  ;;  %v1459_v1 = vadd.f32 %v1317_v63, %v705_v55  ;;  %v726_v56 = vld [vmem:[#allocation2 + $0x320] sm:$0xff]  ;;  %v728_v57 = vld [vmem:[#allocation2 + $0x330] sm:$0xff] }
 0x296   : > { %1584 = vst [vmem:[#allocation2 + $0x260] sm:$0xff] %v1456_v60  ;;  %1586 = vst [vmem:[#allocation2 + $0x270] sm:$0xff] %v1458_v61  ;;  %v727_v62 = vld [vmem:[#allocation2 + $0x328] sm:$0xff]  ;;  %v729_v63 = vld [vmem:[#allocation2 + $0x338] sm:$0xff] }
 0x297   : > { %1585 = vst [vmem:[#allocation2 + $0x268] sm:$0xff] %v1457_v0  ;;  %1587 = vst [vmem:[#allocation2 + $0x278] sm:$0xff] %v1459_v1 }
 0x299   : > { %v1128_v7 = vpop.f32.mrb[40].mxu0  ;;  %v1321_v8 = vpop.f32.mrb[40].mxu1 }
 0x29a   : > { %v1460_v11 = vadd.f32 %v1128_v7, %v706_v2  ;;  %v1462_v12 = vadd.f32 %v1321_v8, %v708_v4  ;;  %v1130_v13 = vpop.f32.mrb[41].mxu0  ;;  %v1323_v14 = vpop.f32.mrb[41].mxu1 }
 0x29b   : > { %v1461_v17 = vadd.f32 %v1130_v13, %v707_v5  ;;  %v1463_v18 = vadd.f32 %v1323_v14, %v709_v6  ;;  %v1132_v19 = vpop.f32.mrb[42].mxu0  ;;  %v1325_v20 = vpop.f32.mrb[42].mxu1  ;;  %v731_v13 = vld [vmem:[#allocation2 + $0x348] sm:$0xff]  ;;  %v733_v14 = vld [vmem:[#allocation2 + $0x358] sm:$0xff] }
 0x29c   : > { %1588 = vst [vmem:[#allocation2 + $0x280] sm:$0xff] %v1460_v11  ;;  %1590 = vst [vmem:[#allocation2 + $0x290] sm:$0xff] %v1462_v12  ;;  %v1464_v21 = vadd.f32 %v1132_v19, %v710_v9  ;;  %v1466_v22 = vadd.f32 %v1325_v20, %v712_v10  ;;  %v1134_v23 = vpop.f32.mrb[43].mxu0  ;;  %v1327_v24 = vpop.f32.mrb[43].mxu1  ;;  %v730_v11 = vld [vmem:[#allocation2 + $0x340] sm:$0xff]  ;;  %v732_v12 = vld [vmem:[#allocation2 + $0x350] sm:$0xff] }
 0x29d   : > { %1589 = vst [vmem:[#allocation2 + $0x288] sm:$0xff] %v1461_v17  ;;  %1591 = vst [vmem:[#allocation2 + $0x298] sm:$0xff] %v1463_v18  ;;  %v1465_v25 = vadd.f32 %v1134_v23, %v711_v15  ;;  %v1467_v26 = vadd.f32 %v1327_v24, %v713_v16  ;;  %v734_v17 = vld [vmem:[#allocation2 + $0x360] sm:$0xff]  ;;  %v736_v18 = vld [vmem:[#allocation2 + $0x370] sm:$0xff] }
 0x29e   : > { %1592 = vst [vmem:[#allocation2 + $0x2a0] sm:$0xff] %v1464_v21  ;;  %1594 = vst [vmem:[#allocation2 + $0x2b0] sm:$0xff] %v1466_v22  ;;  %v735_v23 = vld [vmem:[#allocation2 + $0x368] sm:$0xff]  ;;  %v737_v24 = vld [vmem:[#allocation2 + $0x378] sm:$0xff] }
 0x29f   : > { %1593 = vst [vmem:[#allocation2 + $0x2a8] sm:$0xff] %v1465_v25  ;;  %1595 = vst [vmem:[#allocation2 + $0x2b8] sm:$0xff] %v1467_v26 }
 0x2a1   : > { %v1138_v31 = vpop.f32.mrb[44].mxu0  ;;  %v1331_v32 = vpop.f32.mrb[44].mxu1 }
 0x2a2   : > { %v1468_v34 = vadd.f32 %v1138_v31, %v714_v27  ;;  %v1470_v35 = vadd.f32 %v1331_v32, %v716_v28  ;;  %v1140_v36 = vpop.f32.mrb[45].mxu0  ;;  %v1333_v37 = vpop.f32.mrb[45].mxu1 }
 0x2a3   : > { %v1469_v40 = vadd.f32 %v1140_v36, %v715_v29  ;;  %v1471_v41 = vadd.f32 %v1333_v37, %v717_v30  ;;  %v1142_v42 = vpop.f32.mrb[46].mxu0  ;;  %v1335_v43 = vpop.f32.mrb[46].mxu1  ;;  %v739_v36 = vld [vmem:[#allocation2 + $0x388] sm:$0xff]  ;;  %v741_v37 = vld [vmem:[#allocation2 + $0x398] sm:$0xff] }
 0x2a4   : > { %1596 = vst [vmem:[#allocation2 + $0x2c0] sm:$0xff] %v1468_v34  ;;  %1598 = vst [vmem:[#allocation2 + $0x2d0] sm:$0xff] %v1470_v35  ;;  %v1472_v44 = vadd.f32 %v1142_v42, %v718_v3  ;;  %v1474_v45 = vadd.f32 %v1335_v43, %v720_v33  ;;  %v1144_v46 = vpop.f32.mrb[47].mxu0  ;;  %v1337_v47 = vpop.f32.mrb[47].mxu1  ;;  %v738_v34 = vld [vmem:[#allocation2 + $0x380] sm:$0xff]  ;;  %v740_v35 = vld [vmem:[#allocation2 + $0x390] sm:$0xff] }
 0x2a5   : > { %1597 = vst [vmem:[#allocation2 + $0x2c8] sm:$0xff] %v1469_v40  ;;  %1599 = vst [vmem:[#allocation2 + $0x2d8] sm:$0xff] %v1471_v41  ;;  %v1473_v48 = vadd.f32 %v1144_v46, %v719_v38  ;;  %v1475_v49 = vadd.f32 %v1337_v47, %v721_v39  ;;  %v742_v40 = vld [vmem:[#allocation2 + $0x3a0] sm:$0xff]  ;;  %v744_v41 = vld [vmem:[#allocation2 + $0x3b0] sm:$0xff] }
 0x2a6   : > { %1600 = vst [vmem:[#allocation2 + $0x2e0] sm:$0xff] %v1472_v44  ;;  %1602 = vst [vmem:[#allocation2 + $0x2f0] sm:$0xff] %v1474_v45  ;;  %v743_v46 = vld [vmem:[#allocation2 + $0x3a8] sm:$0xff]  ;;  %v745_v47 = vld [vmem:[#allocation2 + $0x3b8] sm:$0xff] }
 0x2a7   : > { %1601 = vst [vmem:[#allocation2 + $0x2e8] sm:$0xff] %v1473_v48  ;;  %1603 = vst [vmem:[#allocation2 + $0x2f8] sm:$0xff] %v1475_v49 }
 0x2a9   : > { %v1148_v54 = vpop.f32.mrb[48].mxu0  ;;  %v1341_v55 = vpop.f32.mrb[48].mxu1 }
 0x2aa   : > { %v1476_v58 = vadd.f32 %v1148_v54, %v722_v50  ;;  %v1478_v59 = vadd.f32 %v1341_v55, %v724_v51  ;;  %v1150_v60 = vpop.f32.mrb[49].mxu0  ;;  %v1343_v61 = vpop.f32.mrb[49].mxu1 }
 0x2ab   : > { %v1477_v0 = vadd.f32 %v1150_v60, %v723_v52  ;;  %v1479_v1 = vadd.f32 %v1343_v61, %v725_v53  ;;  %v1152_v2 = vpop.f32.mrb[50].mxu0  ;;  %v1345_v4 = vpop.f32.mrb[50].mxu1  ;;  %v747_v60 = vld [vmem:[#allocation2 + $0x3c8] sm:$0xff]  ;;  %v749_v61 = vld [vmem:[#allocation2 + $0x3d8] sm:$0xff] }
 0x2ac   : > { %1604 = vst [vmem:[#allocation2 + $0x300] sm:$0xff] %v1476_v58  ;;  %1606 = vst [vmem:[#allocation2 + $0x310] sm:$0xff] %v1478_v59  ;;  %v1480_v5 = vadd.f32 %v1152_v2, %v726_v56  ;;  %v1482_v6 = vadd.f32 %v1345_v4, %v728_v57  ;;  %v1154_v7 = vpop.f32.mrb[51].mxu0  ;;  %v1347_v8 = vpop.f32.mrb[51].mxu1  ;;  %v746_v58 = vld [vmem:[#allocation2 + $0x3c0] sm:$0xff]  ;;  %v748_v59 = vld [vmem:[#allocation2 + $0x3d0] sm:$0xff] }
 0x2ad   : > { %1605 = vst [vmem:[#allocation2 + $0x308] sm:$0xff] %v1477_v0  ;;  %1607 = vst [vmem:[#allocation2 + $0x318] sm:$0xff] %v1479_v1  ;;  %v1481_v9 = vadd.f32 %v1154_v7, %v727_v62  ;;  %v1483_v10 = vadd.f32 %v1347_v8, %v729_v63  ;;  %v750_v0 = vld [vmem:[#allocation2 + $0x3e0] sm:$0xff]  ;;  %v752_v1 = vld [vmem:[#allocation2 + $0x3f0] sm:$0xff] }
 0x2ae   : > { %1608 = vst [vmem:[#allocation2 + $0x320] sm:$0xff] %v1480_v5  ;;  %1610 = vst [vmem:[#allocation2 + $0x330] sm:$0xff] %v1482_v6  ;;  %v751_v7 = vld [vmem:[#allocation2 + $0x3e8] sm:$0xff]  ;;  %v753_v8 = vld [vmem:[#allocation2 + $0x3f8] sm:$0xff] }
 0x2af   : > { %1609 = vst [vmem:[#allocation2 + $0x328] sm:$0xff] %v1481_v9  ;;  %1611 = vst [vmem:[#allocation2 + $0x338] sm:$0xff] %v1483_v10 }
 0x2b1   : > { %v1158_v15 = vpop.f32.mrb[52].mxu0  ;;  %v1351_v16 = vpop.f32.mrb[52].mxu1 }
 0x2b2   : > { %v1484_v19 = vadd.f32 %v1158_v15, %v730_v11  ;;  %v1486_v20 = vadd.f32 %v1351_v16, %v732_v12  ;;  %v1160_v21 = vpop.f32.mrb[53].mxu0  ;;  %v1353_v22 = vpop.f32.mrb[53].mxu1 }
 0x2b3   : > { %v1485_v25 = vadd.f32 %v1160_v21, %v731_v13  ;;  %v1487_v26 = vadd.f32 %v1353_v22, %v733_v14  ;;  %v1162_v27 = vpop.f32.mrb[54].mxu0  ;;  %v1355_v28 = vpop.f32.mrb[54].mxu1  ;;  %v5675_v21 = vmov (!%p4493_p9), 0   ;;  %v5102_v22 = vld [vmem:[#allocation9 + $0x24] ss:$16 sps:$4 sm:$0xff] (!%p4493_p9)  }
 0x2b4   : > { %1612 = vst [vmem:[#allocation2 + $0x340] sm:$0xff] %v1484_v19  ;;  %1614 = vst [vmem:[#allocation2 + $0x350] sm:$0xff] %v1486_v20  ;;  %v1488_v29 = vadd.f32 %v1162_v27, %v734_v17  ;;  %v1490_v30 = vadd.f32 %v1355_v28, %v736_v18  ;;  %v1164_v31 = vpop.f32.mrb[55].mxu0  ;;  %v1357_v32 = vpop.f32.mrb[55].mxu1  ;;  %v5099_v19 = vld [vmem:[#allocation9 + $0x4] ss:$16 sps:$4 sm:$0xff] (!%p4493_p9)   ;;  %2040 = vmatprep.mubr.bf16.mxu0 (!%p4493_p9), %v5675_v21  ;;  %2120 = vmatprep.mubr.bf16.mxu1 (!%p4493_p9), %v5675_v21 }
 0x2b5   : > { %1613 = vst [vmem:[#allocation2 + $0x348] sm:$0xff] %v1485_v25  ;;  %1615 = vst [vmem:[#allocation2 + $0x358] sm:$0xff] %v1487_v26  ;;  %v1489_v3 = vadd.f32 %v1164_v31, %v735_v23  ;;  %v1491_v33 = vadd.f32 %v1357_v32, %v737_v24  ;;  %v5101_v20 = vld [vmem:[#allocation9] ss:$16 sps:$4 sm:$0xff] (!%p4493_p9)   ;;  %2008 = vmatprep.subr.bf16.mxu0 (!%p4493_p9), %v5099_v19  ;;  %4729 = vmatprep.subr.bf16.mxu1 (!%p4493_p9), %v5099_v19  ;;  %v5105_v24 = vld [vmem:[#allocation9 + $0x44] ss:$16 sps:$4 sm:$0xff] (!%p4493_p9)  }
 0x2b6   : > { %1616 = vst [vmem:[#allocation2 + $0x360] sm:$0xff] %v1488_v29  ;;  %1618 = vst [vmem:[#allocation2 + $0x370] sm:$0xff] %v1490_v30  ;;  %2009 = vmatpush1.bf16.msra.mxu0 (!%p4493_p9), %v5101_v20  ;;  %v5104_v23 = vld [vmem:[#allocation9 + $0x20] ss:$16 sps:$4 sm:$0xff] (!%p4493_p9)   ;;  %4737 = vmatpush1.bf16.msra.mxu1 (!%p4493_p9), %v5101_v20  ;;  %v5108_v26 = vld [vmem:[#allocation9 + $0x64] ss:$16 sps:$4 sm:$0xff] (!%p4493_p9)  }
 0x2b7   : > { %1617 = vst [vmem:[#allocation2 + $0x368] sm:$0xff] %v1489_v3  ;;  %1619 = vst [vmem:[#allocation2 + $0x378] sm:$0xff] %v1491_v33  ;;  %2010 = vmatprep.subr.bf16.mxu0 (!%p4493_p9), %v5102_v22  ;;  %4730 = vmatprep.subr.bf16.mxu1 (!%p4493_p9), %v5102_v22  ;;  %v5107_v25 = vld [vmem:[#allocation9 + $0x40] ss:$16 sps:$4 sm:$0xff] (!%p4493_p9)   ;;  %v5111_v28 = vld [vmem:[#allocation9 + $0x84] ss:$16 sps:$4 sm:$0xff] (!%p4493_p9)  }
 0x2b8   : > { %v5110_v27 = vld [vmem:[#allocation9 + $0x60] ss:$16 sps:$4 sm:$0xff] (!%p4493_p9)   ;;  %v5114_v30 = vld [vmem:[#allocation9 + $0xa4] ss:$16 sps:$4 sm:$0xff] (!%p4493_p9)   ;;  %v5141_v20 = vld [vmem:[#allocation9 + $0xc8] ss:$16 sps:$4 sm:$0xff] (!%p4493_p9)  }
 0x2b9   : > { %v1168_v38 = vpop.f32.mrb[56].mxu0  ;;  %v1361_v39 = vpop.f32.mrb[56].mxu1  ;;  %v5113_v29 = vld [vmem:[#allocation9 + $0x80] ss:$16 sps:$4 sm:$0xff] (!%p4493_p9)   ;;  %v5117_v32 = vld [vmem:[#allocation9 + $0xc4] ss:$16 sps:$4 sm:$0xff] (!%p4493_p9)  }
 0x2ba   : > { %v1492_v42 = vadd.f32 %v1168_v38, %v738_v34  ;;  %v1494_v43 = vadd.f32 %v1361_v39, %v740_v35  ;;  %v1170_v44 = vpop.f32.mrb[57].mxu0  ;;  %v1363_v45 = vpop.f32.mrb[57].mxu1  ;;  %2011 = vmatpush1.bf16.msra.mxu0 (!%p4493_p9), %v5104_v23  ;;  %4738 = vmatpush1.bf16.msra.mxu1 (!%p4493_p9), %v5104_v23  ;;  %v5116_v31 = vld [vmem:[#allocation9 + $0xa0] ss:$16 sps:$4 sm:$0xff] (!%p4493_p9)   ;;  %v5120_v33 = vld [vmem:[#allocation9 + $0xe4] ss:$16 sps:$4 sm:$0xff] (!%p4493_p9)  }
 0x2bb   : > { %v1493_v48 = vadd.f32 %v1170_v44, %v739_v36  ;;  %v1495_v49 = vadd.f32 %v1363_v45, %v741_v37  ;;  %v1172_v50 = vpop.f32.mrb[58].mxu0  ;;  %v1365_v51 = vpop.f32.mrb[58].mxu1  ;;  %2012 = vmatprep.subr.bf16.mxu0 (!%p4493_p9), %v5105_v24  ;;  %4731 = vmatprep.subr.bf16.mxu1 (!%p4493_p9), %v5105_v24  ;;  %v5119_v3 = vld [vmem:[#allocation9 + $0xc0] ss:$16 sps:$4 sm:$0xff] (!%p4493_p9)   ;;  %v1769_v36 = vld [vmem:[%s6132_s3 + $0x8] sm:$0xff] (!%p4493_p9)  ;;  %v1771_v45 = vld [vmem:[%s6132_s3 + $0x18] sm:$0xff] (!%p4493_p9) }
 0x2bc   : > { %1620 = vst [vmem:[#allocation2 + $0x380] sm:$0xff] %v1492_v42  ;;  %1622 = vst [vmem:[#allocation2 + $0x390] sm:$0xff] %v1494_v43  ;;  %v1496_v52 = vadd.f32 %v1172_v50, %v742_v40  ;;  %v1498_v53 = vadd.f32 %v1365_v51, %v744_v41  ;;  %v1174_v54 = vpop.f32.mrb[59].mxu0  ;;  %v1367_v55 = vpop.f32.mrb[59].mxu1  ;;  %v5122_v34 = vld [vmem:[#allocation9 + $0xe0] ss:$16 sps:$4 sm:$0xff] (!%p4493_p9)  }
 0x2bd   : > { %1621 = vst [vmem:[#allocation2 + $0x388] sm:$0xff] %v1493_v48  ;;  %1623 = vst [vmem:[#allocation2 + $0x398] sm:$0xff] %v1495_v49  ;;  %v1497_v56 = vadd.f32 %v1174_v54, %v743_v46  ;;  %v1499_v57 = vadd.f32 %v1367_v55, %v745_v47  ;;  %v1768_v35 = vld [vmem:[%s6132_s3] sm:$0xff] (!%p4493_p9)  ;;  %v1785_v38 = vld [vmem:[%s6132_s3 + $0x88] sm:$0xff] (!%p4493_p9) }
 0x2be   : > { %1624 = vst [vmem:[#allocation2 + $0x3a0] sm:$0xff] %v1496_v52  ;;  %1626 = vst [vmem:[#allocation2 + $0x3b0] sm:$0xff] %v1498_v53  ;;  %2013 = vmatpush1.bf16.msra.mxu0 (!%p4493_p9), %v5107_v25  ;;  %4739 = vmatpush1.bf16.msra.mxu1 (!%p4493_p9), %v5107_v25  ;;  %v1784_v37 = vld [vmem:[%s6132_s3 + $0x80] sm:$0xff] (!%p4493_p9)  ;;  %v5125_v39 = vld [vmem:[#allocation9 + $0xc] ss:$16 sps:$4 sm:$0xff] (!%p4493_p9)   ;;  %v6387_v40 = vpack.c.bf16 (!%p4493_p9), %v1769_v36, %v1768_v35 }
 0x2bf   : > { %1625 = vst [vmem:[#allocation2 + $0x3a8] sm:$0xff] %v1497_v56  ;;  %1627 = vst [vmem:[#allocation2 + $0x3b8] sm:$0xff] %v1499_v57  ;;  %2014 = vmatprep.subr.bf16.mxu0 (!%p4493_p9), %v5108_v26  ;;  %4732 = vmatprep.subr.bf16.mxu1 (!%p4493_p9), %v5108_v26  ;;  %v6389_v41 = vpack.c.bf16 (!%p4493_p9), %v1785_v38, %v1784_v37  ;;  %v5123_v42 = vld [vmem:[#allocation9 + $0x8] ss:$16 sps:$4 sm:$0xff] (!%p4493_p9)   ;;  %v5128_v43 = vld [vmem:[#allocation9 + $0x2c] ss:$16 sps:$4 sm:$0xff] (!%p4493_p9)  }
 0x2c0   : > { %v1770_v44 = vld [vmem:[%s6132_s3 + $0x10] sm:$0xff] (!%p4493_p9)  ;;  %v5149_v47 = vld [vmem:[#allocation11 + $0x4] ss:$8 sps:$4 sm:$0xff] (!%p4493_p9)   ;;  %v1787_v48 = vld [vmem:[%s6132_s3 + $0x98] sm:$0xff] (!%p4493_p9) }
 0x2c1   : > { %v1178_v62 = vpop.f32.mrb[60].mxu0  ;;  %v1371_v63 = vpop.f32.mrb[60].mxu1  ;;  %1639 = sbr.rel (%p4493_p9) target bundleno = 1798 (0x706), region = 88  ;;  %v1786_v46 = vld [vmem:[%s6132_s3 + $0x90] sm:$0xff] (!%p4493_p9)  ;;  %v5147_v49 = vld [vmem:[#allocation11] ss:$8 sps:$4 sm:$0xff] (!%p4493_p9)   ;;  %v6399_v53 = vpack.c.bf16 (!%p4493_p9), %v1771_v45, %v1770_v44 }
 0x2c2   : > { %v1500_v2 = vadd.f32 %v1178_v62, %v746_v58  ;;  %v1502_v4 = vadd.f32 %v1371_v63, %v748_v59  ;;  %v1180_v5 = vpop.f32.mrb[61].mxu0  ;;  %v1373_v6 = vpop.f32.mrb[61].mxu1  ;;  %2015 = vmatpush1.bf16.msra.mxu0 (!%p4493_p9), %v5110_v27  ;;  %4740 = vmatpush1.bf16.msra.mxu1 (!%p4493_p9), %v5110_v27  ;;  %v5126_v50 = vld [vmem:[#allocation9 + $0x28] ss:$16 sps:$4 sm:$0xff] (!%p4493_p9)   ;;  %v5152_v51 = vld [vmem:[#allocation11 + $0x14] ss:$8 sps:$4 sm:$0xff] (!%p4493_p9)   ;;  %v6401_v54 = vpack.c.bf16 (!%p4493_p9), %v1787_v48, %v1786_v46 }
 0x2c3   : > { %v1501_v9 = vadd.f32 %v1180_v5, %v747_v60  ;;  %v1503_v10 = vadd.f32 %v1373_v6, %v749_v61  ;;  %v1182_v11 = vpop.f32.mrb[62].mxu0  ;;  %v1375_v12 = vpop.f32.mrb[62].mxu1  ;;  %2016 = vmatprep.subr.bf16.mxu0 (!%p4493_p9), %v5111_v28  ;;  %4733 = vmatprep.subr.bf16.mxu1 (!%p4493_p9), %v5111_v28  ;;  %v5131_v52 = vld [vmem:[#allocation9 + $0x4c] ss:$16 sps:$4 sm:$0xff] (!%p4493_p9)   ;;  %v5129_v55 = vld [vmem:[#allocation9 + $0x48] ss:$16 sps:$4 sm:$0xff] (!%p4493_p9)  }
 0x2c4   : > { %1628 = vst [vmem:[#allocation2 + $0x3c0] sm:$0xff] %v1500_v2  ;;  %1630 = vst [vmem:[#allocation2 + $0x3d0] sm:$0xff] %v1502_v4  ;;  %v1504_v13 = vadd.f32 %v1182_v11, %v750_v0  ;;  %v1506_v14 = vadd.f32 %v1375_v12, %v752_v1  ;;  %v1184_v15 = vpop.f32.mrb[63].mxu0  ;;  %v1377_v16 = vpop.f32.mrb[63].mxu1  ;;  %v5134_v56 = vld [vmem:[#allocation9 + $0x6c] ss:$16 sps:$4 sm:$0xff] (!%p4493_p9)  }
 0x2c5   : > { %1629 = vst [vmem:[#allocation2 + $0x3c8] sm:$0xff] %v1501_v9  ;;  %1631 = vst [vmem:[#allocation2 + $0x3d8] sm:$0xff] %v1503_v10  ;;  %v1505_v17 = vadd.f32 %v1184_v15, %v751_v7  ;;  %v1507_v18 = vadd.f32 %v1377_v16, %v753_v8  ;;  %v5150_v57 = vld [vmem:[#allocation11 + $0x10] ss:$8 sps:$4 sm:$0xff] (!%p4493_p9)   ;;  %v1772_v58 = vld [vmem:[%s6132_s3 + $0x20] sm:$0xff] (!%p4493_p9) }
 0x2c6   : > { %1632 = vst [vmem:[#allocation2 + $0x3e0] sm:$0xff] %v1504_v13  ;;  %1634 = vst [vmem:[#allocation2 + $0x3f0] sm:$0xff] %v1506_v14  ;;  %2017 = vmatpush1.bf16.msra.mxu0 (!%p4493_p9), %v5113_v29  ;;  %4741 = vmatpush1.bf16.msra.mxu1 (!%p4493_p9), %v5113_v29  ;;  %v1773_v59 = vld [vmem:[%s6132_s3 + $0x28] sm:$0xff] (!%p4493_p9)  ;;  %v1788_v61 = vld [vmem:[%s6132_s3 + $0xa0] sm:$0xff] (!%p4493_p9) }
 0x2c7   : > { %1633 = vst [vmem:[#allocation2 + $0x3e8] sm:$0xff] %v1505_v17  ;;  %1635 = vst [vmem:[#allocation2 + $0x3f8] sm:$0xff] %v1507_v18  ;;  %2018 = vmatprep.subr.bf16.mxu0 (!%p4493_p9), %v5114_v30  ;;  %4734 = vmatprep.subr.bf16.mxu1 (!%p4493_p9), %v5114_v30  ;;  %v5155_v60 = vld [vmem:[#allocation11 + $0x24] ss:$8 sps:$4 sm:$0xff] (!%p4493_p9)   ;;  %v5132_v63 = vld [vmem:[#allocation9 + $0x68] ss:$16 sps:$4 sm:$0xff] (!%p4493_p9)   ;;  %v6411_v4 = vpack.c.bf16 (!%p4493_p9), %v1773_v59, %v1772_v58 }
 0x2c8   : > { %v1789_v62 = vld [vmem:[%s6132_s3 + $0xa8] sm:$0xff]  ;;  %v5158_v2 = vld [vmem:[#allocation11 + $0x34] ss:$8 sps:$4 sm:$0xff]   ;;  %v5156_v8 = vld [vmem:[#allocation11 + $0x30] ss:$8 sps:$4 sm:$0xff]  }
 0x2c9   : > { %v5137_v0 = vld [vmem:[#allocation9 + $0x8c] ss:$16 sps:$4 sm:$0xff]   ;;  %v5153_v1 = vld [vmem:[#allocation11 + $0x20] ss:$8 sps:$4 sm:$0xff]   ;;  %v6413_v5 = vpack.c.bf16 %v1789_v62, %v1788_v61  ;;  %v1774_v10 = vld [vmem:[%s6132_s3 + $0x30] sm:$0xff] }
 0x2ca   : > { %2019 = vmatpush1.bf16.msra.mxu0 %v5116_v31  ;;  %4742 = vmatpush1.bf16.msra.mxu1 %v5116_v31  ;;  %v5135_v6 = vld [vmem:[#allocation9 + $0x88] ss:$16 sps:$4 sm:$0xff]   ;;  %v5140_v7 = vld [vmem:[#allocation9 + $0xac] ss:$16 sps:$4 sm:$0xff]   ;;  %v1790_v12 = vld [vmem:[%s6132_s3 + $0xb0] sm:$0xff] }
 0x2cb   : > { %2020 = vmatprep.subr.bf16.mxu0 %v5117_v32  ;;  %4735 = vmatprep.subr.bf16.mxu1 %v5117_v32  ;;  %v5161_v9 = vld [vmem:[#allocation11 + $0x44] ss:$8 sps:$4 sm:$0xff]   ;;  %v1775_v11 = vld [vmem:[%s6132_s3 + $0x38] sm:$0xff]  ;;  %v5159_v15 = vld [vmem:[#allocation11 + $0x40] ss:$8 sps:$4 sm:$0xff]  }
 0x2cc   : > { %v1791_v13 = vld [vmem:[%s6132_s3 + $0xb8] sm:$0xff]  ;;  %v6423_v18 = vpack.c.bf16 %v1775_v11, %v1774_v10  ;;  %v5167_v24 = vld [vmem:[#allocation11 + $0x64] ss:$8 sps:$4 sm:$0xff]   ;;  %v5165_v30 = vld [vmem:[#allocation11 + $0x60] ss:$8 sps:$4 sm:$0xff]  }
 0x2cd   : > { %v5138_v14 = vld [vmem:[#allocation9 + $0xa8] ss:$16 sps:$4 sm:$0xff]   ;;  %v5143_v16 = vld [vmem:[#allocation9 + $0xcc] ss:$16 sps:$4 sm:$0xff]   ;;  %v6425_v19 = vpack.c.bf16 %v1791_v13, %v1790_v12  ;;  %v1776_v25 = vld [vmem:[%s6132_s3 + $0x40] sm:$0xff] }
 0x2ce   : > { %2021 = vmatpush1.bf16.msra.mxu0 %v5119_v3  ;;  %4743 = vmatpush1.bf16.msra.mxu1 %v5119_v3  ;;  %v5164_v17 = vld [vmem:[#allocation11 + $0x54] ss:$8 sps:$4 sm:$0xff]   ;;  %v5162_v22 = vld [vmem:[#allocation11 + $0x50] ss:$8 sps:$4 sm:$0xff]   ;;  %v1777_v26 = vld [vmem:[%s6132_s3 + $0x48] sm:$0xff] }
 0x2cf   : > { %2022 = vmatprep.subr.bf16.mxu0 %v5120_v33  ;;  %4736 = vmatprep.subr.bf16.mxu1 %v5120_v33  ;;  %v5146_v23 = vld [vmem:[#allocation9 + $0xec] ss:$16 sps:$4 sm:$0xff]   ;;  %v1792_v27 = vld [vmem:[%s6132_s3 + $0xc0] sm:$0xff]  ;;  %v5144_v29 = vld [vmem:[#allocation9 + $0xe8] ss:$16 sps:$4 sm:$0xff]   ;;  %v6435_v32 = vpack.c.bf16 %v1777_v26, %v1776_v25 }
 0x2d0   : > { %v1793_v28 = vld [vmem:[%s6132_s3 + $0xc8] sm:$0xff]  ;;  %v5170_v31 = vld [vmem:[#allocation11 + $0x74] ss:$8 sps:$4 sm:$0xff]   ;;  %v5168_v33 = vld [vmem:[#allocation11 + $0x70] ss:$8 sps:$4 sm:$0xff]  }
 0x2d1   : > { %v6437_v3 = vpack.c.bf16 %v1793_v28, %v1792_v27  ;;  %v1778_v35 = vld [vmem:[%s6132_s3 + $0x50] sm:$0xff]  ;;  %v1779_v36 = vld [vmem:[%s6132_s3 + $0x58] sm:$0xff]  ;;  %v5179_v46 = vld [vmem:[#allocation11 + $0xa4] ss:$8 sps:$4 sm:$0xff]  }
 0x2d2   : > { %2023 = vmatpush1.bf16.msra.mxu0 %v5122_v34  ;;  %4744 = vmatpush1.bf16.msra.mxu1 %v5122_v34  ;;  %v5173_v34 = vld [vmem:[#allocation11 + $0x84] ss:$8 sps:$4 sm:$0xff]   ;;  %v1794_v37 = vld [vmem:[%s6132_s3 + $0xd0] sm:$0xff]  ;;  %v1795_v38 = vld [vmem:[%s6132_s3 + $0xd8] sm:$0xff] }
 0x2d3   : > { %2201 = vmatprep.subr.bf16.mxu1 %v5125_v39  ;;  %3260 = vmatprep.subr.bf16.mxu0 %v5149_v47  ;;  %v5171_v39 = vld [vmem:[#allocation11 + $0x80] ss:$8 sps:$4 sm:$0xff]   ;;  %v6449_v44 = vpack.c.bf16 %v1795_v38, %v1794_v37  ;;  %v5174_v45 = vld [vmem:[#allocation11 + $0x90] ss:$8 sps:$4 sm:$0xff]   ;;  %v5185_v58 = vld [vmem:[#allocation11 + $0xc4] ss:$8 sps:$4 sm:$0xff]  }
 0x2d4   : > { %v1780_v47 = vld [vmem:[%s6132_s3 + $0x60] sm:$0xff]  ;;  %v1781_v48 = vld [vmem:[%s6132_s3 + $0x68] sm:$0xff]  ;;  %v1782_v59 = vld [vmem:[%s6132_s3 + $0x70] sm:$0xff] }
 0x2d5   : > { %2041 = vmatmul.mubr.bf16.vlgmr.msra.gmra.mrb[0].mxu0 %v6387_v40  ;;  %2121 = vmatmul.mubr.bf16.vlgmr.msra.gmra.mrb[0].mxu1 %v6389_v41  ;;  %v1798_v61 = vld [vmem:[%s6132_s3 + $0xf0] sm:$0xff]  ;;  %v1799_v62 = vld [vmem:[%s6132_s3 + $0xf8] sm:$0xff]  ;;  %v1640_v11 = vld [vmem:[#allocation2] sm:$0xff] }
 0x2d6   : > { %2050 = vmatprep.mubr.bf16.mxu0 %v5675_v21  ;;  %2202 = vmatpush1.bf16.msra.mxu1 %v5123_v42  ;;  %v5176_v42 = vld [vmem:[#allocation11 + $0x94] ss:$8 sps:$4 sm:$0xff]   ;;  %v1704_v12 = vld [vmem:[#allocation2 + $0x200] sm:$0xff]  ;;  %v1709_v26 = vld [vmem:[#allocation2 + $0x228] sm:$0xff] }
 0x2d7   : > { %2130 = vmatprep.mubr.bf16.mxu1 %v5675_v21  ;;  %2203 = vmatprep.subr.bf16.mxu1 %v5128_v43  ;;  %v6447_v43 = vpack.c.bf16 %v1779_v36, %v1778_v35 }
 0x2d8   : > { %3261 = vmatpush1.bf16.msra.mxu0 %v5147_v49  ;;  %v1796_v49 = vld [vmem:[%s6132_s3 + $0xe0] sm:$0xff] }
 0x2d9   : > { %3262 = vmatprep.subr.bf16.mxu0 %v5152_v51  ;;  %v5177_v51 = vld [vmem:[#allocation11 + $0xa0] ss:$8 sps:$4 sm:$0xff]  }
 0x2da   : > { %2204 = vmatpush1.bf16.msra.mxu1 %v5126_v50  ;;  %v1797_v50 = vld [vmem:[%s6132_s3 + $0xe8] sm:$0xff] }
 0x2db   : > { %2205 = vmatprep.subr.bf16.mxu1 %v5131_v52  ;;  %v5182_v52 = vld [vmem:[#allocation11 + $0xb4] ss:$8 sps:$4 sm:$0xff]  }
 0x2dc   : > { %3263 = vmatpush1.bf16.msra.mxu0 %v5150_v57  ;;  %v5180_v57 = vld [vmem:[#allocation11 + $0xb0] ss:$8 sps:$4 sm:$0xff]  }
 0x2dd   : > { %2051 = vmatmul.mubr.bf16.gmra.mrb[4].mxu0 %v6399_v53  ;;  %2131 = vmatmul.mubr.bf16.gmra.mrb[4].mxu1 %v6401_v54 }
 0x2de   : > { %2060 = vmatprep.mubr.bf16.mxu0 %v5675_v21  ;;  %2140 = vmatprep.mubr.bf16.mxu1 %v5675_v21 }
 0x2df   : > { %2206 = vmatpush1.bf16.msra.mxu1 %v5129_v55  ;;  %3264 = vmatprep.subr.bf16.mxu0 %v5155_v60  ;;  %v1806_v55 = vpack.c.bf16 %v1781_v48, %v1780_v47  ;;  %v1783_v60 = vld [vmem:[%s6132_s3 + $0x78] sm:$0xff] }
 0x2e0   : > { %2207 = vmatprep.subr.bf16.mxu1 %v5134_v56  ;;  %3265 = vmatpush1.bf16.msra.mxu0 %v5153_v1  ;;  %v6459_v56 = vpack.c.bf16 %v1797_v50, %v1796_v49  ;;  %v1815_v1 = vpack.c.bf16 %v1799_v62, %v1798_v61  ;;  %v1712_v49 = vld [vmem:[#allocation2 + $0x240] sm:$0xff] }
 0x2e1   : > { %3266 = vmatprep.subr.bf16.mxu0 %v5158_v2  ;;  %v5188_v2 = vld [vmem:[#allocation11 + $0xd4] ss:$8 sps:$4 sm:$0xff]  }
 0x2e3   : > { %2208 = vmatpush1.bf16.msra.mxu1 %v5132_v63  ;;  %v5183_v63 = vld [vmem:[#allocation11 + $0xc0] ss:$8 sps:$4 sm:$0xff]  }
 0x2e4   : > { %2209 = vmatprep.subr.bf16.mxu1 %v5137_v0  ;;  %3267 = vmatpush1.bf16.msra.mxu0 %v5156_v8  ;;  %v1807_v0 = vpack.c.bf16 %v1783_v60, %v1782_v59  ;;  %v5189_v8 = vld [vmem:[#allocation11 + $0xe0] ss:$8 sps:$4 sm:$0xff]  }
 0x2e5   : > { %2061 = vmatmul.mubr.bf16.gmra.mrb[8].mxu0 %v6411_v4  ;;  %2141 = vmatmul.mubr.bf16.gmra.mrb[8].mxu1 %v6413_v5 }
 0x2e6   : > { %2070 = vmatprep.mubr.bf16.mxu0 %v5675_v21  ;;  %2150 = vmatprep.mubr.bf16.mxu1 %v5675_v21 }
 0x2e7   : > { %2210 = vmatpush1.bf16.msra.mxu1 %v5135_v6  ;;  %3268 = vmatprep.subr.bf16.mxu0 %v5161_v9  ;;  %v5186_v6 = vld [vmem:[#allocation11 + $0xd0] ss:$8 sps:$4 sm:$0xff]   ;;  %v6503_v9 = vld [vmem:[%s7273_s4] sm:$0xf] }
 0x2e8   : > { %2211 = vmatprep.subr.bf16.mxu1 %v5140_v7  ;;  %3269 = vmatpush1.bf16.msra.mxu0 %v5159_v15  ;;  %v5191_v7 = vld [vmem:[#allocation11 + $0xe4] ss:$8 sps:$4 sm:$0xff]  }
 0x2e9   : > { %3270 = vmatprep.subr.bf16.mxu0 %v5164_v17  ;;  %v1644_v17 = vld [vmem:[#allocation2 + $0x20] sm:$0xff] }
 0x2eb   : > { %2212 = vmatpush1.bf16.msra.mxu1 %v5138_v14  ;;  %v1705_v14 = vld [vmem:[#allocation2 + $0x208] sm:$0xff] }
 0x2ec   : > { %2213 = vmatprep.subr.bf16.mxu1 %v5143_v16  ;;  %3271 = vmatpush1.bf16.msra.mxu0 %v5162_v22 }
 0x2ed   : > { %2071 = vmatmul.mubr.bf16.gmra.mrb[12].mxu0 %v6423_v18  ;;  %2151 = vmatmul.mubr.bf16.gmra.mrb[12].mxu1 %v6425_v19 }
 0x2ee   : > { %2080 = vmatprep.mubr.bf16.mxu0 %v5675_v21  ;;  %2160 = vmatprep.mubr.bf16.mxu1 %v5675_v21 }
 0x2ef   : > { %2214 = vmatpush1.bf16.msra.mxu1 %v5141_v20  ;;  %3272 = vmatprep.subr.bf16.mxu0 %v5167_v24 }
 0x2f0   : > { %2215 = vmatprep.subr.bf16.mxu1 %v5146_v23  ;;  %3273 = vmatpush1.bf16.msra.mxu0 %v5165_v30  ;;  %v1645_v23 = vld [vmem:[#allocation2 + $0x28] sm:$0xff] }
 0x2f1   : > { %3274 = vmatprep.subr.bf16.mxu0 %v5170_v31 }
 0x2f3   : > { %2216 = vmatpush1.bf16.msra.mxu1 %v5144_v29 }
 0x2f4   : > { %3275 = vmatpush1.bf16.msra.mxu0 %v5168_v33 }
 0x2f5   : > { %2081 = vmatmul.mubr.bf16.gmra.mrb[16].mxu0 %v6435_v32  ;;  %2161 = vmatmul.mubr.bf16.gmra.mrb[16].mxu1 %v6437_v3 }
 0x2f6   : > { %2090 = vmatprep.mubr.bf16.mxu0 %v5675_v21  ;;  %2170 = vmatprep.mubr.bf16.mxu1 %v5675_v21 }
 0x2f7   : > { %3276 = vmatprep.subr.bf16.mxu0 %v5173_v34 }
 0x2f8   : > { %3277 = vmatpush1.bf16.msra.mxu0 %v5171_v39 }
 0x2f9   : > { %3278 = vmatprep.subr.bf16.mxu0 %v5176_v42 }
 0x2fc   : > { %3279 = vmatpush1.bf16.msra.mxu0 %v5174_v45 }
 0x2fd   : > { %2091 = vmatmul.mubr.bf16.gmra.mrb[20].mxu0 %v6447_v43  ;;  %2171 = vmatmul.mubr.bf16.gmra.mrb[20].mxu1 %v6449_v44 }
 0x2fe   : > { %2100 = vmatprep.mubr.bf16.mxu0 %v5675_v21  ;;  %2180 = vmatprep.mubr.bf16.mxu1 %v5675_v21 }
 0x2ff   : > { %3280 = vmatprep.subr.bf16.mxu0 %v5179_v46  ;;  %v1648_v46 = vld [vmem:[#allocation2 + $0x40] sm:$0xff] }
 0x300   : > { %3281 = vmatpush1.bf16.msra.mxu0 %v5177_v51 }
 0x301   : > { %3282 = vmatprep.subr.bf16.mxu0 %v5182_v52  ;;  %v1649_v52 = vld [vmem:[#allocation2 + $0x48] sm:$0xff] }
 0x304   : > { %3283 = vmatpush1.bf16.msra.mxu0 %v5180_v57  ;;  %v1713_v57 = vld [vmem:[#allocation2 + $0x248] sm:$0xff] }
 0x305   : > { %2101 = vmatmul.mubr.bf16.gmra.mrb[24].mxu0 %v1806_v55  ;;  %2181 = vmatmul.mubr.bf16.gmra.mrb[24].mxu1 %v6459_v56 }
 0x306   : > { %2110 = vmatprep.mubr.bf16.mxu0 %v5675_v21  ;;  %2190 = vmatprep.mubr.bf16.mxu1 %v5675_v21 }
 0x307   : > { %3284 = vmatprep.subr.bf16.mxu0 %v5185_v58 }
 0x308   : > { %3285 = vmatpush1.bf16.msra.mxu0 %v5183_v63  ;;  %v1716_v63 = vld [vmem:[#allocation2 + $0x260] sm:$0xff] }
 0x309   : > { %3286 = vmatprep.subr.bf16.mxu0 %v5188_v2 }
 0x30c   : > { %3287 = vmatpush1.bf16.msra.mxu0 %v5186_v6  ;;  %v1653_v6 = vld [vmem:[#allocation2 + $0x68] sm:$0xff] }
 0x30d   : > { %2111 = vmatmul.mubr.bf16.gmra.mrb[28].mxu0 %v1807_v0  ;;  %2191 = vmatmul.mubr.bf16.gmra.mrb[28].mxu1 %v1815_v1 }
 0x30e   : > { %2233 = vmatprep.mubr.bf16.mxu1 %v5675_v21  ;;  %3288 = vmatprep.subr.bf16.mxu0 %v5191_v7 }
 0x310   : > { %3289 = vmatpush1.bf16.msra.mxu0 %v5189_v8 }
 0x315   : > { %2234 = vmatmul.mubr.bf16.vlgmr.msra.gmra.mrb[32].mxu1 %v6387_v40  ;;  %v5194_v40 = vld [vmem:[#allocation11 + $0xf4] ss:$8 sps:$4 sm:$0xff]  }
 0x316   : > { %2243 = vmatprep.mubr.bf16.mxu1 %v5675_v21  ;;  %3290 = vmatprep.subr.bf16.mxu0 %v5194_v40  ;;  %v1717_v40 = vld [vmem:[#allocation2 + $0x268] sm:$0xff] }
 0x31d   : > { %2244 = vmatmul.mubr.bf16.gmra.mrb[36].mxu1 %v6399_v53  ;;  %v5192_v53 = vld [vmem:[#allocation11 + $0xf0] ss:$8 sps:$4 sm:$0xff]  }
 0x31e   : > { %2253 = vmatprep.mubr.bf16.mxu1 %v5675_v21  ;;  %3291 = vmatpush1.bf16.msra.mxu0 %v5192_v53 }
 0x325   : > { %2254 = vmatmul.mubr.bf16.gmra.mrb[40].mxu1 %v6411_v4  ;;  %v5197_v4 = vld [vmem:[#allocation11 + $0x104] ss:$8 sps:$4 sm:$0xff]  }
 0x326   : > { %2263 = vmatprep.mubr.bf16.mxu1 %v5675_v21  ;;  %3453 = vmatprep.subr.bf16.mxu0 %v5197_v4 }
 0x32d   : > { %2264 = vmatmul.mubr.bf16.gmra.mrb[44].mxu1 %v6423_v18 }
 0x32e   : > { %2273 = vmatprep.mubr.bf16.mxu1 %v5675_v21 }
 0x335   : > { %2274 = vmatmul.mubr.bf16.gmra.mrb[48].mxu1 %v6435_v32 }
 0x336   : > { %2283 = vmatprep.mubr.bf16.mxu1 %v5675_v21 }
 0x33d   : > { %2284 = vmatmul.mubr.bf16.gmra.mrb[52].mxu1 %v6447_v43 }
 0x33e   : > { %2293 = vmatprep.mubr.bf16.mxu1 %v5675_v21 }
 0x345   : > { %2294 = vmatmul.mubr.bf16.gmra.mrb[56].mxu1 %v1806_v55  ;;  %v1652_v55 = vld [vmem:[#allocation2 + $0x60] sm:$0xff] }
 0x346   : > { %2303 = vmatprep.mubr.bf16.mxu1 %v5675_v21 }
 0x34d   : > { %2304 = vmatmul.mubr.bf16.gmra.mrb[60].mxu1 %v1807_v0 }
 0x34e   : > { %2313 = vmatprep.mubr.bf16.mxu1 %v5675_v21 }
 0x355   : > { %2314 = vmatmul.mubr.bf16.gmra.mrb[64].mxu1 %v6389_v41  ;;  %v2524_v41 = vlaneseq }
 0x356   : > { %2323 = vmatprep.mubr.bf16.mxu1 %v5675_v21 }
 0x35d   : > { %2324 = vmatmul.mubr.bf16.gmra.mrb[68].mxu1 %v6401_v54  ;;  %v6497_v54 = vshrl.u32 %v2524_v41, 7 }
 0x35e   : > { %2333 = vmatprep.mubr.bf16.mxu1 %v5675_v21 }
 0x35f   : > { %v2530_v10 = vsub.s32 1, %v6497_v54 }
 0x361   : > { %v6514_v16 = vrot.slane %v6503_v9, %v2530_v10 }
 0x365   : > { %2334 = vmatmul.mubr.bf16.gmra.mrb[72].mxu1 %v6413_v5  ;;  %v2526_v5 = vsub.s32 0, %v6497_v54 }
 0x366   : > { %2343 = vmatprep.mubr.bf16.mxu1 %v5675_v21 }
 0x367   : > { %v6509_v13 = vrot.slane %v6503_v9, %v2526_v5 }
 0x36d   : > { %2344 = vmatmul.mubr.bf16.gmra.mrb[76].mxu1 %v6425_v19  ;;  %v1708_v19 = vld [vmem:[#allocation2 + $0x220] sm:$0xff] }
 0x36e   : > { %2353 = vmatprep.mubr.bf16.mxu1 %v5675_v21 }
 0x375   : > { %2354 = vmatmul.mubr.bf16.gmra.mrb[80].mxu1 %v6437_v3 }
 0x376   : > { %2363 = vmatprep.mubr.bf16.mxu1 %v5675_v21 }
 0x37d   : > { %2364 = vmatmul.mubr.bf16.gmra.mrb[84].mxu1 %v6449_v44 }
 0x37e   : > { %2373 = vmatprep.mubr.bf16.mxu1 %v5675_v21 }
 0x385   : > { %2374 = vmatmul.mubr.bf16.gmra.mrb[88].mxu1 %v6459_v56 }
 0x386   : > { %2383 = vmatprep.mubr.bf16.mxu1 %v5675_v21  ;;  %v1641_v21 = vld [vmem:[#allocation2 + $0x8] sm:$0xff] }
 0x38d   : > { %2384 = vmatmul.mubr.bf16.gmra.mrb[92].mxu1 %v1815_v1 }
 0x3a8   : > { %v2042_v15 = vpop.f32.mrb[0].mxu0  ;;  %v2122_v18 = vpop.f32.mrb[0].mxu1 }
 0x3a9   : > { %v2394_v20 = vadd.f32 %v2042_v15, %v1640_v11  ;;  %v2044_v22 = vpop.f32.mrb[1].mxu0  ;;  %v2458_v24 = vadd.f32 %v2122_v18, %v1704_v12  ;;  %v2124_v25 = vpop.f32.mrb[1].mxu1  ;;  %v5195_v12 = vld [vmem:[#allocation11 + $0x100] ss:$8 sps:$4 sm:$0xff]  }
 0x3aa   : > { %v2395_v27 = vadd.f32 %v2044_v22, %v1641_v21  ;;  %v2046_v28 = vpop.f32.mrb[2].mxu0  ;;  %v2459_v29 = vadd.f32 %v2124_v25, %v1705_v14  ;;  %v2126_v30 = vpop.f32.mrb[2].mxu1 }
 0x3ab   : > { %v2544_v31 = vadd.f32 %v6509_v13, %v2394_v20  ;;  %v2398_v32 = vadd.f32 %v2046_v28, %v1644_v17  ;;  %v2048_v3 = vpop.f32.mrb[3].mxu0  ;;  %v2608_v33 = vadd.f32 %v6509_v13, %v2458_v24  ;;  %v2462_v34 = vadd.f32 %v2126_v30, %v1708_v19  ;;  %v2128_v35 = vpop.f32.mrb[3].mxu1  ;;  %v5200_v20 = vld [vmem:[#allocation11 + $0x114] ss:$8 sps:$4 sm:$0xff]   ;;  %v1656_v30 = vld [vmem:[#allocation2 + $0x80] sm:$0xff] }
 0x3ac   : > { %v2545_v36 = vadd.f32 %v6514_v16, %v2395_v27  ;;  %v2399_v37 = vadd.f32 %v2048_v3, %v1645_v23  ;;  %v2609_v38 = vadd.f32 %v6514_v16, %v2459_v29  ;;  %v2463_v39 = vadd.f32 %v2128_v35, %v1709_v26  ;;  %v5198_v35 = vld [vmem:[#allocation11 + $0x110] ss:$8 sps:$4 sm:$0xff]  }
 0x3ad   : > { %v2548_v42 = vadd.f32 %v6509_v13, %v2398_v32  ;;  %v2736_v43 = vmax.f32 %v2608_v33, 0.0  ;;  %v2612_v44 = vadd.f32 %v6509_v13, %v2462_v34  ;;  %v2672_v50 = vmax.f32 %v2544_v31, 0.0  ;;  %v1657_v31 = vld [vmem:[#allocation2 + $0x88] sm:$0xff]  ;;  %v1660_v34 = vld [vmem:[#allocation2 + $0xa0] sm:$0xff] }
 0x3ae   : > { %v2549_v45 = vadd.f32 %v6514_v16, %v2399_v37  ;;  %v2737_v47 = vmax.f32 %v2609_v38, 0.0  ;;  %v2613_v48 = vadd.f32 %v6514_v16, %v2463_v39  ;;  %v2673_v58 = vmax.f32 %v2545_v36, 0.0  ;;  %v1720_v38 = vld [vmem:[#allocation2 + $0x280] sm:$0xff] }
 0x3af   : > { %v2676_v51 = vmax.f32 %v2548_v42, 0.0  ;;  %v2740_v56 = vmax.f32 %v2612_v44, 0.0 }
 0x3b0   : > { %v2677_v59 = vmax.f32 %v2549_v45, 0.0  ;;  %v2052_v60 = vpop.f32.mrb[4].mxu0  ;;  %v2741_v61 = vmax.f32 %v2613_v48, 0.0  ;;  %v2132_v62 = vpop.f32.mrb[4].mxu1  ;;  %v1721_v45 = vld [vmem:[#allocation2 + $0x288] sm:$0xff] }
 0x3b1   : > { %v2800_v0 = vpack.c.bf16 %v2676_v51, %v2672_v50  ;;  %v2402_v1 = vadd.f32 %v2052_v60, %v1648_v46  ;;  %v2054_v2 = vpop.f32.mrb[5].mxu0  ;;  %v2466_v7 = vadd.f32 %v2132_v62, %v1712_v49  ;;  %v2134_v8 = vpop.f32.mrb[5].mxu1  ;;  %v6524_v53 = vpack.c.bf16 %v2740_v56, %v2736_v43  ;;  %v5203_v43 = vld [vmem:[#allocation11 + $0x124] ss:$8 sps:$4 sm:$0xff]  }
 0x3b2   : > { %v2403_v4 = vadd.f32 %v2054_v2, %v1649_v52  ;;  %v2056_v41 = vpop.f32.mrb[6].mxu0  ;;  %v2801_v11 = vpack.c.bf16 %v2677_v59, %v2673_v58  ;;  %v2467_v21 = vadd.f32 %v2134_v8, %v1713_v57  ;;  %v2136_v14 = vpop.f32.mrb[6].mxu1  ;;  %v6526_v15 = vpack.c.bf16 %v2741_v61, %v2737_v47  ;;  %v1724_v51 = vld [vmem:[#allocation2 + $0x2a0] sm:$0xff]  ;;  %v1661_v56 = vld [vmem:[#allocation2 + $0xa8] sm:$0xff] }
 0x3b3   : > { %v2552_v17 = vadd.f32 %v6509_v13, %v2402_v1  ;;  %v2406_v18 = vadd.f32 %v2056_v41, %v1652_v55  ;;  %v2058_v19 = vpop.f32.mrb[7].mxu0  ;;  %v2616_v22 = vadd.f32 %v6509_v13, %v2466_v7  ;;  %v2470_v23 = vadd.f32 %v2136_v14, %v1716_v63  ;;  %v2138_v24 = vpop.f32.mrb[7].mxu1  ;;  %v1725_v60 = vld [vmem:[#allocation2 + $0x2a8] sm:$0xff]  ;;  %v5206_v41 = vld [vmem:[#allocation11 + $0x134] ss:$8 sps:$4 sm:$0xff]  }
 0x3b4   : > { %v2553_v25 = vadd.f32 %v6514_v16, %v2403_v4  ;;  %v2407_v26 = vadd.f32 %v2058_v19, %v1653_v6  ;;  %3292 = vmatprep.mubr.bf16.mxu0 %v2801_v11  ;;  %v2617_v27 = vadd.f32 %v6514_v16, %v2467_v21  ;;  %v2471_v28 = vadd.f32 %v2138_v24, %v1717_v40  ;;  %v5201_v1 = vld [vmem:[#allocation11 + $0x120] ss:$8 sps:$4 sm:$0xff]  }
 0x3b5   : > { %v2556_v29 = vadd.f32 %v6509_v13, %v2406_v18  ;;  %3293 = vmatmul.mubr.bf16.vlgmr.msra.gmra.mrb[32].mxu0 %v2800_v0  ;;  %v2744_v32 = vmax.f32 %v2616_v22, 0.0  ;;  %v2620_v3 = vadd.f32 %v6509_v13, %v2470_v23  ;;  %v2680_v39 = vmax.f32 %v2552_v17, 0.0  ;;  %v1664_v22 = vld [vmem:[#allocation2 + $0xc0] sm:$0xff]  ;;  %v1665_v23 = vld [vmem:[#allocation2 + $0xc8] sm:$0xff] }
 0x3b6   : > { %v2557_v33 = vadd.f32 %v6514_v16, %v2407_v26  ;;  %3454 = vmatpush1.bf16.msra.mxu0 %v5195_v12  ;;  %v2745_v36 = vmax.f32 %v2617_v27, 0.0  ;;  %v2621_v37 = vadd.f32 %v6514_v16, %v2471_v28  ;;  %v2681_v46 = vmax.f32 %v2553_v25, 0.0  ;;  %v1668_v27 = vld [vmem:[#allocation2 + $0xe0] sm:$0xff]  ;;  %v5204_v28 = vld [vmem:[#allocation11 + $0x130] ss:$8 sps:$4 sm:$0xff]  }
 0x3b7   : > { %v2684_v42 = vmax.f32 %v2556_v29, 0.0  ;;  %3455 = vmatprep.subr.bf16.mxu0 %v5200_v20  ;;  %v2748_v44 = vmax.f32 %v2620_v3, 0.0 }
 0x3b8   : > { %v2685_v47 = vmax.f32 %v2557_v33, 0.0  ;;  %v2062_v48 = vpop.f32.mrb[8].mxu0  ;;  %v2749_v49 = vmax.f32 %v2621_v37, 0.0  ;;  %v2142_v50 = vpop.f32.mrb[8].mxu1  ;;  %v5209_v33 = vld [vmem:[#allocation11 + $0x144] ss:$8 sps:$4 sm:$0xff]  }
 0x3b9   : > { %v2410_v52 = vadd.f32 %v2062_v48, %v1656_v30  ;;  %v2064_v55 = vpop.f32.mrb[9].mxu0  ;;  %v2804_v57 = vpack.c.bf16 %v2684_v42, %v2680_v39  ;;  %v2474_v58 = vadd.f32 %v2142_v50, %v1720_v38  ;;  %v2144_v59 = vpop.f32.mrb[9].mxu1  ;;  %v6536_v61 = vpack.c.bf16 %v2748_v44, %v2744_v32  ;;  %v1733_v50 = vld [vmem:[#allocation2 + $0x2e8] sm:$0xff] }
 0x3ba   : > { %v2411_v62 = vadd.f32 %v2064_v55, %v1657_v31  ;;  %v2066_v63 = vpop.f32.mrb[10].mxu0  ;;  %v2805_v0 = vpack.c.bf16 %v2685_v47, %v2681_v46  ;;  %3456 = vmatpush1.bf16.msra.mxu0 %v5198_v35  ;;  %v2475_v2 = vadd.f32 %v2144_v59, %v1721_v45  ;;  %v2146_v6 = vpop.f32.mrb[10].mxu1  ;;  %v6538_v7 = vpack.c.bf16 %v2749_v49, %v2745_v36  ;;  %v1728_v31 = vld [vmem:[#allocation2 + $0x2c0] sm:$0xff]  ;;  %v1729_v35 = vld [vmem:[#allocation2 + $0x2c8] sm:$0xff] }
 0x3bb   : > { %v2560_v8 = vadd.f32 %v6509_v13, %v2410_v52  ;;  %v2414_v40 = vadd.f32 %v2066_v63, %v1660_v34  ;;  %v2068_v4 = vpop.f32.mrb[11].mxu0  ;;  %3457 = vmatprep.subr.bf16.mxu0 %v5203_v43  ;;  %v2624_v11 = vadd.f32 %v6509_v13, %v2474_v58  ;;  %v2478_v12 = vadd.f32 %v2146_v6, %v1724_v51  ;;  %v2148_v21 = vpop.f32.mrb[11].mxu1  ;;  %v1732_v43 = vld [vmem:[#allocation2 + $0x2e0] sm:$0xff]  ;;  %v1669_v46 = vld [vmem:[#allocation2 + $0xe8] sm:$0xff] }
 0x3bc   : > { %v2561_v14 = vadd.f32 %v6514_v16, %v2411_v62  ;;  %v2415_v17 = vadd.f32 %v2068_v4, %v1661_v56  ;;  %3302 = vmatprep.mubr.bf16.mxu0 %v2805_v0  ;;  %v2625_v18 = vadd.f32 %v6514_v16, %v2475_v2  ;;  %v2479_v19 = vadd.f32 %v2148_v21, %v1725_v60  ;;  %v1672_v21 = vld [vmem:[#allocation2 + $0x100] sm:$0xff] }
 0x3bd   : > { %v2564_v20 = vadd.f32 %v6509_v13, %v2414_v40  ;;  %3303 = vmatmul.mubr.bf16.gmra.mrb[36].mxu0 %v2804_v57  ;;  %v2752_v24 = vmax.f32 %v2624_v11, 0.0  ;;  %v2628_v25 = vadd.f32 %v6509_v13, %v2478_v12  ;;  %v2688_v32 = vmax.f32 %v2560_v8, 0.0  ;;  %v5207_v57 = vld [vmem:[#allocation11 + $0x140] ss:$8 sps:$4 sm:$0xff]  }
 0x3be   : > { %v2565_v26 = vadd.f32 %v6514_v16, %v2415_v17  ;;  %3458 = vmatpush1.bf16.msra.mxu0 %v5201_v1  ;;  %v2753_v29 = vmax.f32 %v2625_v18, 0.0  ;;  %v2629_v30 = vadd.f32 %v6514_v16, %v2479_v19  ;;  %v2689_v36 = vmax.f32 %v2561_v14, 0.0  ;;  %v5212_v1 = vld [vmem:[#allocation11 + $0x154] ss:$8 sps:$4 sm:$0xff]   ;;  %v1673_v14 = vld [vmem:[#allocation2 + $0x108] sm:$0xff] }
 0x3bf   : > { %v2692_v3 = vmax.f32 %v2564_v20, 0.0  ;;  %3459 = vmatprep.subr.bf16.mxu0 %v5206_v41  ;;  %v2756_v34 = vmax.f32 %v2628_v25, 0.0  ;;  %v1676_v20 = vld [vmem:[#allocation2 + $0x120] sm:$0xff] }
 0x3c0   : > { %v2693_v37 = vmax.f32 %v2565_v26, 0.0  ;;  %v2072_v38 = vpop.f32.mrb[12].mxu0  ;;  %v2757_v39 = vmax.f32 %v2629_v30, 0.0  ;;  %v2152_v42 = vpop.f32.mrb[12].mxu1  ;;  %v1736_v25 = vld [vmem:[#allocation2 + $0x300] sm:$0xff]  ;;  %v1737_v30 = vld [vmem:[#allocation2 + $0x308] sm:$0xff] }
 0x3c1   : > { %v2418_v44 = vadd.f32 %v2072_v38, %v1664_v22  ;;  %v2074_v45 = vpop.f32.mrb[13].mxu0  ;;  %v2808_v47 = vpack.c.bf16 %v2692_v3, %v2688_v32  ;;  %v2482_v48 = vadd.f32 %v2152_v42, %v1728_v31  ;;  %v2154_v49 = vpop.f32.mrb[13].mxu1  ;;  %v6548_v51 = vpack.c.bf16 %v2756_v34, %v2752_v24  ;;  %v5210_v22 = vld [vmem:[#allocation11 + $0x150] ss:$8 sps:$4 sm:$0xff]   ;;  %v1677_v38 = vld [vmem:[#allocation2 + $0x128] sm:$0xff] }
 0x3c2   : > { %v2419_v52 = vadd.f32 %v2074_v45, %v1665_v23  ;;  %v2076_v55 = vpop.f32.mrb[14].mxu0  ;;  %v2809_v56 = vpack.c.bf16 %v2693_v37, %v2689_v36  ;;  %3460 = vmatpush1.bf16.msra.mxu0 %v5204_v28  ;;  %v2483_v58 = vadd.f32 %v2154_v49, %v1729_v35  ;;  %v2156_v59 = vpop.f32.mrb[14].mxu1  ;;  %v6550_v60 = vpack.c.bf16 %v2757_v39, %v2753_v29  ;;  %v5215_v28 = vld [vmem:[#allocation11 + $0x164] ss:$8 sps:$4 sm:$0xff]   ;;  %v5213_v49 = vld [vmem:[#allocation11 + $0x160] ss:$8 sps:$4 sm:$0xff]  }
 0x3c3   : > { %v2568_v62 = vadd.f32 %v6509_v13, %v2418_v44  ;;  %v2422_v63 = vadd.f32 %v2076_v55, %v1668_v27  ;;  %v2078_v0 = vpop.f32.mrb[15].mxu0  ;;  %3461 = vmatprep.subr.bf16.mxu0 %v5209_v33  ;;  %v2632_v2 = vadd.f32 %v6509_v13, %v2482_v48  ;;  %v2486_v6 = vadd.f32 %v2156_v59, %v1732_v43  ;;  %v2158_v8 = vpop.f32.mrb[15].mxu1  ;;  %v1740_v35 = vld [vmem:[#allocation2 + $0x320] sm:$0xff]  ;;  %v1741_v44 = vld [vmem:[#allocation2 + $0x328] sm:$0xff]  ;;  %v5218_v59 = vld [vmem:[#allocation11 + $0x174] ss:$8 sps:$4 sm:$0xff]  }
 0x3c4   : > { %v2569_v40 = vadd.f32 %v6514_v16, %v2419_v52  ;;  %v2423_v4 = vadd.f32 %v2078_v0, %v1669_v46  ;;  %3312 = vmatprep.mubr.bf16.mxu0 %v2809_v56  ;;  %v2633_v41 = vadd.f32 %v6514_v16, %v2483_v58  ;;  %v2487_v11 = vadd.f32 %v2158_v8, %v1733_v50 }
 0x3c5   : > { %v2572_v12 = vadd.f32 %v6509_v13, %v2422_v63  ;;  %3313 = vmatmul.mubr.bf16.gmra.mrb[40].mxu0 %v2808_v47  ;;  %v2760_v17 = vmax.f32 %v2632_v2, 0.0  ;;  %v2636_v18 = vadd.f32 %v6509_v13, %v2486_v6  ;;  %v2696_v26 = vmax.f32 %v2568_v62, 0.0 }
 0x3c6   : > { %v2573_v19 = vadd.f32 %v6514_v16, %v2423_v4  ;;  %3462 = vmatpush1.bf16.msra.mxu0 %v5207_v57  ;;  %v2761_v23 = vmax.f32 %v2633_v41, 0.0  ;;  %v2637_v24 = vadd.f32 %v6514_v16, %v2487_v11  ;;  %v2697_v31 = vmax.f32 %v2569_v40, 0.0  ;;  %v1680_v4 = vld [vmem:[#allocation2 + $0x140] sm:$0xff]  ;;  %v1681_v41 = vld [vmem:[#allocation2 + $0x148] sm:$0xff] }
 0x3c7   : > { %v2700_v27 = vmax.f32 %v2572_v12, 0.0  ;;  %3463 = vmatprep.subr.bf16.mxu0 %v5212_v1  ;;  %v2764_v29 = vmax.f32 %v2636_v18, 0.0 }
 0x3c8   : > { %v2701_v32 = vmax.f32 %v2573_v19, 0.0  ;;  %v2082_v3 = vpop.f32.mrb[16].mxu0  ;;  %v2765_v33 = vmax.f32 %v2637_v24, 0.0  ;;  %v2162_v34 = vpop.f32.mrb[16].mxu1  ;;  %v5221_v24 = vld [vmem:[#allocation11 + $0x184] ss:$8 sps:$4 sm:$0xff]  }
 0x3c9   : > { %v2426_v36 = vadd.f32 %v2082_v3, %v1672_v21  ;;  %v2084_v37 = vpop.f32.mrb[17].mxu0  ;;  %v2812_v39 = vpack.c.bf16 %v2700_v27, %v2696_v26  ;;  %v2490_v42 = vadd.f32 %v2162_v34, %v1736_v25  ;;  %v2164_v43 = vpop.f32.mrb[17].mxu1  ;;  %v6560_v45 = vpack.c.bf16 %v2764_v29, %v2760_v17  ;;  %v5216_v17 = vld [vmem:[#allocation11 + $0x170] ss:$8 sps:$4 sm:$0xff]   ;;  %v1745_v26 = vld [vmem:[#allocation2 + $0x348] sm:$0xff] }
 0x3ca   : > { %v2427_v46 = vadd.f32 %v2084_v37, %v1673_v14  ;;  %v2086_v47 = vpop.f32.mrb[18].mxu0  ;;  %v2813_v48 = vpack.c.bf16 %v2701_v32, %v2697_v31  ;;  %3464 = vmatpush1.bf16.msra.mxu0 %v5210_v22  ;;  %v2491_v50 = vadd.f32 %v2164_v43, %v1737_v30  ;;  %v2166_v52 = vpop.f32.mrb[18].mxu1  ;;  %v6562_v55 = vpack.c.bf16 %v2765_v33, %v2761_v23  ;;  %v1684_v14 = vld [vmem:[#allocation2 + $0x160] sm:$0xff]  ;;  %v1685_v34 = vld [vmem:[#allocation2 + $0x168] sm:$0xff] }
 0x3cb   : > { %v2576_v56 = vadd.f32 %v6509_v13, %v2426_v36  ;;  %v2430_v57 = vadd.f32 %v2086_v47, %v1676_v20  ;;  %v2088_v58 = vpop.f32.mrb[19].mxu0  ;;  %3465 = vmatprep.subr.bf16.mxu0 %v5215_v28  ;;  %v2640_v62 = vadd.f32 %v6509_v13, %v2490_v42  ;;  %v2494_v63 = vadd.f32 %v2166_v52, %v1740_v35  ;;  %v2168_v0 = vpop.f32.mrb[19].mxu1  ;;  %v1744_v20 = vld [vmem:[#allocation2 + $0x340] sm:$0xff] }
 0x3cc   : > { %v2577_v1 = vadd.f32 %v6514_v16, %v2427_v46  ;;  %v2431_v2 = vadd.f32 %v2088_v58, %v1677_v38  ;;  %3322 = vmatprep.mubr.bf16.mxu0 %v2813_v48  ;;  %v2641_v6 = vadd.f32 %v6514_v16, %v2491_v50  ;;  %v2495_v8 = vadd.f32 %v2168_v0, %v1741_v44  ;;  %v1748_v32 = vld [vmem:[#allocation2 + $0x360] sm:$0xff]  ;;  %v1749_v38 = vld [vmem:[#allocation2 + $0x368] sm:$0xff] }
 0x3cd   : > { %v2580_v40 = vadd.f32 %v6509_v13, %v2430_v57  ;;  %3323 = vmatmul.mubr.bf16.gmra.mrb[44].mxu0 %v2812_v39  ;;  %v2768_v11 = vmax.f32 %v2640_v62, 0.0  ;;  %v2644_v12 = vadd.f32 %v6509_v13, %v2494_v63  ;;  %v2704_v22 = vmax.f32 %v2576_v56, 0.0  ;;  %v5219_v46 = vld [vmem:[#allocation11 + $0x180] ss:$8 sps:$4 sm:$0xff]   ;;  %v5224_v57 = vld [vmem:[#allocation11 + $0x194] ss:$8 sps:$4 sm:$0xff]  }
 0x3ce   : > { %v2581_v21 = vadd.f32 %v6514_v16, %v2431_v2  ;;  %3466 = vmatpush1.bf16.msra.mxu0 %v5213_v49  ;;  %v2769_v18 = vmax.f32 %v2641_v6, 0.0  ;;  %v2645_v19 = vadd.f32 %v6514_v16, %v2495_v8  ;;  %v2705_v27 = vmax.f32 %v2577_v1, 0.0  ;;  %v1688_v8 = vld [vmem:[#allocation2 + $0x180] sm:$0xff] }
 0x3cf   : > { %v2708_v23 = vmax.f32 %v2580_v40, 0.0  ;;  %3467 = vmatprep.subr.bf16.mxu0 %v5218_v59  ;;  %v2772_v25 = vmax.f32 %v2644_v12, 0.0  ;;  %v1689_v40 = vld [vmem:[#allocation2 + $0x188] sm:$0xff]  ;;  %v1692_v12 = vld [vmem:[#allocation2 + $0x1a0] sm:$0xff] }
 0x3d0   : > { %v2709_v28 = vmax.f32 %v2581_v21, 0.0  ;;  %v2092_v29 = vpop.f32.mrb[20].mxu0  ;;  %v2773_v30 = vmax.f32 %v2645_v19, 0.0  ;;  %v2172_v31 = vpop.f32.mrb[20].mxu1  ;;  %v5222_v21 = vld [vmem:[#allocation11 + $0x190] ss:$8 sps:$4 sm:$0xff]  }
 0x3d1   : > { %v2434_v3 = vadd.f32 %v2092_v29, %v1680_v4  ;;  %v2094_v33 = vpop.f32.mrb[21].mxu0  ;;  %v2816_v35 = vpack.c.bf16 %v2708_v23, %v2704_v22  ;;  %v2498_v36 = vadd.f32 %v2172_v31, %v1744_v20  ;;  %v2174_v37 = vpop.f32.mrb[21].mxu1  ;;  %v6572_v39 = vpack.c.bf16 %v2772_v25, %v2768_v11  ;;  %v5227_v22 = vld [vmem:[#allocation11 + $0x1a4] ss:$8 sps:$4 sm:$0xff]  }
 0x3d2   : > { %v2435_v42 = vadd.f32 %v2094_v33, %v1681_v41  ;;  %v2096_v43 = vpop.f32.mrb[22].mxu0  ;;  %v2817_v44 = vpack.c.bf16 %v2709_v28, %v2705_v27  ;;  %3468 = vmatpush1.bf16.msra.mxu0 %v5216_v17  ;;  %v2499_v47 = vadd.f32 %v2174_v37, %v1745_v26  ;;  %v2176_v48 = vpop.f32.mrb[22].mxu1  ;;  %v6574_v49 = vpack.c.bf16 %v2773_v30, %v2769_v18  ;;  %v1752_v18 = vld [vmem:[#allocation2 + $0x380] sm:$0xff] }
 0x3d3   : > { %v2584_v50 = vadd.f32 %v6509_v13, %v2434_v3  ;;  %v2438_v52 = vadd.f32 %v2096_v43, %v1684_v14  ;;  %v2098_v56 = vpop.f32.mrb[23].mxu0  ;;  %3469 = vmatprep.subr.bf16.mxu0 %v5221_v24  ;;  %v2648_v58 = vadd.f32 %v6509_v13, %v2498_v36  ;;  %v2502_v59 = vadd.f32 %v2176_v48, %v1748_v32  ;;  %v2178_v62 = vpop.f32.mrb[23].mxu1  ;;  %v1753_v24 = vld [vmem:[#allocation2 + $0x388] sm:$0xff]  ;;  %v1756_v30 = vld [vmem:[#allocation2 + $0x3a0] sm:$0xff] }
 0x3d4   : > { %v2585_v63 = vadd.f32 %v6514_v16, %v2435_v42  ;;  %v2439_v0 = vadd.f32 %v2098_v56, %v1685_v34  ;;  %3332 = vmatprep.mubr.bf16.mxu0 %v2817_v44  ;;  %v2649_v1 = vadd.f32 %v6514_v16, %v2499_v47  ;;  %v2503_v2 = vadd.f32 %v2178_v62, %v1749_v38  ;;  %v1693_v3 = vld [vmem:[#allocation2 + $0x1a8] sm:$0xff] }
 0x3d5   : > { %v2588_v6 = vadd.f32 %v6509_v13, %v2438_v52  ;;  %3333 = vmatmul.mubr.bf16.gmra.mrb[48].mxu0 %v2816_v35  ;;  %v2776_v4 = vmax.f32 %v2648_v58, 0.0  ;;  %v2652_v41 = vadd.f32 %v6509_v13, %v2502_v59  ;;  %v2712_v19 = vmax.f32 %v2584_v50, 0.0  ;;  %v1757_v36 = vld [vmem:[#allocation2 + $0x3a8] sm:$0xff] }
 0x3d6   : > { %v2589_v11 = vadd.f32 %v6514_v16, %v2439_v0  ;;  %3470 = vmatpush1.bf16.msra.mxu0 %v5219_v46  ;;  %v2777_v14 = vmax.f32 %v2649_v1, 0.0  ;;  %v2653_v17 = vadd.f32 %v6514_v16, %v2503_v2  ;;  %v2713_v25 = vmax.f32 %v2585_v63, 0.0  ;;  %v5225_v44 = vld [vmem:[#allocation11 + $0x1a0] ss:$8 sps:$4 sm:$0xff]  }
 0x3d7   : > { %v2716_v20 = vmax.f32 %v2588_v6, 0.0  ;;  %3471 = vmatprep.subr.bf16.mxu0 %v5224_v57  ;;  %v2780_v23 = vmax.f32 %v2652_v41, 0.0  ;;  %v5230_v57 = vld [vmem:[#allocation11 + $0x1b4] ss:$8 sps:$4 sm:$0xff]  }
 0x3d8   : > { %v2717_v26 = vmax.f32 %v2589_v11, 0.0  ;;  %v2102_v27 = vpop.f32.mrb[24].mxu0  ;;  %v2781_v28 = vmax.f32 %v2653_v17, 0.0  ;;  %v2182_v29 = vpop.f32.mrb[24].mxu1 }
 0x3d9   : > { %v2442_v31 = vadd.f32 %v2102_v27, %v1688_v8  ;;  %v2104_v32 = vpop.f32.mrb[25].mxu0  ;;  %v2820_v33 = vpack.c.bf16 %v2716_v20, %v2712_v19  ;;  %v2506_v34 = vadd.f32 %v2182_v29, %v1752_v18  ;;  %v2184_v35 = vpop.f32.mrb[25].mxu1  ;;  %v6584_v37 = vpack.c.bf16 %v2780_v23, %v2776_v4  ;;  %v1696_v8 = vld [vmem:[#allocation2 + $0x1c0] sm:$0xff] }
 0x3da   : > { %v2443_v38 = vadd.f32 %v2104_v32, %v1689_v40  ;;  %v2106_v42 = vpop.f32.mrb[26].mxu0  ;;  %v2821_v43 = vpack.c.bf16 %v2717_v26, %v2713_v25  ;;  %3472 = vmatpush1.bf16.msra.mxu0 %v5222_v21  ;;  %v2507_v46 = vadd.f32 %v2184_v35, %v1753_v24  ;;  %v2186_v47 = vpop.f32.mrb[26].mxu1  ;;  %v6586_v48 = vpack.c.bf16 %v2781_v28, %v2777_v14  ;;  %v1697_v40 = vld [vmem:[#allocation2 + $0x1c8] sm:$0xff]  ;;  %v5228_v21 = vld [vmem:[#allocation11 + $0x1b0] ss:$8 sps:$4 sm:$0xff]   ;;  %v1760_v19 = vld [vmem:[#allocation2 + $0x3c0] sm:$0xff] }
 0x3db   : > { %v2592_v50 = vadd.f32 %v6509_v13, %v2442_v31  ;;  %v2446_v52 = vadd.f32 %v2106_v42, %v1692_v12  ;;  %v2108_v56 = vpop.f32.mrb[27].mxu0  ;;  %3473 = vmatprep.subr.bf16.mxu0 %v5227_v22  ;;  %v2656_v58 = vadd.f32 %v6509_v13, %v2506_v34  ;;  %v2510_v59 = vadd.f32 %v2186_v47, %v1756_v30  ;;  %v2188_v62 = vpop.f32.mrb[27].mxu1  ;;  %v1700_v12 = vld [vmem:[#allocation2 + $0x1e0] sm:$0xff]  ;;  %v1761_v24 = vld [vmem:[#allocation2 + $0x3c8] sm:$0xff] }
 0x3dc   : > { %v2593_v63 = vadd.f32 %v6514_v16, %v2443_v38  ;;  %v2447_v0 = vadd.f32 %v2108_v56, %v1693_v3  ;;  %3342 = vmatprep.mubr.bf16.mxu0 %v2821_v43  ;;  %v2657_v1 = vadd.f32 %v6514_v16, %v2507_v46  ;;  %v2511_v2 = vadd.f32 %v2188_v62, %v1757_v36  ;;  %v5233_v14 = vld [vmem:[#allocation11 + $0x1c4] ss:$8 sps:$4 sm:$0xff]  }
 0x3dd   : > { %v2596_v6 = vadd.f32 %v6509_v13, %v2446_v52  ;;  %3343 = vmatmul.mubr.bf16.gmra.mrb[52].mxu0 %v2820_v33  ;;  %v2784_v4 = vmax.f32 %v2656_v58, 0.0  ;;  %v2660_v41 = vadd.f32 %v6509_v13, %v2510_v59  ;;  %v2720_v20 = vmax.f32 %v2592_v50, 0.0  ;;  %v1764_v25 = vld [vmem:[#allocation2 + $0x3e0] sm:$0xff]  ;;  %v1701_v34 = vld [vmem:[#allocation2 + $0x1e8] sm:$0xff] }
 0x3de   : > { %v2597_v11 = vadd.f32 %v6514_v16, %v2447_v0  ;;  %3474 = vmatpush1.bf16.msra.mxu0 %v5225_v44  ;;  %v2785_v17 = vmax.f32 %v2657_v1, 0.0  ;;  %v2661_v18 = vadd.f32 %v6514_v16, %v2511_v2  ;;  %v2534_v26 = vsub.s32 2, %v6497_v54  ;;  %v1765_v42 = vld [vmem:[#allocation2 + $0x3e8] sm:$0xff] }
 0x3df   : > { %v2724_v22 = vmax.f32 %v2596_v6, 0.0  ;;  %3475 = vmatprep.subr.bf16.mxu0 %v5230_v57  ;;  %v2788_v23 = vmax.f32 %v2660_v41, 0.0  ;;  %v2721_v27 = vmax.f32 %v2593_v63, 0.0  ;;  %v2538_v32 = vsub.s32 3, %v6497_v54  ;;  %v5231_v50 = vld [vmem:[#allocation11 + $0x1c0] ss:$8 sps:$4 sm:$0xff]  }
 0x3e0   : > { %v2725_v28 = vmax.f32 %v2597_v11, 0.0  ;;  %v2112_v29 = vpop.f32.mrb[28].mxu0  ;;  %v2789_v30 = vmax.f32 %v2661_v18, 0.0  ;;  %v2192_v31 = vpop.f32.mrb[28].mxu1  ;;  %v5236_v63 = vld [vmem:[#allocation11 + $0x1d4] ss:$8 sps:$4 sm:$0xff]  }
 0x3e1   : > { %v2450_v3 = vadd.f32 %v2112_v29, %v1696_v8  ;;  %v2114_v33 = vpop.f32.mrb[29].mxu0  ;;  %v2824_v35 = vpack.c.bf16 %v2724_v22, %v2720_v20  ;;  %v2514_v36 = vadd.f32 %v2192_v31, %v1760_v19  ;;  %v2194_v38 = vpop.f32.mrb[29].mxu1  ;;  %v6598_v43 = vpack.c.bf16 %v2788_v23, %v2784_v4  ;;  %v1642_v19 = vld [vmem:[#allocation2 + $0x10] sm:$0xff] }
 0x3e2   : > { %v2451_v44 = vadd.f32 %v2114_v33, %v1697_v40  ;;  %v2116_v46 = vpop.f32.mrb[30].mxu0  ;;  %v2825_v47 = vpack.c.bf16 %v2725_v28, %v2721_v27  ;;  %3476 = vmatpush1.bf16.msra.mxu0 %v5228_v21  ;;  %v2515_v52 = vadd.f32 %v2194_v38, %v1761_v24  ;;  %v2196_v56 = vpop.f32.mrb[30].mxu1  ;;  %v6600_v57 = vpack.c.bf16 %v2789_v30, %v2785_v17  ;;  %v5239_v24 = vld [vmem:[#allocation11 + $0x1e4] ss:$8 sps:$4 sm:$0xff]   ;;  %v1643_v27 = vld [vmem:[#allocation2 + $0x18] sm:$0xff] }
 0x3e3   : > { %v2600_v58 = vadd.f32 %v6509_v13, %v2450_v3  ;;  %v2454_v59 = vadd.f32 %v2116_v46, %v1700_v12  ;;  %v2118_v62 = vpop.f32.mrb[31].mxu0  ;;  %3477 = vmatprep.subr.bf16.mxu0 %v5233_v14  ;;  %v2664_v0 = vadd.f32 %v6509_v13, %v2514_v36  ;;  %v2518_v1 = vadd.f32 %v2196_v56, %v1764_v25  ;;  %v2198_v2 = vpop.f32.mrb[31].mxu1  ;;  %v5234_v14 = vld [vmem:[#allocation11 + $0x1d0] ss:$8 sps:$4 sm:$0xff]  }
 0x3e4   : > { %v2601_v6 = vadd.f32 %v6514_v16, %v2451_v44  ;;  %v2455_v8 = vadd.f32 %v2118_v62, %v1701_v34  ;;  %3352 = vmatprep.mubr.bf16.mxu0 %v2825_v47  ;;  %v2665_v40 = vadd.f32 %v6514_v16, %v2515_v52  ;;  %v2519_v4 = vadd.f32 %v2198_v2, %v1765_v42  ;;  %v1646_v3 = vld [vmem:[#allocation2 + $0x30] sm:$0xff]  ;;  %v5237_v42 = vld [vmem:[#allocation11 + $0x1e0] ss:$8 sps:$4 sm:$0xff]  }
 0x3e5   : > { %v2604_v41 = vadd.f32 %v6509_v13, %v2454_v59  ;;  %3353 = vmatmul.mubr.bf16.gmra.mrb[56].mxu0 %v2824_v35  ;;  %v2792_v11 = vmax.f32 %v2664_v0, 0.0  ;;  %v2668_v12 = vadd.f32 %v6509_v13, %v2518_v1  ;;  %v2728_v20 = vmax.f32 %v2600_v58, 0.0  ;;  %v1647_v35 = vld [vmem:[#allocation2 + $0x38] sm:$0xff]  ;;  %v1650_v1 = vld [vmem:[#allocation2 + $0x50] sm:$0xff] }
 0x3e6   : > { %v2605_v21 = vadd.f32 %v6514_v16, %v2455_v8  ;;  %3478 = vmatpush1.bf16.msra.mxu0 %v5231_v50  ;;  %v2793_v17 = vmax.f32 %v2665_v40, 0.0  ;;  %v2669_v18 = vadd.f32 %v6514_v16, %v2519_v4  ;;  %v6611_v25 = vrot.slane %v6503_v9, %v2534_v26  ;;  %v5240_v0 = vld [vmem:[#allocation11 + $0x1f0] ss:$8 sps:$4 sm:$0xff]  }
 0x3e7   : > { %v2732_v22 = vmax.f32 %v2604_v41, 0.0  ;;  %3479 = vmatprep.subr.bf16.mxu0 %v5236_v63  ;;  %v2796_v23 = vmax.f32 %v2668_v12, 0.0  ;;  %v2729_v28 = vmax.f32 %v2601_v6, 0.0  ;;  %v6614_v31 = vrot.slane %v6503_v9, %v2538_v32  ;;  %v5242_v32 = vld [vmem:[#allocation11 + $0x1f4] ss:$8 sps:$4 sm:$0xff]  }
 0x3e8   : > { %v2733_v29 = vmax.f32 %v2605_v21, 0.0  ;;  %v2797_v13 = vmax.f32 %v2669_v18, 0.0  ;;  %v2235_v30 = vpop.f32.mrb[32].mxu1  ;;  %v1651_v6 = vld [vmem:[#allocation2 + $0x58] sm:$0xff]  ;;  %v1654_v4 = vld [vmem:[#allocation2 + $0x70] sm:$0xff] }
 0x3e9   : > { %v2828_v33 = vpack.c.bf16 %v2732_v22, %v2728_v20  ;;  %v2396_v16 = vadd.f32 %v2235_v30, %v1642_v19  ;;  %v2237_v34 = vpop.f32.mrb[33].mxu1  ;;  %v6616_v36 = vpack.c.bf16 %v2796_v23, %v2792_v11  ;;  %v1655_v21 = vld [vmem:[#allocation2 + $0x78] sm:$0xff] }
 0x3ea   : > { %v2829_v38 = vpack.c.bf16 %v2733_v29, %v2729_v28  ;;  %3480 = vmatpush1.bf16.msra.mxu0 %v5234_v14  ;;  %v2397_v26 = vadd.f32 %v2237_v34, %v1643_v27  ;;  %v2239_v44 = vpop.f32.mrb[34].mxu1  ;;  %v6618_v46 = vpack.c.bf16 %v2797_v13, %v2793_v17  ;;  %v1658_v13 = vld [vmem:[#allocation2 + $0x90] sm:$0xff] }
 0x3eb   : > { %3481 = vmatprep.subr.bf16.mxu0 %v5239_v24  ;;  %v2546_v47 = vadd.f32 %v6611_v25, %v2396_v16  ;;  %v2400_v50 = vadd.f32 %v2239_v44, %v1646_v3  ;;  %v2241_v9 = vpop.f32.mrb[35].mxu1  ;;  %v1659_v3 = vld [vmem:[#allocation2 + $0x98] sm:$0xff]  ;;  %v1662_v34 = vld [vmem:[#allocation2 + $0xb0] sm:$0xff] }
 0x3ec   : > { %3362 = vmatprep.mubr.bf16.mxu0 %v2829_v38  ;;  %v2547_v52 = vadd.f32 %v6614_v31, %v2397_v26  ;;  %v2401_v56 = vadd.f32 %v2241_v9, %v1647_v35 }
 0x3ed   : > { %3363 = vmatmul.mubr.bf16.gmra.mrb[60].mxu0 %v2828_v33  ;;  %v2674_v58 = vmax.f32 %v2546_v47, 0.0  ;;  %v2550_v59 = vadd.f32 %v6611_v25, %v2400_v50 }
 0x3ee   : > { %3372 = vmatprep.mubr.bf16.mxu0 %v6526_v15  ;;  %3482 = vmatpush1.bf16.msra.mxu0 %v5237_v42  ;;  %v2675_v62 = vmax.f32 %v2547_v52, 0.0  ;;  %v2551_v63 = vadd.f32 %v6614_v31, %v2401_v56  ;;  %v1663_v42 = vld [vmem:[#allocation2 + $0xb8] sm:$0xff] }
 0x3ef   : > { %v2678_v2 = vmax.f32 %v2550_v59, 0.0  ;;  %3483 = vmatprep.subr.bf16.mxu0 %v5242_v32 }
 0x3f0   : > { %v2679_v8 = vmax.f32 %v2551_v63, 0.0  ;;  %v2245_v40 = vpop.f32.mrb[36].mxu1  ;;  %v1666_v63 = vld [vmem:[#allocation2 + $0xd0] sm:$0xff] }
 0x3f1   : > { %v6625_v41 = vpack.c.bf16 %v2678_v2, %v2674_v58  ;;  %v2404_v11 = vadd.f32 %v2245_v40, %v1650_v1  ;;  %v2247_v12 = vpop.f32.mrb[37].mxu1  ;;  %v1667_v1 = vld [vmem:[#allocation2 + $0xd8] sm:$0xff] }
 0x3f2   : > { %3484 = vmatpush1.bf16.msra.mxu0 %v5240_v0  ;;  %v2405_v14 = vadd.f32 %v2247_v12, %v1651_v6  ;;  %v2249_v15 = vpop.f32.mrb[38].mxu1  ;;  %v6627_v17 = vpack.c.bf16 %v2679_v8, %v2675_v62  ;;  %v1670_v8 = vld [vmem:[#allocation2 + $0xf0] sm:$0xff] }
 0x3f3   : > { %v2554_v18 = vadd.f32 %v6611_v25, %v2404_v11  ;;  %v2408_v19 = vadd.f32 %v2249_v15, %v1654_v4  ;;  %v2251_v20 = vpop.f32.mrb[39].mxu1  ;;  %v1671_v11 = vld [vmem:[#allocation2 + $0xf8] sm:$0xff] }
 0x3f4   : > { %v2555_v22 = vadd.f32 %v6614_v31, %v2405_v14  ;;  %v2409_v23 = vadd.f32 %v2251_v20, %v1655_v21 }
 0x3f5   : > { %3373 = vmatmul.mubr.bf16.gmra.mrb[64].mxu0 %v6524_v53  ;;  %v2682_v24 = vmax.f32 %v2554_v18, 0.0  ;;  %v2558_v27 = vadd.f32 %v6611_v25, %v2408_v19 }
 0x3f6   : > { %3382 = vmatprep.mubr.bf16.mxu0 %v6538_v7  ;;  %v2683_v28 = vmax.f32 %v2555_v22, 0.0  ;;  %v2559_v29 = vadd.f32 %v6614_v31, %v2409_v23 }
 0x3f7   : > { %v2686_v30 = vmax.f32 %v2558_v27, 0.0 }
 0x3f8   : > { %v2687_v33 = vmax.f32 %v2559_v29, 0.0  ;;  %v2255_v16 = vpop.f32.mrb[40].mxu1 }
 0x3f9   : > { %v2412_v35 = vadd.f32 %v2255_v16, %v1658_v13  ;;  %v2257_v38 = vpop.f32.mrb[41].mxu1  ;;  %v6635_v26 = vpack.c.bf16 %v2686_v30, %v2682_v24  ;;  %v1675_v13 = vld [vmem:[#allocation2 + $0x118] sm:$0xff] }
 0x3fa   : > { %v2413_v53 = vadd.f32 %v2257_v38, %v1659_v3  ;;  %v2259_v44 = vpop.f32.mrb[42].mxu1  ;;  %v6637_v47 = vpack.c.bf16 %v2687_v33, %v2683_v28  ;;  %v1674_v28 = vld [vmem:[#allocation2 + $0x110] sm:$0xff] }
 0x3fb   : > { %v2562_v7 = vadd.f32 %v6611_v25, %v2412_v35  ;;  %v2416_v50 = vadd.f32 %v2259_v44, %v1662_v34  ;;  %v2261_v9 = vpop.f32.mrb[43].mxu1  ;;  %v1678_v33 = vld [vmem:[#allocation2 + $0x130] sm:$0xff]  ;;  %v1679_v35 = vld [vmem:[#allocation2 + $0x138] sm:$0xff] }
 0x3fc   : > { %v2563_v32 = vadd.f32 %v6614_v31, %v2413_v53  ;;  %v2417_v52 = vadd.f32 %v2261_v9, %v1663_v42 }
 0x3fd   : > { %3383 = vmatmul.mubr.bf16.gmra.mrb[68].mxu0 %v6536_v61  ;;  %v2690_v56 = vmax.f32 %v2562_v7, 0.0  ;;  %v2566_v58 = vadd.f32 %v6611_v25, %v2416_v50 }
 0x3fe   : > { %3392 = vmatprep.mubr.bf16.mxu0 %v6550_v60  ;;  %v2691_v59 = vmax.f32 %v2563_v32, 0.0  ;;  %v2567_v62 = vadd.f32 %v6614_v31, %v2417_v52 }
 0x3ff   : > { %v2694_v0 = vmax.f32 %v2566_v58, 0.0 }
 0x400   : > { %v2695_v2 = vmax.f32 %v2567_v62, 0.0  ;;  %v2265_v6 = vpop.f32.mrb[44].mxu1  ;;  %v5243_v62 = vld [vmem:[#allocation12 + $0x40] sm:$0xff]  }
 0x401   : > { %v2420_v40 = vadd.f32 %v2265_v6, %v1666_v63  ;;  %v2267_v4 = vpop.f32.mrb[45].mxu1  ;;  %v6645_v12 = vpack.c.bf16 %v2694_v0, %v2690_v56  ;;  %v5244_v63 = vld [vmem:[#allocation12] sm:$0xff]   ;;  %4617 = vmatprep.subr.bf16.mxu1 %v5243_v62  ;;  %v5245_v62 = vld [vmem:[#allocation12 + $0x48] sm:$0xff]  }
 0x402   : > { %v2421_v61 = vadd.f32 %v2267_v4, %v1667_v1  ;;  %v2269_v21 = vpop.f32.mrb[46].mxu1  ;;  %v6647_v14 = vpack.c.bf16 %v2695_v2, %v2691_v59  ;;  %v1682_v59 = vld [vmem:[#allocation2 + $0x150] sm:$0xff]  ;;  %v1683_v1 = vld [vmem:[#allocation2 + $0x158] sm:$0xff]  ;;  %4618 = vmatpush3.bf16.msra.mxu1 %v5244_v63  ;;  %v5246_v63 = vld [vmem:[#allocation12 + $0x8] sm:$0xff]  }
 0x403   : > { %v2570_v60 = vadd.f32 %v6611_v25, %v2420_v40  ;;  %v2424_v15 = vadd.f32 %v2269_v21, %v1670_v8  ;;  %v2271_v18 = vpop.f32.mrb[47].mxu1  ;;  %v1686_v8 = vld [vmem:[#allocation2 + $0x170] sm:$0xff]  ;;  %4619 = vmatprep.subr.bf16.mxu1 %v5245_v62 }
 0x404   : > { %v2571_v19 = vadd.f32 %v6614_v31, %v2421_v61  ;;  %v2425_v20 = vadd.f32 %v2271_v18, %v1671_v11 }
 0x405   : > { %3393 = vmatmul.mubr.bf16.gmra.mrb[72].mxu0 %v6548_v51  ;;  %v2698_v22 = vmax.f32 %v2570_v60, 0.0  ;;  %v2574_v23 = vadd.f32 %v6611_v25, %v2424_v15 }
 0x406   : > { %3402 = vmatprep.mubr.bf16.mxu0 %v6562_v55  ;;  %v2699_v24 = vmax.f32 %v2571_v19, 0.0  ;;  %v2575_v27 = vadd.f32 %v6614_v31, %v2425_v20  ;;  %4620 = vmatpush3.bf16.msra.mxu1 %v5246_v63 }
 0x407   : > { %v2702_v29 = vmax.f32 %v2574_v23, 0.0 }
 0x408   : > { %v2703_v30 = vmax.f32 %v2575_v27, 0.0  ;;  %v2275_v3 = vpop.f32.mrb[48].mxu1 }
 0x409   : > { %v2428_v16 = vadd.f32 %v2275_v3, %v1674_v28  ;;  %v2277_v34 = vpop.f32.mrb[49].mxu1  ;;  %v6655_v38 = vpack.c.bf16 %v2702_v29, %v2698_v22  ;;  %v1690_v28 = vld [vmem:[#allocation2 + $0x190] sm:$0xff] }
 0x40a   : > { %v2429_v51 = vadd.f32 %v2277_v34, %v1675_v13  ;;  %v2279_v42 = vpop.f32.mrb[50].mxu1  ;;  %v6657_v53 = vpack.c.bf16 %v2703_v30, %v2699_v24  ;;  %v1691_v13 = vld [vmem:[#allocation2 + $0x198] sm:$0xff] }
 0x40b   : > { %v2578_v55 = vadd.f32 %v6611_v25, %v2428_v16  ;;  %v2432_v44 = vadd.f32 %v2279_v42, %v1678_v33  ;;  %v2281_v7 = vpop.f32.mrb[51].mxu1  ;;  %v1694_v33 = vld [vmem:[#allocation2 + $0x1b0] sm:$0xff] }
 0x40c   : > { %v2579_v50 = vadd.f32 %v6614_v31, %v2429_v51  ;;  %v2433_v9 = vadd.f32 %v2281_v7, %v1679_v35  ;;  %v1695_v35 = vld [vmem:[#allocation2 + $0x1b8] sm:$0xff] }
 0x40d   : > { %3403 = vmatmul.mubr.bf16.gmra.mrb[76].mxu0 %v6560_v45  ;;  %v2706_v32 = vmax.f32 %v2578_v55, 0.0  ;;  %v2582_v52 = vadd.f32 %v6611_v25, %v2432_v44  ;;  %v1687_v45 = vld [vmem:[#allocation2 + $0x178] sm:$0xff] }
 0x40e   : > { %3412 = vmatprep.mubr.bf16.mxu0 %v6574_v49  ;;  %v2707_v56 = vmax.f32 %v2579_v50, 0.0  ;;  %v2583_v58 = vadd.f32 %v6614_v31, %v2433_v9 }
 0x40f   : > { %v2710_v0 = vmax.f32 %v2582_v52, 0.0 }
 0x410   : > { %v2711_v2 = vmax.f32 %v2583_v58, 0.0  ;;  %v2285_v6 = vpop.f32.mrb[52].mxu1 }
 0x411   : > { %v2436_v40 = vadd.f32 %v2285_v6, %v1682_v59  ;;  %v2287_v4 = vpop.f32.mrb[53].mxu1  ;;  %v6665_v11 = vpack.c.bf16 %v2710_v0, %v2706_v32  ;;  %v1698_v59 = vld [vmem:[#allocation2 + $0x1d0] sm:$0xff] }
 0x412   : > { %v2437_v61 = vadd.f32 %v2287_v4, %v1683_v1  ;;  %v2289_v49 = vpop.f32.mrb[54].mxu1  ;;  %v6667_v21 = vpack.c.bf16 %v2711_v2, %v2707_v56  ;;  %v1699_v1 = vld [vmem:[#allocation2 + $0x1d8] sm:$0xff] }
 0x413   : > { %v2586_v60 = vadd.f32 %v6611_v25, %v2436_v40  ;;  %v2440_v15 = vadd.f32 %v2289_v49, %v1686_v8  ;;  %v2291_v18 = vpop.f32.mrb[55].mxu1  ;;  %v1702_v8 = vld [vmem:[#allocation2 + $0x1f0] sm:$0xff] }
 0x414   : > { %v2587_v19 = vadd.f32 %v6614_v31, %v2437_v61  ;;  %v2441_v20 = vadd.f32 %v2291_v18, %v1687_v45 }
 0x415   : > { %3413 = vmatmul.mubr.bf16.gmra.mrb[80].mxu0 %v6572_v39  ;;  %v2714_v22 = vmax.f32 %v2586_v60, 0.0  ;;  %v2590_v23 = vadd.f32 %v6611_v25, %v2440_v15 }
 0x416   : > { %3422 = vmatprep.mubr.bf16.mxu0 %v6586_v48  ;;  %v2715_v24 = vmax.f32 %v2587_v19, 0.0  ;;  %v2591_v27 = vadd.f32 %v6614_v31, %v2441_v20 }
 0x417   : > { %v2718_v29 = vmax.f32 %v2590_v23, 0.0 }
 0x418   : > { %v2719_v30 = vmax.f32 %v2591_v27, 0.0  ;;  %v2295_v3 = vpop.f32.mrb[56].mxu1 }
 0x419   : > { %v2444_v16 = vadd.f32 %v2295_v3, %v1690_v28  ;;  %v2297_v34 = vpop.f32.mrb[57].mxu1  ;;  %v6675_v51 = vpack.c.bf16 %v2718_v29, %v2714_v22  ;;  %v1706_v28 = vld [vmem:[#allocation2 + $0x210] sm:$0xff] }
 0x41a   : > { %v2445_v39 = vadd.f32 %v2297_v34, %v1691_v13  ;;  %v2299_v42 = vpop.f32.mrb[58].mxu1  ;;  %v6677_v55 = vpack.c.bf16 %v2719_v30, %v2715_v24  ;;  %v1707_v13 = vld [vmem:[#allocation2 + $0x218] sm:$0xff] }
 0x41b   : > { %v2594_v48 = vadd.f32 %v6611_v25, %v2444_v16  ;;  %v2448_v44 = vadd.f32 %v2299_v42, %v1694_v33  ;;  %v2301_v7 = vpop.f32.mrb[59].mxu1  ;;  %v1710_v33 = vld [vmem:[#allocation2 + $0x230] sm:$0xff] }
 0x41c   : > { %v2595_v50 = vadd.f32 %v6614_v31, %v2445_v39  ;;  %v2449_v9 = vadd.f32 %v2301_v7, %v1695_v35  ;;  %v1711_v35 = vld [vmem:[#allocation2 + $0x238] sm:$0xff] }
 0x41d   : > { %3423 = vmatmul.mubr.bf16.gmra.mrb[84].mxu0 %v6584_v37  ;;  %v2722_v32 = vmax.f32 %v2594_v48, 0.0  ;;  %v2598_v52 = vadd.f32 %v6611_v25, %v2448_v44  ;;  %v1703_v37 = vld [vmem:[#allocation2 + $0x1f8] sm:$0xff] }
 0x41e   : > { %3432 = vmatprep.mubr.bf16.mxu0 %v6600_v57  ;;  %v2723_v56 = vmax.f32 %v2595_v50, 0.0  ;;  %v2599_v58 = vadd.f32 %v6614_v31, %v2449_v9 }
 0x41f   : > { %v2726_v0 = vmax.f32 %v2598_v52, 0.0 }
 0x420   : > { %v2727_v2 = vmax.f32 %v2599_v58, 0.0  ;;  %v2305_v6 = vpop.f32.mrb[60].mxu1  ;;  %v5248_v58 = vld [vmem:[#allocation12 + $0x10] sm:$0xff]  }
 0x421   : > { %v2452_v40 = vadd.f32 %v2305_v6, %v1698_v59  ;;  %v2307_v4 = vpop.f32.mrb[61].mxu1  ;;  %v6685_v45 = vpack.c.bf16 %v2726_v0, %v2722_v32  ;;  %v5249_v59 = vld [vmem:[#allocation12 + $0x58] sm:$0xff]   ;;  %v1714_v0 = vld [vmem:[#allocation2 + $0x250] sm:$0xff] }
 0x422   : > { %v2453_v61 = vadd.f32 %v2307_v4, %v1699_v1  ;;  %v2309_v57 = vpop.f32.mrb[62].mxu1  ;;  %v6687_v49 = vpack.c.bf16 %v2727_v2, %v2723_v56  ;;  %v5247_v56 = vld [vmem:[#allocation12 + $0x50] sm:$0xff]   ;;  %v1715_v2 = vld [vmem:[#allocation2 + $0x258] sm:$0xff] }
 0x423   : > { %v2602_v60 = vadd.f32 %v6611_v25, %v2452_v40  ;;  %v2456_v15 = vadd.f32 %v2309_v57, %v1702_v8  ;;  %v2311_v18 = vpop.f32.mrb[63].mxu1  ;;  %4621 = vmatprep.subr.bf16.mxu1 %v5247_v56  ;;  %v1718_v40 = vld [vmem:[#allocation2 + $0x270] sm:$0xff] }
 0x424   : > { %v2603_v19 = vadd.f32 %v6614_v31, %v2453_v61  ;;  %v2457_v20 = vadd.f32 %v2311_v18, %v1703_v37  ;;  %4622 = vmatpush3.bf16.msra.mxu1 %v5248_v58  ;;  %v1719_v61 = vld [vmem:[#allocation2 + $0x278] sm:$0xff] }
 0x425   : > { %3433 = vmatmul.mubr.bf16.gmra.mrb[88].mxu0 %v6598_v43  ;;  %v2730_v22 = vmax.f32 %v2602_v60, 0.0  ;;  %v2606_v23 = vadd.f32 %v6611_v25, %v2456_v15  ;;  %4623 = vmatprep.subr.bf16.mxu1 %v5249_v59  ;;  %v5251_v60 = vld [vmem:[#allocation12 + $0x60] sm:$0xff]  }
 0x426   : > { %3442 = vmatprep.mubr.bf16.mxu0 %v6618_v46  ;;  %v2731_v24 = vmax.f32 %v2603_v19, 0.0  ;;  %v2607_v27 = vadd.f32 %v6614_v31, %v2457_v20 }
 0x427   : > { %v2734_v29 = vmax.f32 %v2606_v23, 0.0 }
 0x428   : > { %v2735_v30 = vmax.f32 %v2607_v27, 0.0  ;;  %v2315_v3 = vpop.f32.mrb[64].mxu1  ;;  %v5252_v27 = vld [vmem:[#allocation12 + $0x20] sm:$0xff]  }
 0x429   : > { %v2460_v16 = vadd.f32 %v2315_v3, %v1706_v28  ;;  %v2317_v34 = vpop.f32.mrb[65].mxu1  ;;  %v6695_v39 = vpack.c.bf16 %v2734_v29, %v2730_v22 }
 0x42a   : > { %v2461_v43 = vadd.f32 %v2317_v34, %v1707_v13  ;;  %v2319_v42 = vpop.f32.mrb[66].mxu1  ;;  %v6697_v48 = vpack.c.bf16 %v2735_v30, %v2731_v24  ;;  %v5253_v13 = vld [vmem:[#allocation12 + $0x68] sm:$0xff]   ;;  %v1723_v34 = vld [vmem:[#allocation2 + $0x298] sm:$0xff] }
 0x42b   : > { %v2610_v46 = vadd.f32 %v6611_v25, %v2460_v16  ;;  %v2464_v44 = vadd.f32 %v2319_v42, %v1710_v33  ;;  %v2321_v7 = vpop.f32.mrb[67].mxu1  ;;  %v1722_v33 = vld [vmem:[#allocation2 + $0x290] sm:$0xff] }
 0x42c   : > { %v2611_v50 = vadd.f32 %v6614_v31, %v2461_v43  ;;  %v2465_v9 = vadd.f32 %v2321_v7, %v1711_v35  ;;  %v1726_v42 = vld [vmem:[#allocation2 + $0x2b0] sm:$0xff]  ;;  %v1727_v7 = vld [vmem:[#allocation2 + $0x2b8] sm:$0xff] }
 0x42d   : > { %3443 = vmatmul.mubr.bf16.gmra.mrb[92].mxu0 %v6616_v36  ;;  %v2738_v32 = vmax.f32 %v2610_v46, 0.0  ;;  %v2614_v52 = vadd.f32 %v6611_v25, %v2464_v44  ;;  %v5250_v36 = vld [vmem:[#allocation12 + $0x18] sm:$0xff]   ;;  %v5254_v46 = vld [vmem:[#allocation12 + $0x28] sm:$0xff]  }
 0x42e   : > { %3485 = vmatprep.mubr.bf16.mxu0 %v6627_v17  ;;  %v2739_v62 = vmax.f32 %v2611_v50, 0.0  ;;  %v2615_v63 = vadd.f32 %v6614_v31, %v2465_v9  ;;  %4624 = vmatpush3.bf16.msra.mxu1 %v5250_v36  ;;  %v5255_v9 = vld [vmem:[#allocation12 + $0x70] sm:$0xff]  }
 0x42f   : > { %v2742_v1 = vmax.f32 %v2614_v52, 0.0  ;;  %4625 = vmatprep.subr.bf16.mxu1 %v5251_v60  ;;  %v1730_v36 = vld [vmem:[#allocation2 + $0x2d0] sm:$0xff] }
 0x430   : > { %v2743_v6 = vmax.f32 %v2615_v63, 0.0  ;;  %v2325_v8 = vpop.f32.mrb[68].mxu1 }
 0x431   : > { %v2468_v4 = vadd.f32 %v2325_v8, %v1714_v0  ;;  %v2327_v37 = vpop.f32.mrb[69].mxu1  ;;  %v6705_v57 = vpack.c.bf16 %v2742_v1, %v2738_v32  ;;  %v5256_v0 = vld [vmem:[#allocation12 + $0x30] sm:$0xff]  }
 0x432   : > { %v2469_v17 = vadd.f32 %v2327_v37, %v1715_v2  ;;  %v2329_v15 = vpop.f32.mrb[70].mxu1  ;;  %v6707_v18 = vpack.c.bf16 %v2743_v6, %v2739_v62  ;;  %4626 = vmatpush3.bf16.msra.mxu1 %v5252_v27  ;;  %v5257_v6 = vld [vmem:[#allocation12 + $0x78] sm:$0xff]  }
 0x433   : > { %v2618_v19 = vadd.f32 %v6611_v25, %v2468_v4  ;;  %v2472_v20 = vadd.f32 %v2329_v15, %v1718_v40  ;;  %v2331_v22 = vpop.f32.mrb[71].mxu1  ;;  %4627 = vmatprep.subr.bf16.mxu1 %v5253_v13  ;;  %v1731_v37 = vld [vmem:[#allocation2 + $0x2d8] sm:$0xff] }
 0x434   : > { %v2619_v23 = vadd.f32 %v6614_v31, %v2469_v17  ;;  %v2473_v24 = vadd.f32 %v2331_v22, %v1719_v61  ;;  %v1734_v17 = vld [vmem:[#allocation2 + $0x2f0] sm:$0xff]  ;;  %v5258_v15 = vld [vmem:[#allocation12 + $0x38] sm:$0xff]  }
 0x435   : > { %3486 = vmatmul.mubr.bf16.vlgmr.msra.gmra.mrb[32].mxu0 %v6625_v41  ;;  %v2746_v28 = vmax.f32 %v2618_v19, 0.0  ;;  %v2622_v29 = vadd.f32 %v6611_v25, %v2472_v20  ;;  %v1735_v20 = vld [vmem:[#allocation2 + $0x2f8] sm:$0xff] }
 0x436   : > { %3495 = vmatprep.mubr.bf16.mxu0 %v6637_v47  ;;  %v2747_v30 = vmax.f32 %v2619_v23, 0.0  ;;  %v2623_v3 = vadd.f32 %v6614_v31, %v2473_v24  ;;  %4628 = vmatpush3.bf16.msra.mxu1 %v5254_v46 }
 0x437   : > { %v2750_v16 = vmax.f32 %v2622_v29, 0.0  ;;  %4629 = vmatprep.subr.bf16.mxu1 %v5255_v9 }
 0x438   : > { %v2751_v35 = vmax.f32 %v2623_v3, 0.0  ;;  %v2335_v43 = vpop.f32.mrb[72].mxu1 }
 0x439   : > { %v2476_v44 = vadd.f32 %v2335_v43, %v1722_v33  ;;  %v2337_v41 = vpop.f32.mrb[73].mxu1  ;;  %v6715_v50 = vpack.c.bf16 %v2750_v16, %v2746_v28 }
 0x43a   : > { %v2477_v32 = vadd.f32 %v2337_v41, %v1723_v34  ;;  %v2339_v47 = vpop.f32.mrb[74].mxu1  ;;  %v6717_v52 = vpack.c.bf16 %v2751_v35, %v2747_v30  ;;  %4630 = vmatpush3.bf16.msra.mxu1 %v5256_v0  ;;  %v1738_v35 = vld [vmem:[#allocation2 + $0x310] sm:$0xff] }
 0x43b   : > { %v2626_v56 = vadd.f32 %v6611_v25, %v2476_v44  ;;  %v2480_v58 = vadd.f32 %v2339_v47, %v1726_v42  ;;  %v2341_v59 = vpop.f32.mrb[75].mxu1  ;;  %4631 = vmatprep.subr.bf16.mxu1 %v5257_v6  ;;  %v1739_v42 = vld [vmem:[#allocation2 + $0x318] sm:$0xff]  ;;  %v1742_v41 = vld [vmem:[#allocation2 + $0x330] sm:$0xff] }
 0x43c   : > { %v2627_v62 = vadd.f32 %v6614_v31, %v2477_v32  ;;  %v2481_v63 = vadd.f32 %v2341_v59, %v1727_v7  ;;  %v1743_v32 = vld [vmem:[#allocation2 + $0x338] sm:$0xff] }
 0x43d   : > { %3496 = vmatmul.mubr.bf16.gmra.mrb[36].mxu0 %v6635_v26  ;;  %v2754_v1 = vmax.f32 %v2626_v56, 0.0  ;;  %v2630_v2 = vadd.f32 %v6611_v25, %v2480_v58 }
 0x43e   : > { %3505 = vmatprep.mubr.bf16.mxu0 %v6647_v14  ;;  %v2755_v8 = vmax.f32 %v2627_v62, 0.0  ;;  %v2631_v40 = vadd.f32 %v6614_v31, %v2481_v63  ;;  %4632 = vmatpush3.bf16.msra.mxu1 %v5258_v15 }
 0x43f   : > { %v2758_v4 = vmax.f32 %v2630_v2, 0.0 }
 0x440   : > { %v2759_v61 = vmax.f32 %v2631_v40, 0.0  ;;  %v2345_v60 = vpop.f32.mrb[76].mxu1  ;;  %v1746_v40 = vld [vmem:[#allocation2 + $0x350] sm:$0xff] }
 0x441   : > { %v2484_v19 = vadd.f32 %v2345_v60, %v1730_v36  ;;  %v2347_v26 = vpop.f32.mrb[77].mxu1  ;;  %v6725_v22 = vpack.c.bf16 %v2758_v4, %v2754_v1  ;;  %v1747_v4 = vld [vmem:[#allocation2 + $0x358] sm:$0xff]  ;;  %v1750_v60 = vld [vmem:[#allocation2 + $0x370] sm:$0xff] }
 0x442   : > { %v2485_v23 = vadd.f32 %v2347_v26, %v1731_v37  ;;  %v2349_v24 = vpop.f32.mrb[78].mxu1  ;;  %v6727_v14 = vpack.c.bf16 %v2759_v61, %v2755_v8 }
 0x443   : > { %v2634_v27 = vadd.f32 %v6611_v25, %v2484_v19  ;;  %v2488_v28 = vadd.f32 %v2349_v24, %v1734_v17  ;;  %v2351_v29 = vpop.f32.mrb[79].mxu1  ;;  %v1751_v19 = vld [vmem:[#allocation2 + $0x378] sm:$0xff] }
 0x444   : > { %v2635_v13 = vadd.f32 %v6614_v31, %v2485_v23  ;;  %v2489_v30 = vadd.f32 %v2351_v29, %v1735_v20 }
 0x445   : > { %3506 = vmatmul.mubr.bf16.gmra.mrb[40].mxu0 %v6645_v12  ;;  %v2762_v3 = vmax.f32 %v2634_v27, 0.0  ;;  %v2638_v33 = vadd.f32 %v6611_v25, %v2488_v28 }
 0x446   : > { %3515 = vmatprep.mubr.bf16.mxu0 %v6657_v53  ;;  %v2763_v16 = vmax.f32 %v2635_v13, 0.0  ;;  %v2639_v34 = vadd.f32 %v6614_v31, %v2489_v30 }
 0x447   : > { %v2766_v43 = vmax.f32 %v2638_v33, 0.0 }
 0x448   : > { %v2767_v46 = vmax.f32 %v2639_v34, 0.0  ;;  %v2355_v44 = vpop.f32.mrb[80].mxu1 }
 0x449   : > { %v2492_v7 = vadd.f32 %v2355_v44, %v1738_v35  ;;  %v2357_v9 = vpop.f32.mrb[81].mxu1  ;;  %v6735_v47 = vpack.c.bf16 %v2766_v43, %v2762_v3  ;;  %v1755_v35 = vld [vmem:[#allocation2 + $0x398] sm:$0xff] }
 0x44a   : > { %v2493_v12 = vadd.f32 %v2357_v9, %v1739_v42  ;;  %v2359_v56 = vpop.f32.mrb[82].mxu1  ;;  %v6737_v58 = vpack.c.bf16 %v2767_v46, %v2763_v16  ;;  %v1754_v16 = vld [vmem:[#allocation2 + $0x390] sm:$0xff] }
 0x44b   : > { %v2642_v53 = vadd.f32 %v6611_v25, %v2492_v7  ;;  %v2496_v59 = vadd.f32 %v2359_v56, %v1742_v41  ;;  %v2361_v62 = vpop.f32.mrb[83].mxu1  ;;  %v1758_v46 = vld [vmem:[#allocation2 + $0x3b0] sm:$0xff]  ;;  %v1759_v7 = vld [vmem:[#allocation2 + $0x3b8] sm:$0xff] }
 0x44c   : > { %v2643_v63 = vadd.f32 %v6614_v31, %v2493_v12  ;;  %v2497_v0 = vadd.f32 %v2361_v62, %v1743_v32 }
 0x44d   : > { %3516 = vmatmul.mubr.bf16.gmra.mrb[44].mxu0 %v6655_v38  ;;  %v2770_v1 = vmax.f32 %v2642_v53, 0.0  ;;  %v2646_v2 = vadd.f32 %v6611_v25, %v2496_v59 }
 0x44e   : > { %3525 = vmatprep.mubr.bf16.mxu0 %v6667_v21  ;;  %v2771_v6 = vmax.f32 %v2643_v63, 0.0  ;;  %v2647_v8 = vadd.f32 %v6614_v31, %v2497_v0 }
 0x44f   : > { %v2774_v36 = vmax.f32 %v2646_v2, 0.0 }
 0x450   : > { %v2775_v37 = vmax.f32 %v2647_v8, 0.0  ;;  %v2365_v61 = vpop.f32.mrb[84].mxu1 }
 0x451   : > { %v2500_v17 = vadd.f32 %v2365_v61, %v1746_v40  ;;  %v2367_v15 = vpop.f32.mrb[85].mxu1  ;;  %v6745_v26 = vpack.c.bf16 %v2774_v36, %v2770_v1  ;;  %v1763_v40 = vld [vmem:[#allocation2 + $0x3d8] sm:$0xff] }
 0x452   : > { %v2501_v38 = vadd.f32 %v2367_v15, %v1747_v4  ;;  %v2369_v20 = vpop.f32.mrb[86].mxu1  ;;  %v6747_v23 = vpack.c.bf16 %v2775_v37, %v2771_v6  ;;  %v1762_v6 = vld [vmem:[#allocation2 + $0x3d0] sm:$0xff] }
 0x453   : > { %v2650_v21 = vadd.f32 %v6611_v25, %v2500_v17  ;;  %v2504_v24 = vadd.f32 %v2369_v20, %v1750_v60  ;;  %v2371_v27 = vpop.f32.mrb[87].mxu1  ;;  %v1766_v37 = vld [vmem:[#allocation2 + $0x3f0] sm:$0xff]  ;;  %v1767_v17 = vld [vmem:[#allocation2 + $0x3f8] sm:$0xff] }
 0x454   : > { %v2651_v28 = vadd.f32 %v6614_v31, %v2501_v38  ;;  %v2505_v29 = vadd.f32 %v2371_v27, %v1751_v19 }
 0x455   : > { %3526 = vmatmul.mubr.bf16.gmra.mrb[48].mxu0 %v6665_v11  ;;  %v2778_v13 = vmax.f32 %v2650_v21, 0.0  ;;  %v2654_v30 = vadd.f32 %v6611_v25, %v2504_v24 }
 0x456   : > { %3535 = vmatprep.mubr.bf16.mxu0 %v6677_v55  ;;  %v2779_v3 = vmax.f32 %v2651_v28, 0.0  ;;  %v2655_v33 = vadd.f32 %v6614_v31, %v2505_v29 }
 0x457   : > { %v2782_v34 = vmax.f32 %v2654_v30, 0.0 }
 0x458   : > { %v2783_v43 = vmax.f32 %v2655_v33, 0.0  ;;  %v2375_v42 = vpop.f32.mrb[88].mxu1 }
 0x459   : > { %v2508_v44 = vadd.f32 %v2375_v42, %v1754_v16  ;;  %v2377_v41 = vpop.f32.mrb[89].mxu1  ;;  %v2854_v9 = vpack.c.bf16 %v2782_v34, %v2778_v13 }
 0x45a   : > { %v2509_v32 = vadd.f32 %v2377_v41, %v1755_v35  ;;  %v2379_v11 = vpop.f32.mrb[90].mxu1  ;;  %v2855_v12 = vpack.c.bf16 %v2783_v43, %v2779_v3 }
 0x45b   : > { %v2658_v56 = vadd.f32 %v6611_v25, %v2508_v44  ;;  %v2512_v53 = vadd.f32 %v2379_v11, %v1758_v46  ;;  %v2381_v55 = vpop.f32.mrb[91].mxu1 }
 0x45c   : > { %v2659_v59 = vadd.f32 %v6614_v31, %v2509_v32  ;;  %v2513_v62 = vadd.f32 %v2381_v55, %v1759_v7 }
 0x45d   : > { %3536 = vmatmul.mubr.bf16.gmra.mrb[52].mxu0 %v6675_v51  ;;  %v2786_v63 = vmax.f32 %v2658_v56, 0.0  ;;  %v2662_v0 = vadd.f32 %v6611_v25, %v2512_v53 }
 0x45e   : > { %3545 = vmatprep.mubr.bf16.mxu0 %v6687_v49  ;;  %v2787_v1 = vmax.f32 %v2659_v59, 0.0  ;;  %v2663_v2 = vadd.f32 %v6614_v31, %v2513_v62 }
 0x45f   : > { %v2790_v8 = vmax.f32 %v2662_v0, 0.0 }
 0x460   : > { %v2791_v36 = vmax.f32 %v2663_v2, 0.0  ;;  %v2385_v4 = vpop.f32.mrb[92].mxu1 }
 0x461   : > { %v2516_v61 = vadd.f32 %v2385_v4, %v1762_v6  ;;  %v2387_v60 = vpop.f32.mrb[93].mxu1  ;;  %v2858_v15 = vpack.c.bf16 %v2790_v8, %v2786_v63 }
 0x462   : > { %v2517_v19 = vadd.f32 %v2387_v60, %v1763_v40  ;;  %v2389_v51 = vpop.f32.mrb[94].mxu1  ;;  %v2859_v38 = vpack.c.bf16 %v2791_v36, %v2787_v1 }
 0x463   : > { %v2666_v20 = vadd.f32 %v6611_v25, %v2516_v61  ;;  %v2520_v21 = vadd.f32 %v2389_v51, %v1766_v37  ;;  %v2391_v49 = vpop.f32.mrb[95].mxu1 }
 0x464   : > { %v2667_v24 = vadd.f32 %v6614_v31, %v2517_v19  ;;  %v2521_v27 = vadd.f32 %v2391_v49, %v1767_v17 }
 0x465   : > { %3546 = vmatmul.mubr.bf16.gmra.mrb[56].mxu0 %v6685_v45  ;;  %v2794_v28 = vmax.f32 %v2666_v20, 0.0  ;;  %v2670_v29 = vadd.f32 %v6611_v25, %v2520_v21  ;;  %v2928_v25 = vld [vmem:[%s7274_s6] sm:$0x3] }
 0x466   : > { %3555 = vmatprep.mubr.bf16.mxu0 %v6697_v48  ;;  %v2795_v13 = vmax.f32 %v2667_v24, 0.0  ;;  %v2671_v30 = vadd.f32 %v6614_v31, %v2521_v27  ;;  %v6783_v31 = vrot.slane %v2928_v25, %v2526_v5  ;;  %v6787_v45 = vrot.slane %v2928_v25, %v2530_v10 }
 0x467   : > { %v2798_v3 = vmax.f32 %v2670_v29, 0.0 }
 0x468   : > { %v2799_v33 = vmax.f32 %v2671_v30, 0.0 }
 0x469   : > { %v2862_v16 = vpack.c.bf16 %v2798_v3, %v2794_v28 }
 0x46a   : > { %v2863_v34 = vpack.c.bf16 %v2799_v33, %v2795_v13 }
 0x46d   : > { %3556 = vmatmul.mubr.bf16.gmra.mrb[60].mxu0 %v6695_v39 }
 0x46e   : > { %3565 = vmatprep.mubr.bf16.mxu0 %v6707_v18 }
 0x475   : > { %3566 = vmatmul.mubr.bf16.gmra.mrb[64].mxu0 %v6705_v57 }
 0x476   : > { %3575 = vmatprep.mubr.bf16.mxu0 %v6717_v52 }
 0x47d   : > { %3576 = vmatmul.mubr.bf16.gmra.mrb[68].mxu0 %v6715_v50 }
 0x47e   : > { %3585 = vmatprep.mubr.bf16.mxu0 %v6727_v14 }
 0x485   : > { %3586 = vmatmul.mubr.bf16.gmra.mrb[72].mxu0 %v6725_v22 }
 0x486   : > { %3595 = vmatprep.mubr.bf16.mxu0 %v6737_v58 }
 0x48d   : > { %3596 = vmatmul.mubr.bf16.gmra.mrb[76].mxu0 %v6735_v47 }
 0x48e   : > { %3605 = vmatprep.mubr.bf16.mxu0 %v6747_v23 }
 0x495   : > { %3606 = vmatmul.mubr.bf16.gmra.mrb[80].mxu0 %v6745_v26 }
 0x496   : > { %3615 = vmatprep.mubr.bf16.mxu0 %v2855_v12 }
 0x49d   : > { %3616 = vmatmul.mubr.bf16.gmra.mrb[84].mxu0 %v2854_v9 }
 0x49e   : > { %3625 = vmatprep.mubr.bf16.mxu0 %v2859_v38 }
 0x4a5   : > { %3626 = vmatmul.mubr.bf16.gmra.mrb[88].mxu0 %v2858_v15 }
 0x4a6   : > { %3635 = vmatprep.mubr.bf16.mxu0 %v2863_v34 }
 0x4ad   : > { %3636 = vmatmul.mubr.bf16.gmra.mrb[92].mxu0 %v2862_v16 }
 0x508   : > { %v3487_v39 = vpop.f32.mrb[32].mxu0 }
 0x509   : > { %v4745_v48 = vadd.f32 %v3487_v39, %v6783_v31  ;;  %v3489_v57 = vpop.f32.mrb[33].mxu0 }
 0x50a   : > { %v4746_v18 = vadd.f32 %v3489_v57, %v6787_v45  ;;  %v3491_v50 = vpop.f32.mrb[34].mxu0 }
 0x50b   : > { %v4747_v52 = vadd.f32 %v3491_v50, %v6783_v31  ;;  %v3493_v22 = vpop.f32.mrb[35].mxu0  ;;  %v3646_v47 = vmax.f32 %v4745_v48, 0.0 }
 0x50c   : > { %v4748_v14 = vadd.f32 %v3493_v22, %v6787_v45  ;;  %v3647_v5 = vmax.f32 %v4746_v18, 0.0 }
 0x50d   : > { %v3648_v58 = vmax.f32 %v4747_v52, 0.0 }
 0x50e   : > { %v3649_v26 = vmax.f32 %v4748_v14, 0.0 }
 0x50f   : > { %v3710_v23 = vpack.c.bf16 %v3648_v58, %v3646_v47 }
 0x510   : > { %v3711_v54 = vpack.c.bf16 %v3649_v26, %v3647_v5  ;;  %v3497_v10 = vpop.f32.mrb[36].mxu0 }
 0x511   : > { %v4749_v35 = vadd.f32 %v3497_v10, %v6783_v31  ;;  %v3499_v43 = vpop.f32.mrb[37].mxu0 }
 0x512   : > { %v4750_v42 = vadd.f32 %v3499_v43, %v6787_v45  ;;  %v3501_v46 = vpop.f32.mrb[38].mxu0  ;;  %3909 = vmatprep.mubr.bf16.mxu1 %v3711_v54 }
 0x513   : > { %v4751_v44 = vadd.f32 %v3501_v46, %v6783_v31  ;;  %v3503_v41 = vpop.f32.mrb[39].mxu0  ;;  %3910 = vmatmul.mubr.bf16.vlgmr.msra.gmra.mrb[96].mxu1 %v3710_v23  ;;  %v3650_v9 = vmax.f32 %v4749_v35, 0.0 }
 0x514   : > { %v4752_v7 = vadd.f32 %v3503_v41, %v6787_v45  ;;  %v3651_v11 = vmax.f32 %v4750_v42, 0.0 }
 0x515   : > { %v3652_v32 = vmax.f32 %v4751_v44, 0.0 }
 0x516   : > { %v3653_v12 = vmax.f32 %v4752_v7, 0.0 }
 0x517   : > { %v3712_v56 = vpack.c.bf16 %v3652_v32, %v3650_v9 }
 0x518   : > { %v3713_v53 = vpack.c.bf16 %v3653_v12, %v3651_v11  ;;  %v3507_v55 = vpop.f32.mrb[40].mxu0 }
 0x519   : > { %v4753_v59 = vadd.f32 %v3507_v55, %v6783_v31  ;;  %v3509_v62 = vpop.f32.mrb[41].mxu0 }
 0x51a   : > { %v4754_v63 = vadd.f32 %v3509_v62, %v6787_v45  ;;  %v3511_v0 = vpop.f32.mrb[42].mxu0  ;;  %3917 = vmatprep.mubr.bf16.mxu1 %v3713_v53 }
 0x51b   : > { %v4755_v1 = vadd.f32 %v3511_v0, %v6783_v31  ;;  %v3513_v2 = vpop.f32.mrb[43].mxu0  ;;  %3918 = vmatmul.mubr.bf16.gmra.mrb[100].mxu1 %v3712_v56  ;;  %v3654_v8 = vmax.f32 %v4753_v59, 0.0 }
 0x51c   : > { %v4756_v6 = vadd.f32 %v3513_v2, %v6787_v45  ;;  %v3655_v36 = vmax.f32 %v4754_v63, 0.0 }
 0x51d   : > { %v3656_v40 = vmax.f32 %v4755_v1, 0.0 }
 0x51e   : > { %v3657_v4 = vmax.f32 %v4756_v6, 0.0 }
 0x51f   : > { %v3714_v37 = vpack.c.bf16 %v3656_v40, %v3654_v8 }
 0x520   : > { %v3715_v61 = vpack.c.bf16 %v3657_v4, %v3655_v36  ;;  %v3517_v60 = vpop.f32.mrb[44].mxu0 }
 0x521   : > { %v4757_v17 = vadd.f32 %v3517_v60, %v6783_v31  ;;  %v3519_v15 = vpop.f32.mrb[45].mxu0 }
 0x522   : > { %v4758_v19 = vadd.f32 %v3519_v15, %v6787_v45  ;;  %v3521_v51 = vpop.f32.mrb[46].mxu0  ;;  %3925 = vmatprep.mubr.bf16.mxu1 %v3715_v61 }
 0x523   : > { %v4759_v38 = vadd.f32 %v3521_v51, %v6783_v31  ;;  %v3523_v20 = vpop.f32.mrb[47].mxu0  ;;  %3926 = vmatmul.mubr.bf16.gmra.mrb[104].mxu1 %v3714_v37  ;;  %v3658_v49 = vmax.f32 %v4757_v17, 0.0 }
 0x524   : > { %v4760_v21 = vadd.f32 %v3523_v20, %v6787_v45  ;;  %v3659_v27 = vmax.f32 %v4758_v19, 0.0 }
 0x525   : > { %v3660_v24 = vmax.f32 %v4759_v38, 0.0 }
 0x526   : > { %v3661_v28 = vmax.f32 %v4760_v21, 0.0 }
 0x527   : > { %v3716_v29 = vpack.c.bf16 %v3660_v24, %v3658_v49 }
 0x528   : > { %v3717_v13 = vpack.c.bf16 %v3661_v28, %v3659_v27  ;;  %v3527_v30 = vpop.f32.mrb[48].mxu0 }
 0x529   : > { %v4761_v3 = vadd.f32 %v3527_v30, %v6783_v31  ;;  %v3529_v33 = vpop.f32.mrb[49].mxu0 }
 0x52a   : > { %v4762_v16 = vadd.f32 %v3529_v33, %v6787_v45  ;;  %v3531_v34 = vpop.f32.mrb[50].mxu0  ;;  %3933 = vmatprep.mubr.bf16.mxu1 %v3717_v13 }
 0x52b   : > { %v4763_v25 = vadd.f32 %v3531_v34, %v6783_v31  ;;  %v3533_v39 = vpop.f32.mrb[51].mxu0  ;;  %3934 = vmatmul.mubr.bf16.gmra.mrb[108].mxu1 %v3716_v29  ;;  %v3662_v57 = vmax.f32 %v4761_v3, 0.0 }
 0x52c   : > { %v4764_v48 = vadd.f32 %v3533_v39, %v6787_v45  ;;  %v3663_v50 = vmax.f32 %v4762_v16, 0.0 }
 0x52d   : > { %v3664_v18 = vmax.f32 %v4763_v25, 0.0 }
 0x52e   : > { %v3665_v52 = vmax.f32 %v4764_v48, 0.0 }
 0x52f   : > { %v3718_v22 = vpack.c.bf16 %v3664_v18, %v3662_v57 }
 0x530   : > { %v3719_v14 = vpack.c.bf16 %v3665_v52, %v3663_v50  ;;  %v3537_v47 = vpop.f32.mrb[52].mxu0 }
 0x531   : > { %v4765_v58 = vadd.f32 %v3537_v47, %v6783_v31  ;;  %v3539_v5 = vpop.f32.mrb[53].mxu0 }
 0x532   : > { %v4766_v26 = vadd.f32 %v3539_v5, %v6787_v45  ;;  %v3541_v23 = vpop.f32.mrb[54].mxu0  ;;  %3941 = vmatprep.mubr.bf16.mxu1 %v3719_v14 }
 0x533   : > { %v4767_v54 = vadd.f32 %v3541_v23, %v6783_v31  ;;  %v3543_v10 = vpop.f32.mrb[55].mxu0  ;;  %3942 = vmatmul.mubr.bf16.gmra.mrb[112].mxu1 %v3718_v22  ;;  %v3666_v43 = vmax.f32 %v4765_v58, 0.0 }
 0x534   : > { %v4768_v35 = vadd.f32 %v3543_v10, %v6787_v45  ;;  %v3667_v46 = vmax.f32 %v4766_v26, 0.0 }
 0x535   : > { %v3668_v42 = vmax.f32 %v4767_v54, 0.0 }
 0x536   : > { %v3669_v44 = vmax.f32 %v4768_v35, 0.0 }
 0x537   : > { %v3720_v41 = vpack.c.bf16 %v3668_v42, %v3666_v43 }
 0x538   : > { %v3721_v7 = vpack.c.bf16 %v3669_v44, %v3667_v46  ;;  %v3547_v9 = vpop.f32.mrb[56].mxu0 }
 0x539   : > { %v4769_v32 = vadd.f32 %v3547_v9, %v6783_v31  ;;  %v3549_v11 = vpop.f32.mrb[57].mxu0 }
 0x53a   : > { %v4770_v12 = vadd.f32 %v3549_v11, %v6787_v45  ;;  %v3551_v56 = vpop.f32.mrb[58].mxu0  ;;  %3949 = vmatprep.mubr.bf16.mxu1 %v3721_v7 }
 0x53b   : > { %v4771_v53 = vadd.f32 %v3551_v56, %v6783_v31  ;;  %v3553_v55 = vpop.f32.mrb[59].mxu0  ;;  %3950 = vmatmul.mubr.bf16.gmra.mrb[116].mxu1 %v3720_v41  ;;  %v3670_v62 = vmax.f32 %v4769_v32, 0.0 }
 0x53c   : > { %v4772_v59 = vadd.f32 %v3553_v55, %v6787_v45  ;;  %v3671_v0 = vmax.f32 %v4770_v12, 0.0 }
 0x53d   : > { %v3672_v63 = vmax.f32 %v4771_v53, 0.0 }
 0x53e   : > { %v3673_v1 = vmax.f32 %v4772_v59, 0.0 }
 0x53f   : > { %v3722_v2 = vpack.c.bf16 %v3672_v63, %v3670_v62 }
 0x540   : > { %v3723_v6 = vpack.c.bf16 %v3673_v1, %v3671_v0  ;;  %v3557_v8 = vpop.f32.mrb[60].mxu0 }
 0x541   : > { %v4773_v40 = vadd.f32 %v3557_v8, %v6783_v31  ;;  %v3559_v36 = vpop.f32.mrb[61].mxu0 }
 0x542   : > { %v4774_v4 = vadd.f32 %v3559_v36, %v6787_v45  ;;  %v3561_v37 = vpop.f32.mrb[62].mxu0  ;;  %3957 = vmatprep.mubr.bf16.mxu1 %v3723_v6 }
 0x543   : > { %v4775_v61 = vadd.f32 %v3561_v37, %v6783_v31  ;;  %v3563_v60 = vpop.f32.mrb[63].mxu0  ;;  %3958 = vmatmul.mubr.bf16.gmra.mrb[120].mxu1 %v3722_v2  ;;  %v3674_v15 = vmax.f32 %v4773_v40, 0.0 }
 0x544   : > { %v4776_v17 = vadd.f32 %v3563_v60, %v6787_v45  ;;  %v3675_v51 = vmax.f32 %v4774_v4, 0.0 }
 0x545   : > { %v3676_v19 = vmax.f32 %v4775_v61, 0.0 }
 0x546   : > { %v3677_v38 = vmax.f32 %v4776_v17, 0.0 }
 0x547   : > { %v3724_v20 = vpack.c.bf16 %v3676_v19, %v3674_v15 }
 0x548   : > { %v3725_v21 = vpack.c.bf16 %v3677_v38, %v3675_v51  ;;  %v3567_v49 = vpop.f32.mrb[64].mxu0 }
 0x549   : > { %v4777_v24 = vadd.f32 %v3567_v49, %v6783_v31  ;;  %v3569_v27 = vpop.f32.mrb[65].mxu0 }
 0x54a   : > { %v4778_v28 = vadd.f32 %v3569_v27, %v6787_v45  ;;  %v3571_v29 = vpop.f32.mrb[66].mxu0  ;;  %3965 = vmatprep.mubr.bf16.mxu1 %v3725_v21 }
 0x54b   : > { %v4779_v13 = vadd.f32 %v3571_v29, %v6783_v31  ;;  %v3573_v30 = vpop.f32.mrb[67].mxu0  ;;  %3966 = vmatmul.mubr.bf16.gmra.mrb[124].mxu1 %v3724_v20  ;;  %v3678_v33 = vmax.f32 %v4777_v24, 0.0 }
 0x54c   : > { %v4780_v3 = vadd.f32 %v3573_v30, %v6787_v45  ;;  %v3679_v34 = vmax.f32 %v4778_v28, 0.0 }
 0x54d   : > { %v3680_v16 = vmax.f32 %v4779_v13, 0.0 }
 0x54e   : > { %v3681_v25 = vmax.f32 %v4780_v3, 0.0 }
 0x54f   : > { %v3726_v39 = vpack.c.bf16 %v3680_v16, %v3678_v33 }
 0x550   : > { %v3727_v48 = vpack.c.bf16 %v3681_v25, %v3679_v34  ;;  %v3577_v57 = vpop.f32.mrb[68].mxu0 }
 0x551   : > { %v4781_v18 = vadd.f32 %v3577_v57, %v6783_v31  ;;  %v3579_v50 = vpop.f32.mrb[69].mxu0 }
 0x552   : > { %v4782_v52 = vadd.f32 %v3579_v50, %v6787_v45  ;;  %v3581_v22 = vpop.f32.mrb[70].mxu0  ;;  %3973 = vmatprep.mubr.bf16.mxu1 %v3727_v48 }
 0x553   : > { %v4783_v14 = vadd.f32 %v3581_v22, %v6783_v31  ;;  %v3583_v47 = vpop.f32.mrb[71].mxu0  ;;  %3974 = vmatmul.mubr.bf16.gmra.mrb[128].mxu1 %v3726_v39  ;;  %v3682_v5 = vmax.f32 %v4781_v18, 0.0 }
 0x554   : > { %v4784_v58 = vadd.f32 %v3583_v47, %v6787_v45  ;;  %v3683_v23 = vmax.f32 %v4782_v52, 0.0 }
 0x555   : > { %v3684_v26 = vmax.f32 %v4783_v14, 0.0 }
 0x556   : > { %v3685_v54 = vmax.f32 %v4784_v58, 0.0 }
 0x557   : > { %v3728_v10 = vpack.c.bf16 %v3684_v26, %v3682_v5 }
 0x558   : > { %v3729_v35 = vpack.c.bf16 %v3685_v54, %v3683_v23  ;;  %v3587_v43 = vpop.f32.mrb[72].mxu0 }
 0x559   : > { %v4785_v42 = vadd.f32 %v3587_v43, %v6783_v31  ;;  %v3589_v46 = vpop.f32.mrb[73].mxu0 }
 0x55a   : > { %v4786_v44 = vadd.f32 %v3589_v46, %v6787_v45  ;;  %v3591_v41 = vpop.f32.mrb[74].mxu0  ;;  %3981 = vmatprep.mubr.bf16.mxu1 %v3729_v35 }
 0x55b   : > { %v4787_v7 = vadd.f32 %v3591_v41, %v6783_v31  ;;  %v3593_v9 = vpop.f32.mrb[75].mxu0  ;;  %3982 = vmatmul.mubr.bf16.gmra.mrb[132].mxu1 %v3728_v10  ;;  %v3686_v11 = vmax.f32 %v4785_v42, 0.0 }
 0x55c   : > { %v4788_v32 = vadd.f32 %v3593_v9, %v6787_v45  ;;  %v3687_v56 = vmax.f32 %v4786_v44, 0.0 }
 0x55d   : > { %v3688_v12 = vmax.f32 %v4787_v7, 0.0 }
 0x55e   : > { %v3689_v53 = vmax.f32 %v4788_v32, 0.0 }
 0x55f   : > { %v3730_v55 = vpack.c.bf16 %v3688_v12, %v3686_v11 }
 0x560   : > { %v3731_v59 = vpack.c.bf16 %v3689_v53, %v3687_v56  ;;  %v3597_v62 = vpop.f32.mrb[76].mxu0 }
 0x561   : > { %v4789_v63 = vadd.f32 %v3597_v62, %v6783_v31  ;;  %v3599_v0 = vpop.f32.mrb[77].mxu0 }
 0x562   : > { %v4790_v1 = vadd.f32 %v3599_v0, %v6787_v45  ;;  %v3601_v2 = vpop.f32.mrb[78].mxu0  ;;  %3989 = vmatprep.mubr.bf16.mxu1 %v3731_v59 }
 0x563   : > { %v4791_v6 = vadd.f32 %v3601_v2, %v6783_v31  ;;  %v3603_v8 = vpop.f32.mrb[79].mxu0  ;;  %3990 = vmatmul.mubr.bf16.gmra.mrb[136].mxu1 %v3730_v55  ;;  %v3690_v36 = vmax.f32 %v4789_v63, 0.0 }
 0x564   : > { %v4792_v40 = vadd.f32 %v3603_v8, %v6787_v45  ;;  %v3691_v37 = vmax.f32 %v4790_v1, 0.0 }
 0x565   : > { %v3692_v4 = vmax.f32 %v4791_v6, 0.0 }
 0x566   : > { %v3693_v61 = vmax.f32 %v4792_v40, 0.0 }
 0x567   : > { %v3732_v60 = vpack.c.bf16 %v3692_v4, %v3690_v36 }
 0x568   : > { %v3733_v17 = vpack.c.bf16 %v3693_v61, %v3691_v37  ;;  %v3607_v15 = vpop.f32.mrb[80].mxu0  ;;  %v6856_v37 = vld [vmem:[%s7275_s15] ss:$0 sm:$0xff] }
 0x569   : > { %v4793_v19 = vadd.f32 %v3607_v15, %v6783_v31  ;;  %v3609_v51 = vpop.f32.mrb[81].mxu0 }
 0x56a   : > { %v4794_v38 = vadd.f32 %v3609_v51, %v6787_v45  ;;  %v3611_v20 = vpop.f32.mrb[82].mxu0  ;;  %3997 = vmatprep.mubr.bf16.mxu1 %v3733_v17 }
 0x56b   : > { %v4795_v21 = vadd.f32 %v3611_v20, %v6783_v31  ;;  %v3613_v49 = vpop.f32.mrb[83].mxu0  ;;  %3998 = vmatmul.mubr.bf16.gmra.mrb[140].mxu1 %v3732_v60  ;;  %v3694_v27 = vmax.f32 %v4793_v19, 0.0 }
 0x56c   : > { %v4796_v24 = vadd.f32 %v3613_v49, %v6787_v45  ;;  %v3695_v29 = vmax.f32 %v4794_v38, 0.0 }
 0x56d   : > { %v3696_v28 = vmax.f32 %v4795_v21, 0.0 }
 0x56e   : > { %v3697_v13 = vmax.f32 %v4796_v24, 0.0 }
 0x56f   : > { %v3734_v30 = vpack.c.bf16 %v3696_v28, %v3694_v27 }
 0x570   : > { %v3735_v3 = vpack.c.bf16 %v3697_v13, %v3695_v29  ;;  %v3617_v33 = vpop.f32.mrb[84].mxu0 }
 0x571   : > { %v4797_v16 = vadd.f32 %v3617_v33, %v6783_v31  ;;  %v3619_v34 = vpop.f32.mrb[85].mxu0 }
 0x572   : > { %v4798_v25 = vadd.f32 %v3619_v34, %v6787_v45  ;;  %v3621_v39 = vpop.f32.mrb[86].mxu0  ;;  %4005 = vmatprep.mubr.bf16.mxu1 %v3735_v3 }
 0x573   : > { %v4799_v48 = vadd.f32 %v3621_v39, %v6783_v31  ;;  %v3623_v57 = vpop.f32.mrb[87].mxu0  ;;  %4006 = vmatmul.mubr.bf16.gmra.mrb[144].mxu1 %v3734_v30  ;;  %v3698_v50 = vmax.f32 %v4797_v16, 0.0 }
 0x574   : > { %v4800_v18 = vadd.f32 %v3623_v57, %v6787_v45  ;;  %v3699_v22 = vmax.f32 %v4798_v25, 0.0 }
 0x575   : > { %v3700_v52 = vmax.f32 %v4799_v48, 0.0 }
 0x576   : > { %v3701_v14 = vmax.f32 %v4800_v18, 0.0 }
 0x577   : > { %v3736_v47 = vpack.c.bf16 %v3700_v52, %v3698_v50 }
 0x578   : > { %v3737_v58 = vpack.c.bf16 %v3701_v14, %v3699_v22  ;;  %v3627_v5 = vpop.f32.mrb[88].mxu0 }
 0x579   : > { %v4801_v26 = vadd.f32 %v3627_v5, %v6783_v31  ;;  %v3629_v23 = vpop.f32.mrb[89].mxu0 }
 0x57a   : > { %v4802_v54 = vadd.f32 %v3629_v23, %v6787_v45  ;;  %v3631_v10 = vpop.f32.mrb[90].mxu0  ;;  %4013 = vmatprep.mubr.bf16.mxu1 %v3737_v58 }
 0x57b   : > { %v4803_v35 = vadd.f32 %v3631_v10, %v6783_v31  ;;  %v3633_v43 = vpop.f32.mrb[91].mxu0  ;;  %4014 = vmatmul.mubr.bf16.gmra.mrb[148].mxu1 %v3736_v47  ;;  %v3702_v46 = vmax.f32 %v4801_v26, 0.0 }
 0x57c   : > { %v4804_v42 = vadd.f32 %v3633_v43, %v6787_v45  ;;  %v3703_v41 = vmax.f32 %v4802_v54, 0.0 }
 0x57d   : > { %v3704_v44 = vmax.f32 %v4803_v35, 0.0 }
 0x57e   : > { %v3705_v7 = vmax.f32 %v4804_v42, 0.0 }
 0x57f   : > { %v3738_v9 = vpack.c.bf16 %v3704_v44, %v3702_v46 }
 0x580   : > { %v3739_v32 = vpack.c.bf16 %v3705_v7, %v3703_v41  ;;  %v3637_v11 = vpop.f32.mrb[92].mxu0 }
 0x581   : > { %v4805_v12 = vadd.f32 %v3637_v11, %v6783_v31  ;;  %v3639_v56 = vpop.f32.mrb[93].mxu0 }
 0x582   : > { %v4806_v53 = vadd.f32 %v3639_v56, %v6787_v45  ;;  %v3641_v55 = vpop.f32.mrb[94].mxu0  ;;  %4021 = vmatprep.mubr.bf16.mxu1 %v3739_v32 }
 0x583   : > { %v4807_v59 = vadd.f32 %v3641_v55, %v6783_v31  ;;  %v3643_v62 = vpop.f32.mrb[95].mxu0  ;;  %4022 = vmatmul.mubr.bf16.gmra.mrb[152].mxu1 %v3738_v9  ;;  %v3706_v0 = vmax.f32 %v4805_v12, 0.0 }
 0x584   : > { %v4808_v63 = vadd.f32 %v3643_v62, %v6787_v45  ;;  %v3707_v2 = vmax.f32 %v4806_v53, 0.0 }
 0x585   : > { %v3708_v1 = vmax.f32 %v4807_v59, 0.0 }
 0x586   : > { %v3709_v6 = vmax.f32 %v4808_v63, 0.0 }
 0x587   : > { %v3740_v8 = vpack.c.bf16 %v3708_v1, %v3706_v0 }
 0x588   : > { %v3741_v40 = vpack.c.bf16 %v3709_v6, %v3707_v2 }
 0x58a   : > { %4029 = vmatprep.mubr.bf16.mxu1 %v3741_v40 }
 0x58b   : > { %4030 = vmatmul.mubr.bf16.gmra.mrb[156].mxu1 %v3740_v8 }
 0x5e6   : > { %v4633_v36 = vpop.f32.mrb[96].mxu1 }
 0x5e7   : > { %v4634_v4 = vpop.f32.mrb[97].mxu1 }
 0x5e8   : > { %v4635_v31 = vadd.f32 %v4634_v4, %v4633_v36  ;;  %v4636_v61 = vpop.f32.mrb[98].mxu1 }
 0x5e9   : > { %v4637_v60 = vpop.f32.mrb[99].mxu1 }
 0x5ea   : > { %v4638_v17 = vadd.f32 %v4637_v60, %v4636_v61  ;;  %v6859_v45 = vadd.f32 %v4635_v31, %v6856_v37 }
 0x5ec   : > { %v6862_v15 = vadd.f32 %v4638_v17, %v6856_v37  ;;  %v4038_v19 = vmul.f32 %v6859_v45, %v6859_v45 }
 0x5ee   : > { %v4639_v51 = vpop.f32.mrb[100].mxu1  ;;  %4070 = vadd.xlane.f32.xlu0 %v4038_v19  ;;  %v4039_v49 = vmul.f32 %v6862_v15, %v6862_v15 }
 0x5ef   : > { %v4640_v38 = vpop.f32.mrb[101].mxu1 }
 0x5f0   : > { %v4641_v20 = vadd.f32 %v4640_v38, %v4639_v51  ;;  %v4642_v21 = vpop.f32.mrb[102].mxu1 }
 0x5f1   : > { %v4643_v24 = vpop.f32.mrb[103].mxu1 }
 0x5f2   : > { %v4644_v27 = vadd.f32 %v4643_v24, %v4642_v21  ;;  %4072 = vadd.xlane.f32.xlu0 %v4039_v49  ;;  %v6869_v28 = vadd.f32 %v4641_v20, %v6856_v37 }
 0x5f4   : > { %v6872_v29 = vadd.f32 %v4644_v27, %v6856_v37  ;;  %v4040_v13 = vmul.f32 %v6869_v28, %v6869_v28 }
 0x5f6   : > { %v4645_v30 = vpop.f32.mrb[104].mxu1  ;;  %4074 = vadd.xlane.f32.xlu1 %v4040_v13  ;;  %v4041_v34 = vmul.f32 %v6872_v29, %v6872_v29 }
 0x5f7   : > { %v4646_v3 = vpop.f32.mrb[105].mxu1 }
 0x5f8   : > { %v4647_v33 = vadd.f32 %v4646_v3, %v4645_v30  ;;  %v4648_v16 = vpop.f32.mrb[106].mxu1 }
 0x5f9   : > { %v4649_v25 = vpop.f32.mrb[107].mxu1 }
 0x5fa   : > { %v6879_v39 = vadd.f32 %v4647_v33, %v6856_v37  ;;  %v4650_v48 = vadd.f32 %v4649_v25, %v4648_v16  ;;  %4076 = vadd.xlane.f32.xlu1 %v4041_v34 }
 0x5fc   : > { %v6882_v57 = vadd.f32 %v4650_v48, %v6856_v37  ;;  %v4042_v18 = vmul.f32 %v6879_v39, %v6879_v39 }
 0x5fe   : > { %v4651_v50 = vpop.f32.mrb[108].mxu1  ;;  %4078 = vadd.xlane.f32.xlu0 %v4042_v18  ;;  %v4043_v52 = vmul.f32 %v6882_v57, %v6882_v57 }
 0x5ff   : > { %v4652_v22 = vpop.f32.mrb[109].mxu1 }
 0x600   : > { %v4653_v14 = vadd.f32 %v4652_v22, %v4651_v50  ;;  %v4654_v47 = vpop.f32.mrb[110].mxu1  ;;  %4080 = vadd.xlane.f32.xlu1 %v4043_v52 }
 0x601   : > { %v4655_v58 = vpop.f32.mrb[111].mxu1 }
 0x602   : > { %v6889_v5 = vadd.f32 %v4653_v14, %v6856_v37  ;;  %v4656_v26 = vadd.f32 %v4655_v58, %v4654_v47 }
 0x604   : > { %v6892_v23 = vadd.f32 %v4656_v26, %v6856_v37  ;;  %v4044_v54 = vmul.f32 %v6889_v5, %v6889_v5 }
 0x606   : > { %v4657_v10 = vpop.f32.mrb[112].mxu1  ;;  %4082 = vadd.xlane.f32.xlu0 %v4044_v54  ;;  %v4045_v35 = vmul.f32 %v6892_v23, %v6892_v23 }
 0x607   : > { %v4658_v43 = vpop.f32.mrb[113].mxu1 }
 0x608   : > { %v4659_v42 = vadd.f32 %v4658_v43, %v4657_v10  ;;  %v4660_v46 = vpop.f32.mrb[114].mxu1  ;;  %4084 = vadd.xlane.f32.xlu1 %v4045_v35 }
 0x609   : > { %v4661_v44 = vpop.f32.mrb[115].mxu1 }
 0x60a   : > { %v6899_v41 = vadd.f32 %v4659_v42, %v6856_v37  ;;  %v4662_v7 = vadd.f32 %v4661_v44, %v4660_v46 }
 0x60c   : > { %v6902_v9 = vadd.f32 %v4662_v7, %v6856_v37  ;;  %v4046_v32 = vmul.f32 %v6899_v41, %v6899_v41 }
 0x60e   : > { %v4663_v11 = vpop.f32.mrb[116].mxu1  ;;  %4086 = vadd.xlane.f32.xlu0 %v4046_v32  ;;  %v4047_v12 = vmul.f32 %v6902_v9, %v6902_v9 }
 0x60f   : > { %v4664_v56 = vpop.f32.mrb[117].mxu1 }
 0x610   : > { %v4665_v53 = vadd.f32 %v4664_v56, %v4663_v11  ;;  %v4666_v55 = vpop.f32.mrb[118].mxu1  ;;  %4088 = vadd.xlane.f32.xlu1 %v4047_v12 }
 0x611   : > { %v4667_v59 = vpop.f32.mrb[119].mxu1 }
 0x612   : > { %v6909_v62 = vadd.f32 %v4665_v53, %v6856_v37  ;;  %v4668_v63 = vadd.f32 %v4667_v59, %v4666_v55 }
 0x614   : > { %v6912_v0 = vadd.f32 %v4668_v63, %v6856_v37  ;;  %v4048_v1 = vmul.f32 %v6909_v62, %v6909_v62 }
 0x616   : > { %v4669_v2 = vpop.f32.mrb[120].mxu1  ;;  %4090 = vadd.xlane.f32.xlu0 %v4048_v1  ;;  %v4049_v6 = vmul.f32 %v6912_v0, %v6912_v0 }
 0x617   : > { %v4670_v8 = vpop.f32.mrb[121].mxu1 }
 0x618   : > { %v4671_v40 = vadd.f32 %v4670_v8, %v4669_v2  ;;  %v4672_v36 = vpop.f32.mrb[122].mxu1  ;;  %4092 = vadd.xlane.f32.xlu1 %v4049_v6 }
 0x619   : > { %v4673_v4 = vpop.f32.mrb[123].mxu1 }
 0x61a   : > { %v6919_v31 = vadd.f32 %v4671_v40, %v6856_v37  ;;  %v4674_v61 = vadd.f32 %v4673_v4, %v4672_v36 }
 0x61c   : > { %v6922_v60 = vadd.f32 %v4674_v61, %v6856_v37  ;;  %v4050_v17 = vmul.f32 %v6919_v31, %v6919_v31 }
 0x61e   : > { %v4675_v19 = vpop.f32.mrb[124].mxu1  ;;  %4094 = vadd.xlane.f32.xlu0 %v4050_v17  ;;  %v4051_v51 = vmul.f32 %v6922_v60, %v6922_v60 }
 0x61f   : > { %v4676_v38 = vpop.f32.mrb[125].mxu1 }
 0x620   : > { %v4677_v20 = vadd.f32 %v4676_v38, %v4675_v19  ;;  %v4678_v21 = vpop.f32.mrb[126].mxu1  ;;  %4096 = vadd.xlane.f32.xlu1 %v4051_v51 }
 0x621   : > { %v4679_v49 = vpop.f32.mrb[127].mxu1 }
 0x622   : > { %v6929_v24 = vadd.f32 %v4677_v20, %v6856_v37  ;;  %v4680_v27 = vadd.f32 %v4679_v49, %v4678_v21 }
 0x624   : > { %v6932_v13 = vadd.f32 %v4680_v27, %v6856_v37  ;;  %v4052_v30 = vmul.f32 %v6929_v24, %v6929_v24 }
 0x626   : > { %v4681_v3 = vpop.f32.mrb[128].mxu1  ;;  %4098 = vadd.xlane.f32.xlu0 %v4052_v30  ;;  %v4053_v33 = vmul.f32 %v6932_v13, %v6932_v13 }
 0x627   : > { %v4682_v16 = vpop.f32.mrb[129].mxu1 }
 0x628   : > { %v4683_v34 = vadd.f32 %v4682_v16, %v4681_v3  ;;  %v4684_v25 = vpop.f32.mrb[130].mxu1  ;;  %4100 = vadd.xlane.f32.xlu1 %v4053_v33 }
 0x629   : > { %v4685_v48 = vpop.f32.mrb[131].mxu1 }
 0x62a   : > { %v6939_v18 = vadd.f32 %v4683_v34, %v6856_v37  ;;  %v4686_v50 = vadd.f32 %v4685_v48, %v4684_v25 }
 0x62c   : > { %v6942_v52 = vadd.f32 %v4686_v50, %v6856_v37  ;;  %v4054_v22 = vmul.f32 %v6939_v18, %v6939_v18 }
 0x62e   : > { %v4687_v14 = vpop.f32.mrb[132].mxu1  ;;  %4102 = vadd.xlane.f32.xlu0 %v4054_v22  ;;  %v4055_v47 = vmul.f32 %v6942_v52, %v6942_v52 }
 0x62f   : > { %v4688_v58 = vpop.f32.mrb[133].mxu1 }
 0x630   : > { %v4689_v26 = vadd.f32 %v4688_v58, %v4687_v14  ;;  %v4690_v54 = vpop.f32.mrb[134].mxu1  ;;  %4104 = vadd.xlane.f32.xlu1 %v4055_v47 }
 0x631   : > { %v4691_v10 = vpop.f32.mrb[135].mxu1 }
 0x632   : > { %v6949_v35 = vadd.f32 %v4689_v26, %v6856_v37  ;;  %v4692_v43 = vadd.f32 %v4691_v10, %v4690_v54 }
 0x634   : > { %v6952_v42 = vadd.f32 %v4692_v43, %v6856_v37  ;;  %v4056_v46 = vmul.f32 %v6949_v35, %v6949_v35 }
 0x636   : > { %v4693_v44 = vpop.f32.mrb[136].mxu1  ;;  %4106 = vadd.xlane.f32.xlu0 %v4056_v46  ;;  %v4057_v7 = vmul.f32 %v6952_v42, %v6952_v42 }
 0x637   : > { %v4694_v32 = vpop.f32.mrb[137].mxu1 }
 0x638   : > { %v4695_v11 = vadd.f32 %v4694_v32, %v4693_v44  ;;  %v4696_v12 = vpop.f32.mrb[138].mxu1  ;;  %4108 = vadd.xlane.f32.xlu1 %v4057_v7 }
 0x639   : > { %v4697_v56 = vpop.f32.mrb[139].mxu1 }
 0x63a   : > { %v6959_v53 = vadd.f32 %v4695_v11, %v6856_v37  ;;  %v4698_v55 = vadd.f32 %v4697_v56, %v4696_v12 }
 0x63c   : > { %v6962_v59 = vadd.f32 %v4698_v55, %v6856_v37  ;;  %v4058_v63 = vmul.f32 %v6959_v53, %v6959_v53 }
 0x63e   : > { %v4699_v1 = vpop.f32.mrb[140].mxu1  ;;  %4110 = vadd.xlane.f32.xlu0 %v4058_v63  ;;  %v4059_v2 = vmul.f32 %v6962_v59, %v6962_v59 }
 0x63f   : > { %v4700_v6 = vpop.f32.mrb[141].mxu1 }
 0x640   : > { %v4701_v8 = vadd.f32 %v4700_v6, %v4699_v1  ;;  %v4702_v40 = vpop.f32.mrb[142].mxu1  ;;  %4112 = vadd.xlane.f32.xlu1 %v4059_v2 }
 0x641   : > { %v4703_v36 = vpop.f32.mrb[143].mxu1 }
 0x642   : > { %v6969_v4 = vadd.f32 %v4701_v8, %v6856_v37  ;;  %v4704_v61 = vadd.f32 %v4703_v36, %v4702_v40 }
 0x644   : > { %v6972_v17 = vadd.f32 %v4704_v61, %v6856_v37  ;;  %v4060_v19 = vmul.f32 %v6969_v4, %v6969_v4 }
 0x646   : > { %v4705_v51 = vpop.f32.mrb[144].mxu1  ;;  %4114 = vadd.xlane.f32.xlu0 %v4060_v19  ;;  %v4061_v38 = vmul.f32 %v6972_v17, %v6972_v17 }
 0x647   : > { %v4706_v20 = vpop.f32.mrb[145].mxu1 }
 0x648   : > { %v4707_v21 = vadd.f32 %v4706_v20, %v4705_v51  ;;  %v4708_v49 = vpop.f32.mrb[146].mxu1  ;;  %4116 = vadd.xlane.f32.xlu1 %v4061_v38 }
 0x649   : > { %v4709_v27 = vpop.f32.mrb[147].mxu1 }
 0x64a   : > { %v6979_v30 = vadd.f32 %v4707_v21, %v6856_v37  ;;  %v4710_v3 = vadd.f32 %v4709_v27, %v4708_v49 }
 0x64c   : > { %v6982_v33 = vadd.f32 %v4710_v3, %v6856_v37  ;;  %v4062_v16 = vmul.f32 %v6979_v30, %v6979_v30 }
 0x64e   : > { %v4711_v34 = vpop.f32.mrb[148].mxu1  ;;  %4118 = vadd.xlane.f32.xlu0 %v4062_v16  ;;  %v4063_v25 = vmul.f32 %v6982_v33, %v6982_v33 }
 0x64f   : > { %v4712_v48 = vpop.f32.mrb[149].mxu1 }
 0x650   : > { %v4713_v50 = vadd.f32 %v4712_v48, %v4711_v34  ;;  %v4714_v22 = vpop.f32.mrb[150].mxu1  ;;  %4120 = vadd.xlane.f32.xlu1 %v4063_v25 }
 0x651   : > { %v4715_v14 = vpop.f32.mrb[151].mxu1 }
 0x652   : > { %v6989_v47 = vadd.f32 %v4713_v50, %v6856_v37  ;;  %v4716_v58 = vadd.f32 %v4715_v14, %v4714_v22 }
 0x654   : > { %v6992_v26 = vadd.f32 %v4716_v58, %v6856_v37  ;;  %v4064_v54 = vmul.f32 %v6989_v47, %v6989_v47 }
 0x656   : > { %v4717_v10 = vpop.f32.mrb[152].mxu1  ;;  %4122 = vadd.xlane.f32.xlu0 %v4064_v54  ;;  %v4065_v43 = vmul.f32 %v6992_v26, %v6992_v26 }
 0x657   : > { %v4718_v46 = vpop.f32.mrb[153].mxu1 }
 0x658   : > { %v4719_v44 = vadd.f32 %v4718_v46, %v4717_v10  ;;  %v4720_v7 = vpop.f32.mrb[154].mxu1  ;;  %4124 = vadd.xlane.f32.xlu1 %v4065_v43 }
 0x659   : > { %v4721_v32 = vpop.f32.mrb[155].mxu1 }
 0x65a   : > { %v6999_v11 = vadd.f32 %v4719_v44, %v6856_v37  ;;  %v4722_v12 = vadd.f32 %v4721_v32, %v4720_v7 }
 0x65c   : > { %v7002_v56 = vadd.f32 %v4722_v12, %v6856_v37  ;;  %v4066_v55 = vmul.f32 %v6999_v11, %v6999_v11 }
 0x65e   : > { %v4723_v63 = vpop.f32.mrb[156].mxu1  ;;  %4126 = vadd.xlane.f32.xlu0 %v4066_v55  ;;  %v4067_v1 = vmul.f32 %v7002_v56, %v7002_v56 }
 0x65f   : > { %v4724_v2 = vpop.f32.mrb[157].mxu1 }
 0x660   : > { %v4725_v6 = vadd.f32 %v4724_v2, %v4723_v63  ;;  %v4726_v8 = vpop.f32.mrb[158].mxu1  ;;  %4128 = vadd.xlane.f32.xlu1 %v4067_v1 }
 0x661   : > { %v4727_v40 = vpop.f32.mrb[159].mxu1 }
 0x662   : > { %v7009_v36 = vadd.f32 %v4725_v6, %v6856_v37  ;;  %v4728_v61 = vadd.f32 %v4727_v40, %v4726_v8 }
 0x664   : > { %v7012_v19 = vadd.f32 %v4728_v61, %v6856_v37  ;;  %v4068_v51 = vmul.f32 %v7009_v36, %v7009_v36 }
 0x666   : > { %4130 = vadd.xlane.f32.xlu0 %v4068_v51  ;;  %v4069_v38 = vmul.f32 %v7012_v19, %v7012_v19 }
 0x668   : > { %4132 = vadd.xlane.f32.xlu1 %v4069_v38 }
 0x67b   : > { %v4071_v20 = vpop.xlane.xlu0 %4070 }
 0x67c   : > { %v4134_v21 = vmax.f32 %v4071_v20, 1e-24 }
 0x67e   : > { %5259 = vrsqrt.f32 %v4134_v21 }
 0x67f   : > { %v4073_v49 = vpop.xlane.xlu0 %4072 }
 0x680   : > { %v4135_v27 = vmax.f32 %v4073_v49, 1e-24 }
 0x682   : > { %5261 = vrsqrt.f32 %v4135_v27 }
 0x683   : > { %v4075_v3 = vpop.xlane.xlu1 %4074 }
 0x684   : > { %v4136_v16 = vmax.f32 %v4075_v3, 1e-24 }
 0x686   : > { %5263 = vrsqrt.f32 %v4136_v16 }
 0x687   : > { %v4077_v37 = vpop.xlane.xlu1 %4076 }
 0x688   : > { %v5260_v34 = vpop.eup %5259  ;;  %v4137_v25 = vmax.f32 %v4077_v37, 1e-24 }
 0x689   : > { %v4198_v48 = vmul.f32 %v5260_v34, %v6859_v45 }
 0x68a   : > { %5265 = vrsqrt.f32 %v4137_v25 }
 0x68b   : > { %4230 = vst [vmem:[%s6153_s12] sm:$0xff] %v4198_v48  ;;  %v4079_v50 = vpop.xlane.xlu0 %4078 }
 0x68c   : > { %v5262_v22 = vpop.eup %5261  ;;  %v4138_v14 = vmax.f32 %v4079_v50, 1e-24 }
 0x68d   : > { %v4199_v58 = vmul.f32 %v5262_v22, %v6862_v15  ;;  %v4081_v54 = vpop.xlane.xlu1 %4080 }
 0x68e   : > { %5267 = vrsqrt.f32 %v4138_v14  ;;  %v4139_v10 = vmax.f32 %v4081_v54, 1e-24 }
 0x68f   : > { %4231 = vst [vmem:[%s6153_s12 + $0x8] sm:$0xff] %v4199_v58 }
 0x690   : > { %v5264_v43 = vpop.eup %5263  ;;  %5269 = vrsqrt.f32 %v4139_v10 }
 0x691   : > { %v4200_v46 = vmul.f32 %v5264_v43, %v6869_v28 }
 0x693   : > { %4232 = vst [vmem:[%s6153_s12 + $0x10] sm:$0xff] %v4200_v46  ;;  %v4083_v44 = vpop.xlane.xlu0 %4082 }
 0x694   : > { %v5266_v45 = vpop.eup %5265  ;;  %v4140_v7 = vmax.f32 %v4083_v44, 1e-24 }
 0x695   : > { %v4201_v32 = vmul.f32 %v5266_v45, %v6872_v29  ;;  %v4085_v12 = vpop.xlane.xlu1 %4084 }
 0x696   : > { %5271 = vrsqrt.f32 %v4140_v7  ;;  %v4141_v15 = vmax.f32 %v4085_v12, 1e-24 }
 0x697   : > { %4233 = vst [vmem:[%s6153_s12 + $0x18] sm:$0xff] %v4201_v32 }
 0x698   : > { %v5268_v55 = vpop.eup %5267  ;;  %5273 = vrsqrt.f32 %v4141_v15 }
 0x699   : > { %v4202_v63 = vmul.f32 %v5268_v55, %v6879_v39 }
 0x69a   : > { %v5270_v1 = vpop.eup %5269 }
 0x69b   : > { %4234 = vst [vmem:[%s6153_s12 + $0x20] sm:$0xff] %v4202_v63  ;;  %v4203_v28 = vmul.f32 %v5270_v1, %v6882_v57  ;;  %v4087_v2 = vpop.xlane.xlu0 %4086 }
 0x69c   : > { %v4142_v6 = vmax.f32 %v4087_v2, 1e-24 }
 0x69d   : > { %4235 = vst [vmem:[%s6153_s12 + $0x28] sm:$0xff] %v4203_v28  ;;  %v4089_v8 = vpop.xlane.xlu1 %4088 }
 0x69e   : > { %5275 = vrsqrt.f32 %v4142_v6  ;;  %v4143_v29 = vmax.f32 %v4089_v8, 1e-24 }
 0x6a0   : > { %v5272_v40 = vpop.eup %5271  ;;  %5277 = vrsqrt.f32 %v4143_v29 }
 0x6a1   : > { %v4204_v61 = vmul.f32 %v5272_v40, %v6889_v5 }
 0x6a2   : > { %v5274_v51 = vpop.eup %5273 }
 0x6a3   : > { %4236 = vst [vmem:[%s6153_s12 + $0x30] sm:$0xff] %v4204_v61  ;;  %v4205_v39 = vmul.f32 %v5274_v51, %v6892_v23  ;;  %v4091_v38 = vpop.xlane.xlu0 %4090 }
 0x6a4   : > { %v4144_v20 = vmax.f32 %v4091_v38, 1e-24 }
 0x6a5   : > { %4237 = vst [vmem:[%s6153_s12 + $0x38] sm:$0xff] %v4205_v39  ;;  %v4093_v57 = vpop.xlane.xlu1 %4092 }
 0x6a6   : > { %5279 = vrsqrt.f32 %v4144_v20  ;;  %v4145_v21 = vmax.f32 %v4093_v57, 1e-24 }
 0x6a8   : > { %v5276_v49 = vpop.eup %5275  ;;  %5281 = vrsqrt.f32 %v4145_v21 }
 0x6a9   : > { %v4206_v27 = vmul.f32 %v5276_v49, %v6899_v41 }
 0x6aa   : > { %v5278_v3 = vpop.eup %5277 }
 0x6ab   : > { %4238 = vst [vmem:[%s6153_s12 + $0x40] sm:$0xff] %v4206_v27  ;;  %v4207_v5 = vmul.f32 %v5278_v3, %v6902_v9  ;;  %v4095_v16 = vpop.xlane.xlu0 %4094 }
 0x6ac   : > { %v4146_v37 = vmax.f32 %v4095_v16, 1e-24 }
 0x6ad   : > { %4239 = vst [vmem:[%s6153_s12 + $0x48] sm:$0xff] %v4207_v5  ;;  %v4097_v23 = vpop.xlane.xlu1 %4096 }
 0x6ae   : > { %5283 = vrsqrt.f32 %v4146_v37  ;;  %v4147_v34 = vmax.f32 %v4097_v23, 1e-24 }
 0x6b0   : > { %v5280_v25 = vpop.eup %5279  ;;  %5285 = vrsqrt.f32 %v4147_v34 }
 0x6b1   : > { %v4208_v48 = vmul.f32 %v5280_v25, %v6909_v62 }
 0x6b2   : > { %v5282_v50 = vpop.eup %5281 }
 0x6b3   : > { %4240 = vst [vmem:[%s6153_s12 + $0x50] sm:$0xff] %v4208_v48  ;;  %v4209_v41 = vmul.f32 %v5282_v50, %v6912_v0  ;;  %v4099_v22 = vpop.xlane.xlu0 %4098 }
 0x6b4   : > { %v4148_v14 = vmax.f32 %v4099_v22, 1e-24 }
 0x6b5   : > { %4241 = vst [vmem:[%s6153_s12 + $0x58] sm:$0xff] %v4209_v41  ;;  %v4101_v9 = vpop.xlane.xlu1 %4100 }
 0x6b6   : > { %5287 = vrsqrt.f32 %v4148_v14  ;;  %v4149_v58 = vmax.f32 %v4101_v9, 1e-24 }
 0x6b8   : > { %v5284_v54 = vpop.eup %5283  ;;  %5289 = vrsqrt.f32 %v4149_v58 }
 0x6b9   : > { %v4210_v10 = vmul.f32 %v5284_v54, %v6919_v31 }
 0x6ba   : > { %v5286_v43 = vpop.eup %5285 }
 0x6bb   : > { %4242 = vst [vmem:[%s6153_s12 + $0x60] sm:$0xff] %v4210_v10  ;;  %v4211_v62 = vmul.f32 %v5286_v43, %v6922_v60  ;;  %v4103_v46 = vpop.xlane.xlu0 %4102 }
 0x6bc   : > { %v4150_v44 = vmax.f32 %v4103_v46, 1e-24 }
 0x6bd   : > { %4243 = vst [vmem:[%s6153_s12 + $0x68] sm:$0xff] %v4211_v62  ;;  %v4105_v0 = vpop.xlane.xlu1 %4104 }
 0x6be   : > { %5291 = vrsqrt.f32 %v4150_v44  ;;  %v4151_v45 = vmax.f32 %v4105_v0, 1e-24 }
 0x6c0   : > { %v5288_v7 = vpop.eup %5287  ;;  %5293 = vrsqrt.f32 %v4151_v45 }
 0x6c1   : > { %v4212_v32 = vmul.f32 %v5288_v7, %v6929_v24 }
 0x6c2   : > { %v5290_v12 = vpop.eup %5289 }
 0x6c3   : > { %4244 = vst [vmem:[%s6153_s12 + $0x70] sm:$0xff] %v4212_v32  ;;  %v4213_v31 = vmul.f32 %v5290_v12, %v6932_v13  ;;  %v4107_v15 = vpop.xlane.xlu0 %4106 }
 0x6c4   : > { %v4152_v55 = vmax.f32 %v4107_v15, 1e-24 }
 0x6c5   : > { %4245 = vst [vmem:[%s6153_s12 + $0x78] sm:$0xff] %v4213_v31  ;;  %v4109_v60 = vpop.xlane.xlu1 %4108 }
 0x6c6   : > { %5295 = vrsqrt.f32 %v4152_v55  ;;  %v4153_v63 = vmax.f32 %v4109_v60, 1e-24 }
 0x6c8   : > { %v5292_v1 = vpop.eup %5291  ;;  %5297 = vrsqrt.f32 %v4153_v63 }
 0x6c9   : > { %v4214_v28 = vmul.f32 %v5292_v1, %v6939_v18 }
 0x6ca   : > { %v5294_v2 = vpop.eup %5293 }
 0x6cb   : > { %4246 = vst [vmem:[%s6153_s12 + $0x80] sm:$0xff] %v4214_v28  ;;  %v4215_v24 = vmul.f32 %v5294_v2, %v6942_v52  ;;  %v4111_v6 = vpop.xlane.xlu0 %4110 }
 0x6cc   : > { %v4154_v8 = vmax.f32 %v4111_v6, 1e-24 }
 0x6cd   : > { %4247 = vst [vmem:[%s6153_s12 + $0x88] sm:$0xff] %v4215_v24  ;;  %v4113_v13 = vpop.xlane.xlu1 %4112 }
 0x6ce   : > { %5299 = vrsqrt.f32 %v4154_v8  ;;  %v4155_v29 = vmax.f32 %v4113_v13, 1e-24 }
 0x6d0   : > { %v5296_v40 = vpop.eup %5295  ;;  %5301 = vrsqrt.f32 %v4155_v29 }
 0x6d1   : > { %v4216_v61 = vmul.f32 %v5296_v40, %v6949_v35 }
 0x6d2   : > { %v5298_v51 = vpop.eup %5297 }
 0x6d3   : > { %4248 = vst [vmem:[%s6153_s12 + $0x90] sm:$0xff] %v4216_v61  ;;  %v4217_v18 = vmul.f32 %v5298_v51, %v6952_v42  ;;  %v4115_v39 = vpop.xlane.xlu0 %4114 }
 0x6d4   : > { %v4156_v38 = vmax.f32 %v4115_v39, 1e-24 }
 0x6d5   : > { %4249 = vst [vmem:[%s6153_s12 + $0x98] sm:$0xff] %v4217_v18  ;;  %v4117_v52 = vpop.xlane.xlu1 %4116 }
 0x6d6   : > { %5303 = vrsqrt.f32 %v4156_v38  ;;  %v4157_v20 = vmax.f32 %v4117_v52, 1e-24 }
 0x6d8   : > { %v5300_v57 = vpop.eup %5299  ;;  %5305 = vrsqrt.f32 %v4157_v20 }
 0x6d9   : > { %v4218_v21 = vmul.f32 %v5300_v57, %v6959_v53 }
 0x6da   : > { %v5302_v49 = vpop.eup %5301 }
 0x6db   : > { %4250 = vst [vmem:[%s6153_s12 + $0xa0] sm:$0xff] %v4218_v21  ;;  %v4219_v35 = vmul.f32 %v5302_v49, %v6962_v59  ;;  %v4119_v27 = vpop.xlane.xlu0 %4118 }
 0x6dc   : > { %v4158_v3 = vmax.f32 %v4119_v27, 1e-24 }
 0x6dd   : > { %4251 = vst [vmem:[%s6153_s12 + $0xa8] sm:$0xff] %v4219_v35  ;;  %v4121_v42 = vpop.xlane.xlu1 %4120 }
 0x6de   : > { %5307 = vrsqrt.f32 %v4158_v3  ;;  %v4159_v5 = vmax.f32 %v4121_v42, 1e-24 }
 0x6e0   : > { %v5304_v16 = vpop.eup %5303  ;;  %5309 = vrsqrt.f32 %v4159_v5 }
 0x6e1   : > { %v4220_v37 = vmul.f32 %v5304_v16, %v6969_v4 }
 0x6e2   : > { %v5306_v23 = vpop.eup %5305 }
 0x6e3   : > { %4252 = vst [vmem:[%s6153_s12 + $0xb0] sm:$0xff] %v4220_v37  ;;  %v4221_v53 = vmul.f32 %v5306_v23, %v6972_v17  ;;  %v4123_v34 = vpop.xlane.xlu0 %4122 }
 0x6e4   : > { %v4160_v25 = vmax.f32 %v4123_v34, 1e-24 }
 0x6e5   : > { %4253 = vst [vmem:[%s6153_s12 + $0xb8] sm:$0xff] %v4221_v53  ;;  %v4125_v59 = vpop.xlane.xlu1 %4124 }
 0x6e6   : > { %5311 = vrsqrt.f32 %v4160_v25  ;;  %v4161_v48 = vmax.f32 %v4125_v59, 1e-24 }
 0x6e8   : > { %v5308_v50 = vpop.eup %5307  ;;  %5313 = vrsqrt.f32 %v4161_v48 }
 0x6e9   : > { %v4222_v41 = vmul.f32 %v5308_v50, %v6979_v30 }
 0x6ea   : > { %v5310_v22 = vpop.eup %5309 }
 0x6eb   : > { %4254 = vst [vmem:[%s6153_s12 + $0xc0] sm:$0xff] %v4222_v41  ;;  %v4223_v4 = vmul.f32 %v5310_v22, %v6982_v33  ;;  %v4127_v14 = vpop.xlane.xlu0 %4126 }
 0x6ec   : > { %v4162_v9 = vmax.f32 %v4127_v14, 1e-24 }
 0x6ed   : > { %4255 = vst [vmem:[%s6153_s12 + $0xc8] sm:$0xff] %v4223_v4  ;;  %v4129_v17 = vpop.xlane.xlu1 %4128 }
 0x6ee   : > { %5315 = vrsqrt.f32 %v4162_v9  ;;  %v4163_v58 = vmax.f32 %v4129_v17, 1e-24 }
 0x6f0   : > { %v5312_v54 = vpop.eup %5311  ;;  %5317 = vrsqrt.f32 %v4163_v58 }
 0x6f1   : > { %v4224_v10 = vmul.f32 %v5312_v54, %v6989_v47 }
 0x6f2   : > { %v5314_v43 = vpop.eup %5313 }
 0x6f3   : > { %4256 = vst [vmem:[%s6153_s12 + $0xd0] sm:$0xff] %v4224_v10  ;;  %v4225_v30 = vmul.f32 %v5314_v43, %v6992_v26  ;;  %v4131_v62 = vpop.xlane.xlu0 %4130 }
 0x6f4   : > { %v4164_v46 = vmax.f32 %v4131_v62, 1e-24 }
 0x6f5   : > { %4257 = vst [vmem:[%s6153_s12 + $0xd8] sm:$0xff] %v4225_v30  ;;  %v4133_v33 = vpop.xlane.xlu1 %4132 }
 0x6f6   : > { %5319 = vrsqrt.f32 %v4164_v46  ;;  %v4165_v44 = vmax.f32 %v4133_v33, 1e-24 }
 0x6f8   : > { %v5316_v0 = vpop.eup %5315  ;;  %5321 = vrsqrt.f32 %v4165_v44 }
 0x6f9   : > { %v4226_v45 = vmul.f32 %v5316_v0, %v6999_v11 }
 0x6fa   : > { %v5318_v7 = vpop.eup %5317 }
 0x6fb   : > { %4258 = vst [vmem:[%s6153_s12 + $0xe0] sm:$0xff] %v4226_v45  ;;  %v4227_v47 = vmul.f32 %v5318_v7, %v7002_v56 }
 0x6fd   : > { %4259 = vst [vmem:[%s6153_s12 + $0xe8] sm:$0xff] %v4227_v47 }
 0x700   : > { %v5320_v32 = vpop.eup %5319 }
 0x701   : > { %v4228_v26 = vmul.f32 %v5320_v32, %v7009_v36 }
 0x702   : > { %v5322_v12 = vpop.eup %5321 }
 0x703   : > { %4260 = vst [vmem:[%s6153_s12 + $0xf0] sm:$0xff] %v4228_v26  ;;  %v4229_v31 = vmul.f32 %v5322_v12, %v7012_v19 }
 0x705   : > { %4261 = vst [vmem:[%s6153_s12 + $0xf8] sm:$0xff] %v4229_v31 }
 0x706 PF: > { %s7276_s3 = sld [smem:[#allocation24_spill]]  ;;  %s7278_s24 = sld [smem:[#allocation27_spill]] }
 0x707   : > { %s7279_s13 = sld [smem:[#allocation39_spill]]  ;;  %s4276_s19 = sshll.u32 %s6153_s12, 4  ;;  %s7089_s19 = int_to_ptr.vmem [resolvable:$true] %s4276_s19 }
 0x708   : > { %s7093_s30 = scalar_lea.sflag [#allocation5], %s421_s5  ;;  %s5497_s6 = scalar_lea.vmem %s7089_s19, 4096 }
 0x709   : > { %p5498_p6 = scmp.ne.s32.totalorder %s7089_s19, %s5497_s6  ;;  %s5676_s8 = smov [#allocation14]  }
 0x70a   : > { %s5501_s28 = sshll.u32 %s5676_s8, 4  ;;  %s5502_s28 = int_to_ptr.vmem [resolvable:$false] %s5501_s28 }
 0x70b   : > { %s5503_s15 = scalar_lea.vmem %s5502_s28, 8192  ;;  %p5504_p11 = scmp.lt.s32.totalorder %s7089_s19, %s5502_s28 }
 0x70c   : > { %s4616_s2 = sshll.u32 %s7276_s3, 12  ;;  %p7281_p1 = scmp.ne.s32.totalorder %s7278_s24, 0 }
 0x70d   : > { %s7280_s26 = smov %s7279_s13  ;;  %s7086_s4 = scalar_lea.hbm %s7279_s13, %s4616_s2 }
 0x70e   : > { %p5499_p4 = pnand %p5498_p6, %p7281_p1  ;;  %p5505_p13 = scmp.lt.s32.totalorder %s5503_s15, %s5497_s6 }
 0x710   : > { %p5500_p8 = pneg %p5499_p4  ;;  %p5506_p7 = por %p5505_p13, %p5504_p11 }
 0x712   : > { %p5507_p5 = pnand %p5506_p7, %p5500_p8 }
 0x714   : > { %5510 = shalt.err (!%p5507_p5)
}
 0x715   : > { %s5511_s5 = scalar_lea.hbm %s7086_s4, 4096  ;;  %s5515_s27 = scalar_lea.hbm %s7280_s26, 8192 }
 0x716   : > { %p5512_p12 = scmp.ne.s32.totalorder %s7086_s4, %s5511_s5  ;;  %p5516_p10 = scmp.lt.u32.totalorder %s7086_s4, %s7280_s26 }
 0x717   : > { %p5517_p2 = scmp.lt.u32.totalorder %s5515_s27, %s5511_s5  ;;  %p5519_p6 = scmp.lt.u32.totalorder %s5511_s5, %s7086_s4 }
 0x718   : > { %p5513_p0 = pnand %p5512_p12, %p7281_p1 }
 0x719   : > { %p5518_p9 = por %p5517_p2, %p5516_p10 }
 0x71a   : > { %p5514_p3 = pneg %p5513_p0 }
 0x71b   : > { %p5520_p4 = por %p5519_p6, %p5518_p9 }
 0x71d   : > { %p5521_p8 = pnand %p5520_p4, %p5514_p3 }
 0x71f   : > { %5524 = shalt.err (!%p5521_p8)
}
 0x720   : > { %s5677_s23 = smov 128   ;;  %s5678_s13 = smov 8  }
 0x721   : > { %4891 = dma.vmem_to_hbm [thread:$0]  (%p7281_p1), %s7089_s19, 4096, %s7086_s4, %s7093_s30, %s5677_s23, %s5677_s23, %s5678_s13  }
 0x722 PF: > { %s7282_s6 = sld [smem:[#allocation21_spill]]  ;;  %s7283_s8 = sld [smem:[#allocation28_spill]] }
 0x723   : > { %p4924_p11 = scmp.ge.s32.totalorder %s5659_s22, 2 }
 0x728   : > { %s4291_s28 = sand.u32 1, %s7282_s6   ;;  %p7284_p13 = scmp.ne.s32.totalorder %s7283_s8, 0 }
 0x729   : > { %s4292_s15 = scalar_lea.sflag [#allocation5], %s4291_s28 }
 0x72a   : > { %p4914_p7 = pnand %p4924_p11, %p7284_p13 }
 0x72c   : > { %5602 = dma.done.wait (!%p4914_p7), %s4292_s15, 4096  }
 0x72d   : > { %5604 = vsyncadd (!%p4914_p7), %s4292_s15, 4294963200  ;;  %s30_s22 = sadd.s32 1, %s5659_s22   ;;  %s7286_s12 = sld [smem:[#allocation22_spill]] }
 0x72e   : > { %p7122_p5 = scmp.ge.s32.totalorder %s30_s22, 6   ;;  %s7287_s24 = sld [smem:[#allocation29_spill]] }
 0x72f   : > { %s7288_s30 = smov %s5611_s10  ;;  %s7289_s10 = smov %s5615_s11 }
 0x730   : > { %s7290_s11 = smov %s6061_s7  ;;  %s7291_s13 = smov %s5627_s14 }
 0x731   : > { %s7292_s14 = smov %s6005_s25  ;;  %s7293_s15 = smov %s5635_s16 }
 0x732   : > { %s7294_s16 = smov %s5639_s17  ;;  %s7295_s17 = smov %s6008_s1 }
 0x733   : > { %s7296_s18 = smov %s5651_s20  ;;  %s7297_s19 = smov %s5655_s21 }
 0x734   : > { %s7298_s20 = smov %s7287_s24  ;;  %s7299_s21 = smov %s7305_s9 }
 0x735   :  { %29 = sbr.rel (!%p7122_p5) target bundleno = 24 (0x18), region = 145 }
 0x73c   :  { %4297 = vsyncpa [#allocation4], 1 }
 0x73d   :  { %4299 = vsyncpa [#allocation4 + $0x1], 1 }
 0x73e   :  { %4300 = vsyncpa [#allocation7], 1 }
 0x73f   :  { %4302 = vsyncpa [#allocation7 + $0x1], 1 }
 0x740   :  { %4303 = vsyncpa [#allocation10], 1 }
 0x741   :  { %4304 = vsyncpa [#allocation13], 1 }
 0x742   :  { %4305 = vsyncpa [#allocation5], 1 }
 0x743   :  { %4307 = vsyncpa [#allocation5 + $0x1], 1 }

</bundles_post_ra>
